<compile_context>
chip_gen: v6e
topology: v6e:2x2x1
jax: 0.10.0
libtpu: 0.0.40
codegen_flags: <defaults>
</compile_context>

<pallas_src>
import math

import jax
import jax.numpy as jnp
from jax.experimental import pallas as pl
from jax.experimental.pallas import tpu as pltpu


# ----------------------------------------------------------------------------
# Fused kernel: Q/K/V convs (as matmuls) + per-channel attention, one batch per step
# ----------------------------------------------------------------------------
def _make_fused_kernel(C, H, W, inv_scale):
    HW = H * W

    def kernel(wq_ref, bq_ref, wkv_ref, bkv_ref, x_ref, ycols_ref, o_ref,
               q_s, kv_s):
        # ---- Convs as lane-dense MXU matmuls (N = H*W = 256 lanes) ----
        # Q = Wq @ x + bq                      : (C, HW)
        qf = jnp.dot(wq_ref[...], x_ref[0],
                     preferred_element_type=jnp.float32) + bq_ref[...]
        # [K; V] = Wkv @ im2col(y) + bkv       : (2C, HW)  (y_cols read once)
        kvf = jnp.dot(wkv_ref[...], ycols_ref[0],
                      preferred_element_type=jnp.float32) + bkv_ref[...]

        # ---- Bridge flat (.., HW) -> (.., H, W) scratch via static slice stores ----
        # (avoids relying on in-kernel lane-splitting reshapes)
        for h in range(H):
            q_s[:, h, :] = qf[:, h * W:(h + 1) * W]
            kv_s[:, h, :] = kvf[:, h * W:(h + 1) * W]

        # ---- Attention: all C channels of this batch in one grid step (unrolled) ----
        for c in range(C):
            q = q_s[c]           # (H, W)
            k = kv_s[c]          # (H, W)
            v = kv_s[C + c]      # (H, W)

            # scores = Q @ K^T / scaler, softmax over last axis
            s1 = jnp.dot(q, k.T, preferred_element_type=jnp.float32) * inv_scale
            s1 = s1 - jnp.max(s1, axis=-1, keepdims=True)
            e1 = jnp.exp(s1)
            # approx=True would use the EUP fast reciprocal; kept exact for 1e-4 check.
            a1 = e1 * pl.reciprocal(jnp.sum(e1, axis=-1, keepdims=True), approx=False)

            # s2 = Q^T @ K / scaler, softmax over second-to-last axis
            s2 = jnp.dot(q.T, k, preferred_element_type=jnp.float32) * inv_scale
            s2 = s2 - jnp.max(s2, axis=-2, keepdims=True)
            e2 = jnp.exp(s2)
            a2 = e2 * pl.reciprocal(jnp.sum(e2, axis=-2, keepdims=True), approx=False)

            tmp = jnp.dot(a1, v, preferred_element_type=jnp.float32)        # (H, W)
            o_ref[0, c] = jnp.dot(tmp, a2, preferred_element_type=jnp.float32)

    return kernel


# ----------------------------------------------------------------------------
# Glue: im2col for the 3x3 convs (built once, consumed once), full forward pass
# ----------------------------------------------------------------------------
def _im2col_3x3(y):
    """y: (B, C, H, W) -> (B, C*9, H*W), ordered (c, kh, kw) to match
    PyTorch's weight.reshape(Cout, Cin*3*3)."""
    B, C, H, W = y.shape
    y_pad = jnp.pad(y, ((0, 0), (0, 0), (1, 1), (1, 1)))
    shifts = [y_pad[:, :, dh:dh + H, dw:dw + W] for dh in range(3) for dw in range(3)]
    patches = jnp.stack(shifts, axis=2)  # (B, C, 9, H, W)
    return patches.reshape(B, C * 9, H * W)


def encdec_attention_forward(x, y, params):
    """x, y: (B, C, H, W) float32 (NCHW). Returns (B, C, H, W)."""
    B, C, H, W = x.shape
    HW = H * W
    scaler = math.sqrt(float(C))

    wq, bq, wk, bk, wv, bv = params

    # Flatten / pack parameters so the kernel only does 2 matmuls for the convs.
    wq2 = wq.reshape(C, C)
    bq2 = bq.reshape(C, 1)
    wkv = jnp.concatenate([wk.reshape(C, C * 9), wv.reshape(C, C * 9)], axis=0)  # (2C, 9C)
    bkv = jnp.concatenate([bk, bv], axis=0).reshape(2 * C, 1)

    x_flat = x.reshape(B, C, HW)
    # TODO(synk): im2col is built in the wrapper (9x expansion in HBM); moving the 9
    # shifted reads into the kernel needs lane-splitting reshapes of VMEM slices.
    y_cols = _im2col_3x3(y)                                                   # (B, 9C, HW)

    # Cost hint for XLA's scheduler.
    flops = B * (2 * C * C * HW + 2 * (2 * C) * (9 * C) * HW + C * 4 * H * W * (H + W))
    transcendentals = B * C * (H * H + W * W)
    bytes_accessed = 4 * (B * C * HW          # x
                          + B * 9 * C * HW    # y_cols
                          + C * C + 2 * C * 9 * C + 3 * C  # weights/biases
                          + B * C * HW)       # output

    kernel = _make_fused_kernel(C, H, W, 1.0 / scaler)
    out = pl.pallas_call(
        kernel,
        out_shape=jax.ShapeDtypeStruct((B, C, H, W), jnp.float32),
        grid=(B,),
        in_specs=[
            pl.BlockSpec((C, C), lambda b: (0, 0)),            # wq
            pl.BlockSpec((C, 1), lambda b: (0, 0)),            # bq
            pl.BlockSpec((2 * C, 9 * C), lambda b: (0, 0)),    # wkv
            pl.BlockSpec((2 * C, 1), lambda b: (0, 0)),        # bkv
            pl.BlockSpec((1, C, HW), lambda b: (b, 0, 0)),     # x (lane-dense)
            pl.BlockSpec((1, 9 * C, HW), lambda b: (b, 0, 0)), # y_cols (lane-dense)
        ],
        out_specs=pl.BlockSpec((1, C, H, W), lambda b: (b, 0, 0, 0)),
        scratch_shapes=[
            pltpu.VMEM((C, H, W), jnp.float32),       # Q
            pltpu.VMEM((2 * C, H, W), jnp.float32),   # K;V
        ],
        compiler_params=pltpu.CompilerParams(dimension_semantics=("parallel",)),
        cost_estimate=pl.CostEstimate(flops=flops,
                                      transcendentals=transcendentals,
                                      bytes_accessed=bytes_accessed),
    )(wq2, bq2, wkv, bkv, x_flat, y_cols)
    # TODO(synk): Dropout2d is treated as identity (inference semantics).
    return out


# ----------------------------------------------------------------------------
# Pure-JAX reference for verification
# ----------------------------------------------------------------------------
def _ref_forward(x, y, params):
    wq, bq, wk, bk, wv, bv = params
    C = x.shape[1]
    scaler = math.sqrt(float(C))
    dn = ("NCHW", "OIHW", "NCHW")

    Q = jax.lax.conv_general_dilated(x, wq, (1, 1), "VALID", dimension_numbers=dn)
    Q = Q + bq[None, :, None, None]
    K = jax.lax.conv_general_dilated(
        y, wk, (1, 1), ((1, 1), (1, 1)), dimension_numbers=dn
    ) + bk[None, :, None, None]
    V = jax.lax.conv_general_dilated(
        y, wv, (1, 1), ((1, 1), (1, 1)), dimension_numbers=dn
    ) + bv[None, :, None, None]

    scores = jnp.einsum("bchw,bcgw->bchg", Q, K) / scaler      # (B,C,H,H)
    a1 = jax.nn.softmax(scores, axis=-1)
    s2 = jnp.einsum("bchw,bchv->bcwv", Q, K) / scaler          # (B,C,W,W)
    a2 = jax.nn.softmax(s2, axis=-2)
    tmp = jnp.einsum("bchg,bcgw->bchw", a1, V)
    return jnp.einsum("bchw,bcwv->bchv", tmp, a2)


# ----------------------------------------------------------------------------
if __name__ == "__main__":
    B, C, H, W = 2, 8, 16, 16  # dim = 8

    key = jax.random.PRNGKey(0)
    keys = jax.random.split(key, 8)
    x = jax.random.normal(keys[0], (B, C, H, W), jnp.float32)
    y = jax.random.normal(keys[1], (B, C, H, W), jnp.float32)

    # Deterministic parameter init (Conv2d-shaped weights/biases).
    wq = jax.random.normal(keys[2], (C, C, 1, 1), jnp.float32) * 0.1
    bq = jax.random.normal(keys[3], (C,), jnp.float32) * 0.1
    wk = jax.random.normal(keys[4], (C, C, 3, 3), jnp.float32) * 0.1
    bk = jax.random.normal(keys[5], (C,), jnp.float32) * 0.1
    wv = jax.random.normal(keys[6], (C, C, 3, 3), jnp.float32) * 0.1
    bv = jax.random.normal(keys[7], (C,), jnp.float32) * 0.1
    params = (wq, bq, wk, bk, wv, bv)

    fwd = jax.jit(encdec_attention_forward)
    out = jax.block_until_ready(fwd(x, y, params))

    ref = jax.block_until_ready(_ref_forward(x, y, params))
    assert out.shape == (B, C, H, W)
    assert jnp.allclose(out, ref, rtol=1e-4, atol=1e-4), (
        f"max abs err = {jnp.max(jnp.abs(out - ref))}"
    )

    print("KERNEL_OK")
</pallas_src>

<mosaic_0001>
module attributes {stable_mosaic.version = 11 : i64} {
  func.func @kernel(%arg0: i32, %arg1: memref<8x8xf32, #tpu.memory_space<vmem>>, %arg2: memref<8x1xf32, #tpu.memory_space<vmem>>, %arg3: memref<16x72xf32, #tpu.memory_space<vmem>>, %arg4: memref<16x1xf32, #tpu.memory_space<vmem>>, %arg5: memref<1x8x256xf32, #tpu.memory_space<vmem>>, %arg6: memref<1x72x256xf32, #tpu.memory_space<vmem>>, %arg7: memref<1x8x16x16xf32, #tpu.memory_space<vmem>>, %arg8: memref<8x16x16xf32, #tpu.memory_space<vmem>>, %arg9: memref<16x16x16xf32, #tpu.memory_space<vmem>>) attributes {dimension_semantics = [#tpu.dimension_semantics<parallel>], iteration_bounds = array<i64: 2>, scalar_prefetch = 0 : i64, scratch_operands = 2 : i64, tpu.core_type = #tpu.core_type<tc>, window_params = [{pipeline_mode = #tpu.pipeline_mode<synchronous>, transform_indices = @transform_0, window_bounds = array<i64: 8, 8>}, {pipeline_mode = #tpu.pipeline_mode<synchronous>, transform_indices = @transform_1, window_bounds = array<i64: 8, 1>}, {pipeline_mode = #tpu.pipeline_mode<synchronous>, transform_indices = @transform_2, window_bounds = array<i64: 16, 72>}, {pipeline_mode = #tpu.pipeline_mode<synchronous>, transform_indices = @transform_3, window_bounds = array<i64: 16, 1>}, {transform_indices = @transform_4, window_bounds = array<i64: 1, 8, 256>}, {transform_indices = @transform_5, window_bounds = array<i64: 1, 72, 256>}, {transform_indices = @transform_6, window_bounds = array<i64: 1, 8, 16, 16>}]} {
    %c0 = arith.constant 0 : index
    %c0_0 = arith.constant 0 : index
    %0 = vector.load %arg1[%c0, %c0_0] : memref<8x8xf32, #tpu.memory_space<vmem>>, vector<8x8xf32>
    %c0_1 = arith.constant 0 : index
    %c0_2 = arith.constant 0 : index
    %c0_3 = arith.constant 0 : index
    %1 = vector.load %arg5[%c0_1, %c0_2, %c0_3] : memref<1x8x256xf32, #tpu.memory_space<vmem>>, vector<1x8x256xf32>
    %2 = vector.shape_cast %1 : vector<1x8x256xf32> to vector<8x256xf32>
    %cst = arith.constant dense<0.000000e+00> : vector<8x256xf32>
    %3 = tpu.matmul %0, %2, %cst {dimension_numbers = #tpu.dot_dimension_numbers<[1], [0], [0], [1], [0, 0, 1, 1], [], []>} : vector<8x8xf32>, vector<8x256xf32>, vector<8x256xf32> -> vector<8x256xf32>
    %c0_4 = arith.constant 0 : index
    %c0_5 = arith.constant 0 : index
    %4 = vector.load %arg2[%c0_4, %c0_5] : memref<8x1xf32, #tpu.memory_space<vmem>>, vector<8x1xf32>
    %5 = vector.broadcast %4 : vector<8x1xf32> to vector<8x256xf32>
    %6 = arith.addf %3, %5 : vector<8x256xf32>
    %c0_6 = arith.constant 0 : index
    %c0_7 = arith.constant 0 : index
    %7 = vector.load %arg3[%c0_6, %c0_7] : memref<16x72xf32, #tpu.memory_space<vmem>>, vector<16x72xf32>
    %c0_8 = arith.constant 0 : index
    %c0_9 = arith.constant 0 : index
    %c0_10 = arith.constant 0 : index
    %8 = vector.load %arg6[%c0_8, %c0_9, %c0_10] : memref<1x72x256xf32, #tpu.memory_space<vmem>>, vector<1x72x256xf32>
    %9 = vector.shape_cast %8 : vector<1x72x256xf32> to vector<72x256xf32>
    %cst_11 = arith.constant dense<0.000000e+00> : vector<16x256xf32>
    %10 = tpu.matmul %7, %9, %cst_11 {dimension_numbers = #tpu.dot_dimension_numbers<[1], [0], [0], [1], [0, 0, 1, 1], [], []>} : vector<16x72xf32>, vector<72x256xf32>, vector<16x256xf32> -> vector<16x256xf32>
    %c0_12 = arith.constant 0 : index
    %c0_13 = arith.constant 0 : index
    %11 = vector.load %arg4[%c0_12, %c0_13] : memref<16x1xf32, #tpu.memory_space<vmem>>, vector<16x1xf32>
    %12 = vector.broadcast %11 : vector<16x1xf32> to vector<16x256xf32>
    %13 = arith.addf %10, %12 : vector<16x256xf32>
    %14 = vector.extract_strided_slice %6 {offsets = [0, 0], sizes = [8, 16], strides = [1, 1]} : vector<8x256xf32> to vector<8x16xf32>
    %c0_14 = arith.constant 0 : index
    %c0_15 = arith.constant 0 : index
    %c0_16 = arith.constant 0 : index
    %15 = vector.load %arg8[%c0_14, %c0_15, %c0_16] : memref<8x16x16xf32, #tpu.memory_space<vmem>>, vector<8x1x16xf32>
    %16 = vector.shape_cast %15 : vector<8x1x16xf32> to vector<8x16xf32>
    %17 = vector.shape_cast %14 : vector<8x16xf32> to vector<8x1x16xf32>
    tpu.vector_store %arg8[%c0_14, %c0_15, %c0_16], %17 {strides = array<i32>} : memref<8x16x16xf32, #tpu.memory_space<vmem>>, vector<8x1x16xf32>,
    %18 = vector.extract_strided_slice %13 {offsets = [0, 0], sizes = [16, 16], strides = [1, 1]} : vector<16x256xf32> to vector<16x16xf32>
    %c0_17 = arith.constant 0 : index
    %c0_18 = arith.constant 0 : index
    %c0_19 = arith.constant 0 : index
    %19 = vector.load %arg9[%c0_17, %c0_18, %c0_19] : memref<16x16x16xf32, #tpu.memory_space<vmem>>, vector<16x1x16xf32>
    %20 = vector.shape_cast %19 : vector<16x1x16xf32> to vector<16x16xf32>
    %21 = vector.shape_cast %18 : vector<16x16xf32> to vector<16x1x16xf32>
    tpu.vector_store %arg9[%c0_17, %c0_18, %c0_19], %21 {strides = array<i32>} : memref<16x16x16xf32, #tpu.memory_space<vmem>>, vector<16x1x16xf32>,
    %22 = vector.extract_strided_slice %6 {offsets = [0, 16], sizes = [8, 16], strides = [1, 1]} : vector<8x256xf32> to vector<8x16xf32>
    %c0_20 = arith.constant 0 : index
    %c1 = arith.constant 1 : index
    %c0_21 = arith.constant 0 : index
    %23 = vector.load %arg8[%c0_20, %c1, %c0_21] : memref<8x16x16xf32, #tpu.memory_space<vmem>>, vector<8x1x16xf32>
    %24 = vector.shape_cast %23 : vector<8x1x16xf32> to vector<8x16xf32>
    %25 = vector.shape_cast %22 : vector<8x16xf32> to vector<8x1x16xf32>
    tpu.vector_store %arg8[%c0_20, %c1, %c0_21], %25 {strides = array<i32>} : memref<8x16x16xf32, #tpu.memory_space<vmem>>, vector<8x1x16xf32>,
    %26 = vector.extract_strided_slice %13 {offsets = [0, 16], sizes = [16, 16], strides = [1, 1]} : vector<16x256xf32> to vector<16x16xf32>
    %c0_22 = arith.constant 0 : index
    %c1_23 = arith.constant 1 : index
    %c0_24 = arith.constant 0 : index
    %27 = vector.load %arg9[%c0_22, %c1_23, %c0_24] : memref<16x16x16xf32, #tpu.memory_space<vmem>>, vector<16x1x16xf32>
    %28 = vector.shape_cast %27 : vector<16x1x16xf32> to vector<16x16xf32>
    %29 = vector.shape_cast %26 : vector<16x16xf32> to vector<16x1x16xf32>
    tpu.vector_store %arg9[%c0_22, %c1_23, %c0_24], %29 {strides = array<i32>} : memref<16x16x16xf32, #tpu.memory_space<vmem>>, vector<16x1x16xf32>,
    %30 = vector.extract_strided_slice %6 {offsets = [0, 32], sizes = [8, 16], strides = [1, 1]} : vector<8x256xf32> to vector<8x16xf32>
    %c0_25 = arith.constant 0 : index
    %c2 = arith.constant 2 : index
    %c0_26 = arith.constant 0 : index
    %31 = vector.load %arg8[%c0_25, %c2, %c0_26] : memref<8x16x16xf32, #tpu.memory_space<vmem>>, vector<8x1x16xf32>
    %32 = vector.shape_cast %31 : vector<8x1x16xf32> to vector<8x16xf32>
    %33 = vector.shape_cast %30 : vector<8x16xf32> to vector<8x1x16xf32>
    tpu.vector_store %arg8[%c0_25, %c2, %c0_26], %33 {strides = array<i32>} : memref<8x16x16xf32, #tpu.memory_space<vmem>>, vector<8x1x16xf32>,
    %34 = vector.extract_strided_slice %13 {offsets = [0, 32], sizes = [16, 16], strides = [1, 1]} : vector<16x256xf32> to vector<16x16xf32>
    %c0_27 = arith.constant 0 : index
    %c2_28 = arith.constant 2 : index
    %c0_29 = arith.constant 0 : index
    %35 = vector.load %arg9[%c0_27, %c2_28, %c0_29] : memref<16x16x16xf32, #tpu.memory_space<vmem>>, vector<16x1x16xf32>
    %36 = vector.shape_cast %35 : vector<16x1x16xf32> to vector<16x16xf32>
    %37 = vector.shape_cast %34 : vector<16x16xf32> to vector<16x1x16xf32>
    tpu.vector_store %arg9[%c0_27, %c2_28, %c0_29], %37 {strides = array<i32>} : memref<16x16x16xf32, #tpu.memory_space<vmem>>, vector<16x1x16xf32>,
    %38 = vector.extract_strided_slice %6 {offsets = [0, 48], sizes = [8, 16], strides = [1, 1]} : vector<8x256xf32> to vector<8x16xf32>
    %c0_30 = arith.constant 0 : index
    %c3 = arith.constant 3 : index
    %c0_31 = arith.constant 0 : index
    %39 = vector.load %arg8[%c0_30, %c3, %c0_31] : memref<8x16x16xf32, #tpu.memory_space<vmem>>, vector<8x1x16xf32>
    %40 = vector.shape_cast %39 : vector<8x1x16xf32> to vector<8x16xf32>
    %41 = vector.shape_cast %38 : vector<8x16xf32> to vector<8x1x16xf32>
    tpu.vector_store %arg8[%c0_30, %c3, %c0_31], %41 {strides = array<i32>} : memref<8x16x16xf32, #tpu.memory_space<vmem>>, vector<8x1x16xf32>,
    %42 = vector.extract_strided_slice %13 {offsets = [0, 48], sizes = [16, 16], strides = [1, 1]} : vector<16x256xf32> to vector<16x16xf32>
    %c0_32 = arith.constant 0 : index
    %c3_33 = arith.constant 3 : index
    %c0_34 = arith.constant 0 : index
    %43 = vector.load %arg9[%c0_32, %c3_33, %c0_34] : memref<16x16x16xf32, #tpu.memory_space<vmem>>, vector<16x1x16xf32>
    %44 = vector.shape_cast %43 : vector<16x1x16xf32> to vector<16x16xf32>
    %45 = vector.shape_cast %42 : vector<16x16xf32> to vector<16x1x16xf32>
    tpu.vector_store %arg9[%c0_32, %c3_33, %c0_34], %45 {strides = array<i32>} : memref<16x16x16xf32, #tpu.memory_space<vmem>>, vector<16x1x16xf32>,
    %46 = vector.extract_strided_slice %6 {offsets = [0, 64], sizes = [8, 16], strides = [1, 1]} : vector<8x256xf32> to vector<8x16xf32>
    %c0_35 = arith.constant 0 : index
    %c4 = arith.constant 4 : index
    %c0_36 = arith.constant 0 : index
    %47 = vector.load %arg8[%c0_35, %c4, %c0_36] : memref<8x16x16xf32, #tpu.memory_space<vmem>>, vector<8x1x16xf32>
    %48 = vector.shape_cast %47 : vector<8x1x16xf32> to vector<8x16xf32>
    %49 = vector.shape_cast %46 : vector<8x16xf32> to vector<8x1x16xf32>
    tpu.vector_store %arg8[%c0_35, %c4, %c0_36], %49 {strides = array<i32>} : memref<8x16x16xf32, #tpu.memory_space<vmem>>, vector<8x1x16xf32>,
    %50 = vector.extract_strided_slice %13 {offsets = [0, 64], sizes = [16, 16], strides = [1, 1]} : vector<16x256xf32> to vector<16x16xf32>
    %c0_37 = arith.constant 0 : index
    %c4_38 = arith.constant 4 : index
    %c0_39 = arith.constant 0 : index
    %51 = vector.load %arg9[%c0_37, %c4_38, %c0_39] : memref<16x16x16xf32, #tpu.memory_space<vmem>>, vector<16x1x16xf32>
    %52 = vector.shape_cast %51 : vector<16x1x16xf32> to vector<16x16xf32>
    %53 = vector.shape_cast %50 : vector<16x16xf32> to vector<16x1x16xf32>
    tpu.vector_store %arg9[%c0_37, %c4_38, %c0_39], %53 {strides = array<i32>} : memref<16x16x16xf32, #tpu.memory_space<vmem>>, vector<16x1x16xf32>,
    %54 = vector.extract_strided_slice %6 {offsets = [0, 80], sizes = [8, 16], strides = [1, 1]} : vector<8x256xf32> to vector<8x16xf32>
    %c0_40 = arith.constant 0 : index
    %c5 = arith.constant 5 : index
    %c0_41 = arith.constant 0 : index
    %55 = vector.load %arg8[%c0_40, %c5, %c0_41] : memref<8x16x16xf32, #tpu.memory_space<vmem>>, vector<8x1x16xf32>
    %56 = vector.shape_cast %55 : vector<8x1x16xf32> to vector<8x16xf32>
    %57 = vector.shape_cast %54 : vector<8x16xf32> to vector<8x1x16xf32>
    tpu.vector_store %arg8[%c0_40, %c5, %c0_41], %57 {strides = array<i32>} : memref<8x16x16xf32, #tpu.memory_space<vmem>>, vector<8x1x16xf32>,
    %58 = vector.extract_strided_slice %13 {offsets = [0, 80], sizes = [16, 16], strides = [1, 1]} : vector<16x256xf32> to vector<16x16xf32>
    %c0_42 = arith.constant 0 : index
    %c5_43 = arith.constant 5 : index
    %c0_44 = arith.constant 0 : index
    %59 = vector.load %arg9[%c0_42, %c5_43, %c0_44] : memref<16x16x16xf32, #tpu.memory_space<vmem>>, vector<16x1x16xf32>
    %60 = vector.shape_cast %59 : vector<16x1x16xf32> to vector<16x16xf32>
    %61 = vector.shape_cast %58 : vector<16x16xf32> to vector<16x1x16xf32>
    tpu.vector_store %arg9[%c0_42, %c5_43, %c0_44], %61 {strides = array<i32>} : memref<16x16x16xf32, #tpu.memory_space<vmem>>, vector<16x1x16xf32>,
    %62 = vector.extract_strided_slice %6 {offsets = [0, 96], sizes = [8, 16], strides = [1, 1]} : vector<8x256xf32> to vector<8x16xf32>
    %c0_45 = arith.constant 0 : index
    %c6 = arith.constant 6 : index
    %c0_46 = arith.constant 0 : index
    %63 = vector.load %arg8[%c0_45, %c6, %c0_46] : memref<8x16x16xf32, #tpu.memory_space<vmem>>, vector<8x1x16xf32>
    %64 = vector.shape_cast %63 : vector<8x1x16xf32> to vector<8x16xf32>
    %65 = vector.shape_cast %62 : vector<8x16xf32> to vector<8x1x16xf32>
    tpu.vector_store %arg8[%c0_45, %c6, %c0_46], %65 {strides = array<i32>} : memref<8x16x16xf32, #tpu.memory_space<vmem>>, vector<8x1x16xf32>,
    %66 = vector.extract_strided_slice %13 {offsets = [0, 96], sizes = [16, 16], strides = [1, 1]} : vector<16x256xf32> to vector<16x16xf32>
    %c0_47 = arith.constant 0 : index
    %c6_48 = arith.constant 6 : index
    %c0_49 = arith.constant 0 : index
    %67 = vector.load %arg9[%c0_47, %c6_48, %c0_49] : memref<16x16x16xf32, #tpu.memory_space<vmem>>, vector<16x1x16xf32>
    %68 = vector.shape_cast %67 : vector<16x1x16xf32> to vector<16x16xf32>
    %69 = vector.shape_cast %66 : vector<16x16xf32> to vector<16x1x16xf32>
    tpu.vector_store %arg9[%c0_47, %c6_48, %c0_49], %69 {strides = array<i32>} : memref<16x16x16xf32, #tpu.memory_space<vmem>>, vector<16x1x16xf32>,
    %70 = vector.extract_strided_slice %6 {offsets = [0, 112], sizes = [8, 16], strides = [1, 1]} : vector<8x256xf32> to vector<8x16xf32>
    %c0_50 = arith.constant 0 : index
    %c7 = arith.constant 7 : index
    %c0_51 = arith.constant 0 : index
    %71 = vector.load %arg8[%c0_50, %c7, %c0_51] : memref<8x16x16xf32, #tpu.memory_space<vmem>>, vector<8x1x16xf32>
    %72 = vector.shape_cast %71 : vector<8x1x16xf32> to vector<8x16xf32>
    %73 = vector.shape_cast %70 : vector<8x16xf32> to vector<8x1x16xf32>
    tpu.vector_store %arg8[%c0_50, %c7, %c0_51], %73 {strides = array<i32>} : memref<8x16x16xf32, #tpu.memory_space<vmem>>, vector<8x1x16xf32>,
    %74 = vector.extract_strided_slice %13 {offsets = [0, 112], sizes = [16, 16], strides = [1, 1]} : vector<16x256xf32> to vector<16x16xf32>
    %c0_52 = arith.constant 0 : index
    %c7_53 = arith.constant 7 : index
    %c0_54 = arith.constant 0 : index
    %75 = vector.load %arg9[%c0_52, %c7_53, %c0_54] : memref<16x16x16xf32, #tpu.memory_space<vmem>>, vector<16x1x16xf32>
    %76 = vector.shape_cast %75 : vector<16x1x16xf32> to vector<16x16xf32>
    %77 = vector.shape_cast %74 : vector<16x16xf32> to vector<16x1x16xf32>
    tpu.vector_store %arg9[%c0_52, %c7_53, %c0_54], %77 {strides = array<i32>} : memref<16x16x16xf32, #tpu.memory_space<vmem>>, vector<16x1x16xf32>,
    %78 = vector.extract_strided_slice %6 {offsets = [0, 128], sizes = [8, 16], strides = [1, 1]} : vector<8x256xf32> to vector<8x16xf32>
    %c0_55 = arith.constant 0 : index
    %c8 = arith.constant 8 : index
    %c0_56 = arith.constant 0 : index
    %79 = vector.load %arg8[%c0_55, %c8, %c0_56] : memref<8x16x16xf32, #tpu.memory_space<vmem>>, vector<8x1x16xf32>
    %80 = vector.shape_cast %79 : vector<8x1x16xf32> to vector<8x16xf32>
    %81 = vector.shape_cast %78 : vector<8x16xf32> to vector<8x1x16xf32>
    tpu.vector_store %arg8[%c0_55, %c8, %c0_56], %81 {strides = array<i32>} : memref<8x16x16xf32, #tpu.memory_space<vmem>>, vector<8x1x16xf32>,
    %82 = vector.extract_strided_slice %13 {offsets = [0, 128], sizes = [16, 16], strides = [1, 1]} : vector<16x256xf32> to vector<16x16xf32>
    %c0_57 = arith.constant 0 : index
    %c8_58 = arith.constant 8 : index
    %c0_59 = arith.constant 0 : index
    %83 = vector.load %arg9[%c0_57, %c8_58, %c0_59] : memref<16x16x16xf32, #tpu.memory_space<vmem>>, vector<16x1x16xf32>
    %84 = vector.shape_cast %83 : vector<16x1x16xf32> to vector<16x16xf32>
    %85 = vector.shape_cast %82 : vector<16x16xf32> to vector<16x1x16xf32>
    tpu.vector_store %arg9[%c0_57, %c8_58, %c0_59], %85 {strides = array<i32>} : memref<16x16x16xf32, #tpu.memory_space<vmem>>, vector<16x1x16xf32>,
    %86 = vector.extract_strided_slice %6 {offsets = [0, 144], sizes = [8, 16], strides = [1, 1]} : vector<8x256xf32> to vector<8x16xf32>
    %c0_60 = arith.constant 0 : index
    %c9 = arith.constant 9 : index
    %c0_61 = arith.constant 0 : index
    %87 = vector.load %arg8[%c0_60, %c9, %c0_61] : memref<8x16x16xf32, #tpu.memory_space<vmem>>, vector<8x1x16xf32>
    %88 = vector.shape_cast %87 : vector<8x1x16xf32> to vector<8x16xf32>
    %89 = vector.shape_cast %86 : vector<8x16xf32> to vector<8x1x16xf32>
    tpu.vector_store %arg8[%c0_60, %c9, %c0_61], %89 {strides = array<i32>} : memref<8x16x16xf32, #tpu.memory_space<vmem>>, vector<8x1x16xf32>,
    %90 = vector.extract_strided_slice %13 {offsets = [0, 144], sizes = [16, 16], strides = [1, 1]} : vector<16x256xf32> to vector<16x16xf32>
    %c0_62 = arith.constant 0 : index
    %c9_63 = arith.constant 9 : index
    %c0_64 = arith.constant 0 : index
    %91 = vector.load %arg9[%c0_62, %c9_63, %c0_64] : memref<16x16x16xf32, #tpu.memory_space<vmem>>, vector<16x1x16xf32>
    %92 = vector.shape_cast %91 : vector<16x1x16xf32> to vector<16x16xf32>
    %93 = vector.shape_cast %90 : vector<16x16xf32> to vector<16x1x16xf32>
    tpu.vector_store %arg9[%c0_62, %c9_63, %c0_64], %93 {strides = array<i32>} : memref<16x16x16xf32, #tpu.memory_space<vmem>>, vector<16x1x16xf32>,
    %94 = vector.extract_strided_slice %6 {offsets = [0, 160], sizes = [8, 16], strides = [1, 1]} : vector<8x256xf32> to vector<8x16xf32>
    %c0_65 = arith.constant 0 : index
    %c10 = arith.constant 10 : index
    %c0_66 = arith.constant 0 : index
    %95 = vector.load %arg8[%c0_65, %c10, %c0_66] : memref<8x16x16xf32, #tpu.memory_space<vmem>>, vector<8x1x16xf32>
    %96 = vector.shape_cast %95 : vector<8x1x16xf32> to vector<8x16xf32>
    %97 = vector.shape_cast %94 : vector<8x16xf32> to vector<8x1x16xf32>
    tpu.vector_store %arg8[%c0_65, %c10, %c0_66], %97 {strides = array<i32>} : memref<8x16x16xf32, #tpu.memory_space<vmem>>, vector<8x1x16xf32>,
    %98 = vector.extract_strided_slice %13 {offsets = [0, 160], sizes = [16, 16], strides = [1, 1]} : vector<16x256xf32> to vector<16x16xf32>
    %c0_67 = arith.constant 0 : index
    %c10_68 = arith.constant 10 : index
    %c0_69 = arith.constant 0 : index
    %99 = vector.load %arg9[%c0_67, %c10_68, %c0_69] : memref<16x16x16xf32, #tpu.memory_space<vmem>>, vector<16x1x16xf32>
    %100 = vector.shape_cast %99 : vector<16x1x16xf32> to vector<16x16xf32>
    %101 = vector.shape_cast %98 : vector<16x16xf32> to vector<16x1x16xf32>
    tpu.vector_store %arg9[%c0_67, %c10_68, %c0_69], %101 {strides = array<i32>} : memref<16x16x16xf32, #tpu.memory_space<vmem>>, vector<16x1x16xf32>,
    %102 = vector.extract_strided_slice %6 {offsets = [0, 176], sizes = [8, 16], strides = [1, 1]} : vector<8x256xf32> to vector<8x16xf32>
    %c0_70 = arith.constant 0 : index
    %c11 = arith.constant 11 : index
    %c0_71 = arith.constant 0 : index
    %103 = vector.load %arg8[%c0_70, %c11, %c0_71] : memref<8x16x16xf32, #tpu.memory_space<vmem>>, vector<8x1x16xf32>
    %104 = vector.shape_cast %103 : vector<8x1x16xf32> to vector<8x16xf32>
    %105 = vector.shape_cast %102 : vector<8x16xf32> to vector<8x1x16xf32>
    tpu.vector_store %arg8[%c0_70, %c11, %c0_71], %105 {strides = array<i32>} : memref<8x16x16xf32, #tpu.memory_space<vmem>>, vector<8x1x16xf32>,
    %106 = vector.extract_strided_slice %13 {offsets = [0, 176], sizes = [16, 16], strides = [1, 1]} : vector<16x256xf32> to vector<16x16xf32>
    %c0_72 = arith.constant 0 : index
    %c11_73 = arith.constant 11 : index
    %c0_74 = arith.constant 0 : index
    %107 = vector.load %arg9[%c0_72, %c11_73, %c0_74] : memref<16x16x16xf32, #tpu.memory_space<vmem>>, vector<16x1x16xf32>
    %108 = vector.shape_cast %107 : vector<16x1x16xf32> to vector<16x16xf32>
    %109 = vector.shape_cast %106 : vector<16x16xf32> to vector<16x1x16xf32>
    tpu.vector_store %arg9[%c0_72, %c11_73, %c0_74], %109 {strides = array<i32>} : memref<16x16x16xf32, #tpu.memory_space<vmem>>, vector<16x1x16xf32>,
    %110 = vector.extract_strided_slice %6 {offsets = [0, 192], sizes = [8, 16], strides = [1, 1]} : vector<8x256xf32> to vector<8x16xf32>
    %c0_75 = arith.constant 0 : index
    %c12 = arith.constant 12 : index
    %c0_76 = arith.constant 0 : index
    %111 = vector.load %arg8[%c0_75, %c12, %c0_76] : memref<8x16x16xf32, #tpu.memory_space<vmem>>, vector<8x1x16xf32>
    %112 = vector.shape_cast %111 : vector<8x1x16xf32> to vector<8x16xf32>
    %113 = vector.shape_cast %110 : vector<8x16xf32> to vector<8x1x16xf32>
    tpu.vector_store %arg8[%c0_75, %c12, %c0_76], %113 {strides = array<i32>} : memref<8x16x16xf32, #tpu.memory_space<vmem>>, vector<8x1x16xf32>,
    %114 = vector.extract_strided_slice %13 {offsets = [0, 192], sizes = [16, 16], strides = [1, 1]} : vector<16x256xf32> to vector<16x16xf32>
    %c0_77 = arith.constant 0 : index
    %c12_78 = arith.constant 12 : index
    %c0_79 = arith.constant 0 : index
    %115 = vector.load %arg9[%c0_77, %c12_78, %c0_79] : memref<16x16x16xf32, #tpu.memory_space<vmem>>, vector<16x1x16xf32>
    %116 = vector.shape_cast %115 : vector<16x1x16xf32> to vector<16x16xf32>
    %117 = vector.shape_cast %114 : vector<16x16xf32> to vector<16x1x16xf32>
    tpu.vector_store %arg9[%c0_77, %c12_78, %c0_79], %117 {strides = array<i32>} : memref<16x16x16xf32, #tpu.memory_space<vmem>>, vector<16x1x16xf32>,
    %118 = vector.extract_strided_slice %6 {offsets = [0, 208], sizes = [8, 16], strides = [1, 1]} : vector<8x256xf32> to vector<8x16xf32>
    %c0_80 = arith.constant 0 : index
    %c13 = arith.constant 13 : index
    %c0_81 = arith.constant 0 : index
    %119 = vector.load %arg8[%c0_80, %c13, %c0_81] : memref<8x16x16xf32, #tpu.memory_space<vmem>>, vector<8x1x16xf32>
    %120 = vector.shape_cast %119 : vector<8x1x16xf32> to vector<8x16xf32>
    %121 = vector.shape_cast %118 : vector<8x16xf32> to vector<8x1x16xf32>
    tpu.vector_store %arg8[%c0_80, %c13, %c0_81], %121 {strides = array<i32>} : memref<8x16x16xf32, #tpu.memory_space<vmem>>, vector<8x1x16xf32>,
    %122 = vector.extract_strided_slice %13 {offsets = [0, 208], sizes = [16, 16], strides = [1, 1]} : vector<16x256xf32> to vector<16x16xf32>
    %c0_82 = arith.constant 0 : index
    %c13_83 = arith.constant 13 : index
    %c0_84 = arith.constant 0 : index
    %123 = vector.load %arg9[%c0_82, %c13_83, %c0_84] : memref<16x16x16xf32, #tpu.memory_space<vmem>>, vector<16x1x16xf32>
    %124 = vector.shape_cast %123 : vector<16x1x16xf32> to vector<16x16xf32>
    %125 = vector.shape_cast %122 : vector<16x16xf32> to vector<16x1x16xf32>
    tpu.vector_store %arg9[%c0_82, %c13_83, %c0_84], %125 {strides = array<i32>} : memref<16x16x16xf32, #tpu.memory_space<vmem>>, vector<16x1x16xf32>,
    %126 = vector.extract_strided_slice %6 {offsets = [0, 224], sizes = [8, 16], strides = [1, 1]} : vector<8x256xf32> to vector<8x16xf32>
    %c0_85 = arith.constant 0 : index
    %c14 = arith.constant 14 : index
    %c0_86 = arith.constant 0 : index
    %127 = vector.load %arg8[%c0_85, %c14, %c0_86] : memref<8x16x16xf32, #tpu.memory_space<vmem>>, vector<8x1x16xf32>
    %128 = vector.shape_cast %127 : vector<8x1x16xf32> to vector<8x16xf32>
    %129 = vector.shape_cast %126 : vector<8x16xf32> to vector<8x1x16xf32>
    tpu.vector_store %arg8[%c0_85, %c14, %c0_86], %129 {strides = array<i32>} : memref<8x16x16xf32, #tpu.memory_space<vmem>>, vector<8x1x16xf32>,
    %130 = vector.extract_strided_slice %13 {offsets = [0, 224], sizes = [16, 16], strides = [1, 1]} : vector<16x256xf32> to vector<16x16xf32>
    %c0_87 = arith.constant 0 : index
    %c14_88 = arith.constant 14 : index
    %c0_89 = arith.constant 0 : index
    %131 = vector.load %arg9[%c0_87, %c14_88, %c0_89] : memref<16x16x16xf32, #tpu.memory_space<vmem>>, vector<16x1x16xf32>
    %132 = vector.shape_cast %131 : vector<16x1x16xf32> to vector<16x16xf32>
    %133 = vector.shape_cast %130 : vector<16x16xf32> to vector<16x1x16xf32>
    tpu.vector_store %arg9[%c0_87, %c14_88, %c0_89], %133 {strides = array<i32>} : memref<16x16x16xf32, #tpu.memory_space<vmem>>, vector<16x1x16xf32>,
    %134 = vector.extract_strided_slice %6 {offsets = [0, 240], sizes = [8, 16], strides = [1, 1]} : vector<8x256xf32> to vector<8x16xf32>
    %c0_90 = arith.constant 0 : index
    %c15 = arith.constant 15 : index
    %c0_91 = arith.constant 0 : index
    %135 = vector.load %arg8[%c0_90, %c15, %c0_91] : memref<8x16x16xf32, #tpu.memory_space<vmem>>, vector<8x1x16xf32>
    %136 = vector.shape_cast %135 : vector<8x1x16xf32> to vector<8x16xf32>
    %137 = vector.shape_cast %134 : vector<8x16xf32> to vector<8x1x16xf32>
    tpu.vector_store %arg8[%c0_90, %c15, %c0_91], %137 {strides = array<i32>} : memref<8x16x16xf32, #tpu.memory_space<vmem>>, vector<8x1x16xf32>,
    %138 = vector.extract_strided_slice %13 {offsets = [0, 240], sizes = [16, 16], strides = [1, 1]} : vector<16x256xf32> to vector<16x16xf32>
    %c0_92 = arith.constant 0 : index
    %c15_93 = arith.constant 15 : index
    %c0_94 = arith.constant 0 : index
    %139 = vector.load %arg9[%c0_92, %c15_93, %c0_94] : memref<16x16x16xf32, #tpu.memory_space<vmem>>, vector<16x1x16xf32>
    %140 = vector.shape_cast %139 : vector<16x1x16xf32> to vector<16x16xf32>
    %141 = vector.shape_cast %138 : vector<16x16xf32> to vector<16x1x16xf32>
    tpu.vector_store %arg9[%c0_92, %c15_93, %c0_94], %141 {strides = array<i32>} : memref<16x16x16xf32, #tpu.memory_space<vmem>>, vector<16x1x16xf32>,
    %c0_95 = arith.constant 0 : index
    %c0_96 = arith.constant 0 : index
    %c0_97 = arith.constant 0 : index
    %142 = vector.load %arg8[%c0_95, %c0_96, %c0_97] : memref<8x16x16xf32, #tpu.memory_space<vmem>>, vector<1x16x16xf32>
    %143 = vector.shape_cast %142 : vector<1x16x16xf32> to vector<16x16xf32>
    %c0_98 = arith.constant 0 : index
    %c0_99 = arith.constant 0 : index
    %c0_100 = arith.constant 0 : index
    %144 = vector.load %arg9[%c0_98, %c0_99, %c0_100] : memref<16x16x16xf32, #tpu.memory_space<vmem>>, vector<1x16x16xf32>
    %145 = vector.shape_cast %144 : vector<1x16x16xf32> to vector<16x16xf32>
    %c8_101 = arith.constant 8 : index
    %c0_102 = arith.constant 0 : index
    %c0_103 = arith.constant 0 : index
    %146 = vector.load %arg9[%c8_101, %c0_102, %c0_103] : memref<16x16x16xf32, #tpu.memory_space<vmem>>, vector<1x16x16xf32>
    %147 = vector.shape_cast %146 : vector<1x16x16xf32> to vector<16x16xf32>
    %148 = tpu.transpose %145, [1, 0] : vector<16x16xf32> -> vector<16x16xf32>
    %cst_104 = arith.constant dense<0.000000e+00> : vector<16x16xf32>
    %149 = tpu.matmul %143, %148, %cst_104 {dimension_numbers = #tpu.dot_dimension_numbers<[1], [0], [0], [1], [0, 0, 1, 1], [], []>} : vector<16x16xf32>, vector<16x16xf32>, vector<16x16xf32> -> vector<16x16xf32>
    %cst_105 = arith.constant 0.353553385 : f32
    %150 = vector.broadcast %cst_105 : f32 to vector<16x16xf32>
    %151 = arith.mulf %149, %150 : vector<16x16xf32>
    %cst_106 = arith.constant dense<0xFF800000> : vector<16xf32>
    %152 = vector.multi_reduction <maximumf>, %151, %cst_106 [1] : vector<16x16xf32> to vector<16xf32>
    %153 = vector.shape_cast %152 : vector<16xf32> to vector<16x1xf32>
    %154 = vector.broadcast %153 : vector<16x1xf32> to vector<16x16xf32>
    %155 = arith.subf %151, %154 : vector<16x16xf32>
    %156 = math.exp %155 : vector<16x16xf32>
    %cst_107 = arith.constant dense<0.000000e+00> : vector<16xf32>
    %157 = vector.multi_reduction <add>, %156, %cst_107 [1] : vector<16x16xf32> to vector<16xf32>
    %158 = vector.shape_cast %157 : vector<16xf32> to vector<16x1xf32>
    %159 = tpu.reciprocal %158 : vector<16x1xf32> -> vector<16x1xf32>
    %160 = vector.broadcast %159 : vector<16x1xf32> to vector<16x16xf32>
    %161 = arith.mulf %156, %160 : vector<16x16xf32>
    %162 = tpu.transpose %143, [1, 0] : vector<16x16xf32> -> vector<16x16xf32>
    %cst_108 = arith.constant dense<0.000000e+00> : vector<16x16xf32>
    %163 = tpu.matmul %162, %145, %cst_108 {dimension_numbers = #tpu.dot_dimension_numbers<[1], [0], [0], [1], [0, 0, 1, 1], [], []>} : vector<16x16xf32>, vector<16x16xf32>, vector<16x16xf32> -> vector<16x16xf32>
    %cst_109 = arith.constant 0.353553385 : f32
    %164 = vector.broadcast %cst_109 : f32 to vector<16x16xf32>
    %165 = arith.mulf %163, %164 : vector<16x16xf32>
    %cst_110 = arith.constant dense<0xFF800000> : vector<16xf32>
    %166 = vector.multi_reduction <maximumf>, %165, %cst_110 [0] : vector<16x16xf32> to vector<16xf32>
    %167 = vector.shape_cast %166 : vector<16xf32> to vector<1x16xf32>
    %168 = vector.broadcast %167 : vector<1x16xf32> to vector<16x16xf32>
    %169 = arith.subf %165, %168 : vector<16x16xf32>
    %170 = math.exp %169 : vector<16x16xf32>
    %cst_111 = arith.constant dense<0.000000e+00> : vector<16xf32>
    %171 = vector.multi_reduction <add>, %170, %cst_111 [0] : vector<16x16xf32> to vector<16xf32>
    %172 = vector.shape_cast %171 : vector<16xf32> to vector<1x16xf32>
    %173 = tpu.reciprocal %172 : vector<1x16xf32> -> vector<1x16xf32>
    %174 = vector.broadcast %173 : vector<1x16xf32> to vector<16x16xf32>
    %175 = arith.mulf %170, %174 : vector<16x16xf32>
    %cst_112 = arith.constant dense<0.000000e+00> : vector<16x16xf32>
    %176 = tpu.matmul %161, %147, %cst_112 {dimension_numbers = #tpu.dot_dimension_numbers<[1], [0], [0], [1], [0, 0, 1, 1], [], []>} : vector<16x16xf32>, vector<16x16xf32>, vector<16x16xf32> -> vector<16x16xf32>
    %cst_113 = arith.constant dense<0.000000e+00> : vector<16x16xf32>
    %177 = tpu.matmul %176, %175, %cst_113 {dimension_numbers = #tpu.dot_dimension_numbers<[1], [0], [0], [1], [0, 0, 1, 1], [], []>} : vector<16x16xf32>, vector<16x16xf32>, vector<16x16xf32> -> vector<16x16xf32>
    %c0_114 = arith.constant 0 : index
    %c0_115 = arith.constant 0 : index
    %c0_116 = arith.constant 0 : index
    %c0_117 = arith.constant 0 : index
    %178 = vector.load %arg7[%c0_114, %c0_115, %c0_116, %c0_117] : memref<1x8x16x16xf32, #tpu.memory_space<vmem>>, vector<1x1x16x16xf32>
    %179 = vector.shape_cast %178 : vector<1x1x16x16xf32> to vector<16x16xf32>
    %180 = vector.shape_cast %177 : vector<16x16xf32> to vector<1x1x16x16xf32>
    tpu.vector_store %arg7[%c0_114, %c0_115, %c0_116, %c0_117], %180 {strides = array<i32>} : memref<1x8x16x16xf32, #tpu.memory_space<vmem>>, vector<1x1x16x16xf32>,
    %c1_118 = arith.constant 1 : index
    %c0_119 = arith.constant 0 : index
    %c0_120 = arith.constant 0 : index
    %181 = vector.load %arg8[%c1_118, %c0_119, %c0_120] : memref<8x16x16xf32, #tpu.memory_space<vmem>>, vector<1x16x16xf32>
    %182 = vector.shape_cast %181 : vector<1x16x16xf32> to vector<16x16xf32>
    %c1_121 = arith.constant 1 : index
    %c0_122 = arith.constant 0 : index
    %c0_123 = arith.constant 0 : index
    %183 = vector.load %arg9[%c1_121, %c0_122, %c0_123] : memref<16x16x16xf32, #tpu.memory_space<vmem>>, vector<1x16x16xf32>
    %184 = vector.shape_cast %183 : vector<1x16x16xf32> to vector<16x16xf32>
    %c9_124 = arith.constant 9 : index
    %c0_125 = arith.constant 0 : index
    %c0_126 = arith.constant 0 : index
    %185 = vector.load %arg9[%c9_124, %c0_125, %c0_126] : memref<16x16x16xf32, #tpu.memory_space<vmem>>, vector<1x16x16xf32>
    %186 = vector.shape_cast %185 : vector<1x16x16xf32> to vector<16x16xf32>
    %187 = tpu.transpose %184, [1, 0] : vector<16x16xf32> -> vector<16x16xf32>
    %cst_127 = arith.constant dense<0.000000e+00> : vector<16x16xf32>
    %188 = tpu.matmul %182, %187, %cst_127 {dimension_numbers = #tpu.dot_dimension_numbers<[1], [0], [0], [1], [0, 0, 1, 1], [], []>} : vector<16x16xf32>, vector<16x16xf32>, vector<16x16xf32> -> vector<16x16xf32>
    %cst_128 = arith.constant 0.353553385 : f32
    %189 = vector.broadcast %cst_128 : f32 to vector<16x16xf32>
    %190 = arith.mulf %188, %189 : vector<16x16xf32>
    %cst_129 = arith.constant dense<0xFF800000> : vector<16xf32>
    %191 = vector.multi_reduction <maximumf>, %190, %cst_129 [1] : vector<16x16xf32> to vector<16xf32>
    %192 = vector.shape_cast %191 : vector<16xf32> to vector<16x1xf32>
    %193 = vector.broadcast %192 : vector<16x1xf32> to vector<16x16xf32>
    %194 = arith.subf %190, %193 : vector<16x16xf32>
    %195 = math.exp %194 : vector<16x16xf32>
    %cst_130 = arith.constant dense<0.000000e+00> : vector<16xf32>
    %196 = vector.multi_reduction <add>, %195, %cst_130 [1] : vector<16x16xf32> to vector<16xf32>
    %197 = vector.shape_cast %196 : vector<16xf32> to vector<16x1xf32>
    %198 = tpu.reciprocal %197 : vector<16x1xf32> -> vector<16x1xf32>
    %199 = vector.broadcast %198 : vector<16x1xf32> to vector<16x16xf32>
    %200 = arith.mulf %195, %199 : vector<16x16xf32>
    %201 = tpu.transpose %182, [1, 0] : vector<16x16xf32> -> vector<16x16xf32>
    %cst_131 = arith.constant dense<0.000000e+00> : vector<16x16xf32>
    %202 = tpu.matmul %201, %184, %cst_131 {dimension_numbers = #tpu.dot_dimension_numbers<[1], [0], [0], [1], [0, 0, 1, 1], [], []>} : vector<16x16xf32>, vector<16x16xf32>, vector<16x16xf32> -> vector<16x16xf32>
    %cst_132 = arith.constant 0.353553385 : f32
    %203 = vector.broadcast %cst_132 : f32 to vector<16x16xf32>
    %204 = arith.mulf %202, %203 : vector<16x16xf32>
    %cst_133 = arith.constant dense<0xFF800000> : vector<16xf32>
    %205 = vector.multi_reduction <maximumf>, %204, %cst_133 [0] : vector<16x16xf32> to vector<16xf32>
    %206 = vector.shape_cast %205 : vector<16xf32> to vector<1x16xf32>
    %207 = vector.broadcast %206 : vector<1x16xf32> to vector<16x16xf32>
    %208 = arith.subf %204, %207 : vector<16x16xf32>
    %209 = math.exp %208 : vector<16x16xf32>
    %cst_134 = arith.constant dense<0.000000e+00> : vector<16xf32>
    %210 = vector.multi_reduction <add>, %209, %cst_134 [0] : vector<16x16xf32> to vector<16xf32>
    %211 = vector.shape_cast %210 : vector<16xf32> to vector<1x16xf32>
    %212 = tpu.reciprocal %211 : vector<1x16xf32> -> vector<1x16xf32>
    %213 = vector.broadcast %212 : vector<1x16xf32> to vector<16x16xf32>
    %214 = arith.mulf %209, %213 : vector<16x16xf32>
    %cst_135 = arith.constant dense<0.000000e+00> : vector<16x16xf32>
    %215 = tpu.matmul %200, %186, %cst_135 {dimension_numbers = #tpu.dot_dimension_numbers<[1], [0], [0], [1], [0, 0, 1, 1], [], []>} : vector<16x16xf32>, vector<16x16xf32>, vector<16x16xf32> -> vector<16x16xf32>
    %cst_136 = arith.constant dense<0.000000e+00> : vector<16x16xf32>
    %216 = tpu.matmul %215, %214, %cst_136 {dimension_numbers = #tpu.dot_dimension_numbers<[1], [0], [0], [1], [0, 0, 1, 1], [], []>} : vector<16x16xf32>, vector<16x16xf32>, vector<16x16xf32> -> vector<16x16xf32>
    %c0_137 = arith.constant 0 : index
    %c1_138 = arith.constant 1 : index
    %c0_139 = arith.constant 0 : index
    %c0_140 = arith.constant 0 : index
    %217 = vector.load %arg7[%c0_137, %c1_138, %c0_139, %c0_140] : memref<1x8x16x16xf32, #tpu.memory_space<vmem>>, vector<1x1x16x16xf32>
    %218 = vector.shape_cast %217 : vector<1x1x16x16xf32> to vector<16x16xf32>
    %219 = vector.shape_cast %216 : vector<16x16xf32> to vector<1x1x16x16xf32>
    tpu.vector_store %arg7[%c0_137, %c1_138, %c0_139, %c0_140], %219 {strides = array<i32>} : memref<1x8x16x16xf32, #tpu.memory_space<vmem>>, vector<1x1x16x16xf32>,
    %c2_141 = arith.constant 2 : index
    %c0_142 = arith.constant 0 : index
    %c0_143 = arith.constant 0 : index
    %220 = vector.load %arg8[%c2_141, %c0_142, %c0_143] : memref<8x16x16xf32, #tpu.memory_space<vmem>>, vector<1x16x16xf32>
    %221 = vector.shape_cast %220 : vector<1x16x16xf32> to vector<16x16xf32>
    %c2_144 = arith.constant 2 : index
    %c0_145 = arith.constant 0 : index
    %c0_146 = arith.constant 0 : index
    %222 = vector.load %arg9[%c2_144, %c0_145, %c0_146] : memref<16x16x16xf32, #tpu.memory_space<vmem>>, vector<1x16x16xf32>
    %223 = vector.shape_cast %222 : vector<1x16x16xf32> to vector<16x16xf32>
    %c10_147 = arith.constant 10 : index
    %c0_148 = arith.constant 0 : index
    %c0_149 = arith.constant 0 : index
    %224 = vector.load %arg9[%c10_147, %c0_148, %c0_149] : memref<16x16x16xf32, #tpu.memory_space<vmem>>, vector<1x16x16xf32>
    %225 = vector.shape_cast %224 : vector<1x16x16xf32> to vector<16x16xf32>
    %226 = tpu.transpose %223, [1, 0] : vector<16x16xf32> -> vector<16x16xf32>
    %cst_150 = arith.constant dense<0.000000e+00> : vector<16x16xf32>
    %227 = tpu.matmul %221, %226, %cst_150 {dimension_numbers = #tpu.dot_dimension_numbers<[1], [0], [0], [1], [0, 0, 1, 1], [], []>} : vector<16x16xf32>, vector<16x16xf32>, vector<16x16xf32> -> vector<16x16xf32>
    %cst_151 = arith.constant 0.353553385 : f32
    %228 = vector.broadcast %cst_151 : f32 to vector<16x16xf32>
    %229 = arith.mulf %227, %228 : vector<16x16xf32>
    %cst_152 = arith.constant dense<0xFF800000> : vector<16xf32>
    %230 = vector.multi_reduction <maximumf>, %229, %cst_152 [1] : vector<16x16xf32> to vector<16xf32>
    %231 = vector.shape_cast %230 : vector<16xf32> to vector<16x1xf32>
    %232 = vector.broadcast %231 : vector<16x1xf32> to vector<16x16xf32>
    %233 = arith.subf %229, %232 : vector<16x16xf32>
    %234 = math.exp %233 : vector<16x16xf32>
    %cst_153 = arith.constant dense<0.000000e+00> : vector<16xf32>
    %235 = vector.multi_reduction <add>, %234, %cst_153 [1] : vector<16x16xf32> to vector<16xf32>
    %236 = vector.shape_cast %235 : vector<16xf32> to vector<16x1xf32>
    %237 = tpu.reciprocal %236 : vector<16x1xf32> -> vector<16x1xf32>
    %238 = vector.broadcast %237 : vector<16x1xf32> to vector<16x16xf32>
    %239 = arith.mulf %234, %238 : vector<16x16xf32>
    %240 = tpu.transpose %221, [1, 0] : vector<16x16xf32> -> vector<16x16xf32>
    %cst_154 = arith.constant dense<0.000000e+00> : vector<16x16xf32>
    %241 = tpu.matmul %240, %223, %cst_154 {dimension_numbers = #tpu.dot_dimension_numbers<[1], [0], [0], [1], [0, 0, 1, 1], [], []>} : vector<16x16xf32>, vector<16x16xf32>, vector<16x16xf32> -> vector<16x16xf32>
    %cst_155 = arith.constant 0.353553385 : f32
    %242 = vector.broadcast %cst_155 : f32 to vector<16x16xf32>
    %243 = arith.mulf %241, %242 : vector<16x16xf32>
    %cst_156 = arith.constant dense<0xFF800000> : vector<16xf32>
    %244 = vector.multi_reduction <maximumf>, %243, %cst_156 [0] : vector<16x16xf32> to vector<16xf32>
    %245 = vector.shape_cast %244 : vector<16xf32> to vector<1x16xf32>
    %246 = vector.broadcast %245 : vector<1x16xf32> to vector<16x16xf32>
    %247 = arith.subf %243, %246 : vector<16x16xf32>
    %248 = math.exp %247 : vector<16x16xf32>
    %cst_157 = arith.constant dense<0.000000e+00> : vector<16xf32>
    %249 = vector.multi_reduction <add>, %248, %cst_157 [0] : vector<16x16xf32> to vector<16xf32>
    %250 = vector.shape_cast %249 : vector<16xf32> to vector<1x16xf32>
    %251 = tpu.reciprocal %250 : vector<1x16xf32> -> vector<1x16xf32>
    %252 = vector.broadcast %251 : vector<1x16xf32> to vector<16x16xf32>
    %253 = arith.mulf %248, %252 : vector<16x16xf32>
    %cst_158 = arith.constant dense<0.000000e+00> : vector<16x16xf32>
    %254 = tpu.matmul %239, %225, %cst_158 {dimension_numbers = #tpu.dot_dimension_numbers<[1], [0], [0], [1], [0, 0, 1, 1], [], []>} : vector<16x16xf32>, vector<16x16xf32>, vector<16x16xf32> -> vector<16x16xf32>
    %cst_159 = arith.constant dense<0.000000e+00> : vector<16x16xf32>
    %255 = tpu.matmul %254, %253, %cst_159 {dimension_numbers = #tpu.dot_dimension_numbers<[1], [0], [0], [1], [0, 0, 1, 1], [], []>} : vector<16x16xf32>, vector<16x16xf32>, vector<16x16xf32> -> vector<16x16xf32>
    %c0_160 = arith.constant 0 : index
    %c2_161 = arith.constant 2 : index
    %c0_162 = arith.constant 0 : index
    %c0_163 = arith.constant 0 : index
    %256 = vector.load %arg7[%c0_160, %c2_161, %c0_162, %c0_163] : memref<1x8x16x16xf32, #tpu.memory_space<vmem>>, vector<1x1x16x16xf32>
    %257 = vector.shape_cast %256 : vector<1x1x16x16xf32> to vector<16x16xf32>
    %258 = vector.shape_cast %255 : vector<16x16xf32> to vector<1x1x16x16xf32>
    tpu.vector_store %arg7[%c0_160, %c2_161, %c0_162, %c0_163], %258 {strides = array<i32>} : memref<1x8x16x16xf32, #tpu.memory_space<vmem>>, vector<1x1x16x16xf32>,
    %c3_164 = arith.constant 3 : index
    %c0_165 = arith.constant 0 : index
    %c0_166 = arith.constant 0 : index
    %259 = vector.load %arg8[%c3_164, %c0_165, %c0_166] : memref<8x16x16xf32, #tpu.memory_space<vmem>>, vector<1x16x16xf32>
    %260 = vector.shape_cast %259 : vector<1x16x16xf32> to vector<16x16xf32>
    %c3_167 = arith.constant 3 : index
    %c0_168 = arith.constant 0 : index
    %c0_169 = arith.constant 0 : index
    %261 = vector.load %arg9[%c3_167, %c0_168, %c0_169] : memref<16x16x16xf32, #tpu.memory_space<vmem>>, vector<1x16x16xf32>
    %262 = vector.shape_cast %261 : vector<1x16x16xf32> to vector<16x16xf32>
    %c11_170 = arith.constant 11 : index
    %c0_171 = arith.constant 0 : index
    %c0_172 = arith.constant 0 : index
    %263 = vector.load %arg9[%c11_170, %c0_171, %c0_172] : memref<16x16x16xf32, #tpu.memory_space<vmem>>, vector<1x16x16xf32>
    %264 = vector.shape_cast %263 : vector<1x16x16xf32> to vector<16x16xf32>
    %265 = tpu.transpose %262, [1, 0] : vector<16x16xf32> -> vector<16x16xf32>
    %cst_173 = arith.constant dense<0.000000e+00> : vector<16x16xf32>
    %266 = tpu.matmul %260, %265, %cst_173 {dimension_numbers = #tpu.dot_dimension_numbers<[1], [0], [0], [1], [0, 0, 1, 1], [], []>} : vector<16x16xf32>, vector<16x16xf32>, vector<16x16xf32> -> vector<16x16xf32>
    %cst_174 = arith.constant 0.353553385 : f32
    %267 = vector.broadcast %cst_174 : f32 to vector<16x16xf32>
    %268 = arith.mulf %266, %267 : vector<16x16xf32>
    %cst_175 = arith.constant dense<0xFF800000> : vector<16xf32>
    %269 = vector.multi_reduction <maximumf>, %268, %cst_175 [1] : vector<16x16xf32> to vector<16xf32>
    %270 = vector.shape_cast %269 : vector<16xf32> to vector<16x1xf32>
    %271 = vector.broadcast %270 : vector<16x1xf32> to vector<16x16xf32>
    %272 = arith.subf %268, %271 : vector<16x16xf32>
    %273 = math.exp %272 : vector<16x16xf32>
    %cst_176 = arith.constant dense<0.000000e+00> : vector<16xf32>
    %274 = vector.multi_reduction <add>, %273, %cst_176 [1] : vector<16x16xf32> to vector<16xf32>
    %275 = vector.shape_cast %274 : vector<16xf32> to vector<16x1xf32>
    %276 = tpu.reciprocal %275 : vector<16x1xf32> -> vector<16x1xf32>
    %277 = vector.broadcast %276 : vector<16x1xf32> to vector<16x16xf32>
    %278 = arith.mulf %273, %277 : vector<16x16xf32>
    %279 = tpu.transpose %260, [1, 0] : vector<16x16xf32> -> vector<16x16xf32>
    %cst_177 = arith.constant dense<0.000000e+00> : vector<16x16xf32>
    %280 = tpu.matmul %279, %262, %cst_177 {dimension_numbers = #tpu.dot_dimension_numbers<[1], [0], [0], [1], [0, 0, 1, 1], [], []>} : vector<16x16xf32>, vector<16x16xf32>, vector<16x16xf32> -> vector<16x16xf32>
    %cst_178 = arith.constant 0.353553385 : f32
    %281 = vector.broadcast %cst_178 : f32 to vector<16x16xf32>
    %282 = arith.mulf %280, %281 : vector<16x16xf32>
    %cst_179 = arith.constant dense<0xFF800000> : vector<16xf32>
    %283 = vector.multi_reduction <maximumf>, %282, %cst_179 [0] : vector<16x16xf32> to vector<16xf32>
    %284 = vector.shape_cast %283 : vector<16xf32> to vector<1x16xf32>
    %285 = vector.broadcast %284 : vector<1x16xf32> to vector<16x16xf32>
    %286 = arith.subf %282, %285 : vector<16x16xf32>
    %287 = math.exp %286 : vector<16x16xf32>
    %cst_180 = arith.constant dense<0.000000e+00> : vector<16xf32>
    %288 = vector.multi_reduction <add>, %287, %cst_180 [0] : vector<16x16xf32> to vector<16xf32>
    %289 = vector.shape_cast %288 : vector<16xf32> to vector<1x16xf32>
    %290 = tpu.reciprocal %289 : vector<1x16xf32> -> vector<1x16xf32>
    %291 = vector.broadcast %290 : vector<1x16xf32> to vector<16x16xf32>
    %292 = arith.mulf %287, %291 : vector<16x16xf32>
    %cst_181 = arith.constant dense<0.000000e+00> : vector<16x16xf32>
    %293 = tpu.matmul %278, %264, %cst_181 {dimension_numbers = #tpu.dot_dimension_numbers<[1], [0], [0], [1], [0, 0, 1, 1], [], []>} : vector<16x16xf32>, vector<16x16xf32>, vector<16x16xf32> -> vector<16x16xf32>
    %cst_182 = arith.constant dense<0.000000e+00> : vector<16x16xf32>
    %294 = tpu.matmul %293, %292, %cst_182 {dimension_numbers = #tpu.dot_dimension_numbers<[1], [0], [0], [1], [0, 0, 1, 1], [], []>} : vector<16x16xf32>, vector<16x16xf32>, vector<16x16xf32> -> vector<16x16xf32>
    %c0_183 = arith.constant 0 : index
    %c3_184 = arith.constant 3 : index
    %c0_185 = arith.constant 0 : index
    %c0_186 = arith.constant 0 : index
    %295 = vector.load %arg7[%c0_183, %c3_184, %c0_185, %c0_186] : memref<1x8x16x16xf32, #tpu.memory_space<vmem>>, vector<1x1x16x16xf32>
    %296 = vector.shape_cast %295 : vector<1x1x16x16xf32> to vector<16x16xf32>
    %297 = vector.shape_cast %294 : vector<16x16xf32> to vector<1x1x16x16xf32>
    tpu.vector_store %arg7[%c0_183, %c3_184, %c0_185, %c0_186], %297 {strides = array<i32>} : memref<1x8x16x16xf32, #tpu.memory_space<vmem>>, vector<1x1x16x16xf32>,
    %c4_187 = arith.constant 4 : index
    %c0_188 = arith.constant 0 : index
    %c0_189 = arith.constant 0 : index
    %298 = vector.load %arg8[%c4_187, %c0_188, %c0_189] : memref<8x16x16xf32, #tpu.memory_space<vmem>>, vector<1x16x16xf32>
    %299 = vector.shape_cast %298 : vector<1x16x16xf32> to vector<16x16xf32>
    %c4_190 = arith.constant 4 : index
    %c0_191 = arith.constant 0 : index
    %c0_192 = arith.constant 0 : index
    %300 = vector.load %arg9[%c4_190, %c0_191, %c0_192] : memref<16x16x16xf32, #tpu.memory_space<vmem>>, vector<1x16x16xf32>
    %301 = vector.shape_cast %300 : vector<1x16x16xf32> to vector<16x16xf32>
    %c12_193 = arith.constant 12 : index
    %c0_194 = arith.constant 0 : index
    %c0_195 = arith.constant 0 : index
    %302 = vector.load %arg9[%c12_193, %c0_194, %c0_195] : memref<16x16x16xf32, #tpu.memory_space<vmem>>, vector<1x16x16xf32>
    %303 = vector.shape_cast %302 : vector<1x16x16xf32> to vector<16x16xf32>
    %304 = tpu.transpose %301, [1, 0] : vector<16x16xf32> -> vector<16x16xf32>
    %cst_196 = arith.constant dense<0.000000e+00> : vector<16x16xf32>
    %305 = tpu.matmul %299, %304, %cst_196 {dimension_numbers = #tpu.dot_dimension_numbers<[1], [0], [0], [1], [0, 0, 1, 1], [], []>} : vector<16x16xf32>, vector<16x16xf32>, vector<16x16xf32> -> vector<16x16xf32>
    %cst_197 = arith.constant 0.353553385 : f32
    %306 = vector.broadcast %cst_197 : f32 to vector<16x16xf32>
    %307 = arith.mulf %305, %306 : vector<16x16xf32>
    %cst_198 = arith.constant dense<0xFF800000> : vector<16xf32>
    %308 = vector.multi_reduction <maximumf>, %307, %cst_198 [1] : vector<16x16xf32> to vector<16xf32>
    %309 = vector.shape_cast %308 : vector<16xf32> to vector<16x1xf32>
    %310 = vector.broadcast %309 : vector<16x1xf32> to vector<16x16xf32>
    %311 = arith.subf %307, %310 : vector<16x16xf32>
    %312 = math.exp %311 : vector<16x16xf32>
    %cst_199 = arith.constant dense<0.000000e+00> : vector<16xf32>
    %313 = vector.multi_reduction <add>, %312, %cst_199 [1] : vector<16x16xf32> to vector<16xf32>
    %314 = vector.shape_cast %313 : vector<16xf32> to vector<16x1xf32>
    %315 = tpu.reciprocal %314 : vector<16x1xf32> -> vector<16x1xf32>
    %316 = vector.broadcast %315 : vector<16x1xf32> to vector<16x16xf32>
    %317 = arith.mulf %312, %316 : vector<16x16xf32>
    %318 = tpu.transpose %299, [1, 0] : vector<16x16xf32> -> vector<16x16xf32>
    %cst_200 = arith.constant dense<0.000000e+00> : vector<16x16xf32>
    %319 = tpu.matmul %318, %301, %cst_200 {dimension_numbers = #tpu.dot_dimension_numbers<[1], [0], [0], [1], [0, 0, 1, 1], [], []>} : vector<16x16xf32>, vector<16x16xf32>, vector<16x16xf32> -> vector<16x16xf32>
    %cst_201 = arith.constant 0.353553385 : f32
    %320 = vector.broadcast %cst_201 : f32 to vector<16x16xf32>
    %321 = arith.mulf %319, %320 : vector<16x16xf32>
    %cst_202 = arith.constant dense<0xFF800000> : vector<16xf32>
    %322 = vector.multi_reduction <maximumf>, %321, %cst_202 [0] : vector<16x16xf32> to vector<16xf32>
    %323 = vector.shape_cast %322 : vector<16xf32> to vector<1x16xf32>
    %324 = vector.broadcast %323 : vector<1x16xf32> to vector<16x16xf32>
    %325 = arith.subf %321, %324 : vector<16x16xf32>
    %326 = math.exp %325 : vector<16x16xf32>
    %cst_203 = arith.constant dense<0.000000e+00> : vector<16xf32>
    %327 = vector.multi_reduction <add>, %326, %cst_203 [0] : vector<16x16xf32> to vector<16xf32>
    %328 = vector.shape_cast %327 : vector<16xf32> to vector<1x16xf32>
    %329 = tpu.reciprocal %328 : vector<1x16xf32> -> vector<1x16xf32>
    %330 = vector.broadcast %329 : vector<1x16xf32> to vector<16x16xf32>
    %331 = arith.mulf %326, %330 : vector<16x16xf32>
    %cst_204 = arith.constant dense<0.000000e+00> : vector<16x16xf32>
    %332 = tpu.matmul %317, %303, %cst_204 {dimension_numbers = #tpu.dot_dimension_numbers<[1], [0], [0], [1], [0, 0, 1, 1], [], []>} : vector<16x16xf32>, vector<16x16xf32>, vector<16x16xf32> -> vector<16x16xf32>
    %cst_205 = arith.constant dense<0.000000e+00> : vector<16x16xf32>
    %333 = tpu.matmul %332, %331, %cst_205 {dimension_numbers = #tpu.dot_dimension_numbers<[1], [0], [0], [1], [0, 0, 1, 1], [], []>} : vector<16x16xf32>, vector<16x16xf32>, vector<16x16xf32> -> vector<16x16xf32>
    %c0_206 = arith.constant 0 : index
    %c4_207 = arith.constant 4 : index
    %c0_208 = arith.constant 0 : index
    %c0_209 = arith.constant 0 : index
    %334 = vector.load %arg7[%c0_206, %c4_207, %c0_208, %c0_209] : memref<1x8x16x16xf32, #tpu.memory_space<vmem>>, vector<1x1x16x16xf32>
    %335 = vector.shape_cast %334 : vector<1x1x16x16xf32> to vector<16x16xf32>
    %336 = vector.shape_cast %333 : vector<16x16xf32> to vector<1x1x16x16xf32>
    tpu.vector_store %arg7[%c0_206, %c4_207, %c0_208, %c0_209], %336 {strides = array<i32>} : memref<1x8x16x16xf32, #tpu.memory_space<vmem>>, vector<1x1x16x16xf32>,
    %c5_210 = arith.constant 5 : index
    %c0_211 = arith.constant 0 : index
    %c0_212 = arith.constant 0 : index
    %337 = vector.load %arg8[%c5_210, %c0_211, %c0_212] : memref<8x16x16xf32, #tpu.memory_space<vmem>>, vector<1x16x16xf32>
    %338 = vector.shape_cast %337 : vector<1x16x16xf32> to vector<16x16xf32>
    %c5_213 = arith.constant 5 : index
    %c0_214 = arith.constant 0 : index
    %c0_215 = arith.constant 0 : index
    %339 = vector.load %arg9[%c5_213, %c0_214, %c0_215] : memref<16x16x16xf32, #tpu.memory_space<vmem>>, vector<1x16x16xf32>
    %340 = vector.shape_cast %339 : vector<1x16x16xf32> to vector<16x16xf32>
    %c13_216 = arith.constant 13 : index
    %c0_217 = arith.constant 0 : index
    %c0_218 = arith.constant 0 : index
    %341 = vector.load %arg9[%c13_216, %c0_217, %c0_218] : memref<16x16x16xf32, #tpu.memory_space<vmem>>, vector<1x16x16xf32>
    %342 = vector.shape_cast %341 : vector<1x16x16xf32> to vector<16x16xf32>
    %343 = tpu.transpose %340, [1, 0] : vector<16x16xf32> -> vector<16x16xf32>
    %cst_219 = arith.constant dense<0.000000e+00> : vector<16x16xf32>
    %344 = tpu.matmul %338, %343, %cst_219 {dimension_numbers = #tpu.dot_dimension_numbers<[1], [0], [0], [1], [0, 0, 1, 1], [], []>} : vector<16x16xf32>, vector<16x16xf32>, vector<16x16xf32> -> vector<16x16xf32>
    %cst_220 = arith.constant 0.353553385 : f32
    %345 = vector.broadcast %cst_220 : f32 to vector<16x16xf32>
    %346 = arith.mulf %344, %345 : vector<16x16xf32>
    %cst_221 = arith.constant dense<0xFF800000> : vector<16xf32>
    %347 = vector.multi_reduction <maximumf>, %346, %cst_221 [1] : vector<16x16xf32> to vector<16xf32>
    %348 = vector.shape_cast %347 : vector<16xf32> to vector<16x1xf32>
    %349 = vector.broadcast %348 : vector<16x1xf32> to vector<16x16xf32>
    %350 = arith.subf %346, %349 : vector<16x16xf32>
    %351 = math.exp %350 : vector<16x16xf32>
    %cst_222 = arith.constant dense<0.000000e+00> : vector<16xf32>
    %352 = vector.multi_reduction <add>, %351, %cst_222 [1] : vector<16x16xf32> to vector<16xf32>
    %353 = vector.shape_cast %352 : vector<16xf32> to vector<16x1xf32>
    %354 = tpu.reciprocal %353 : vector<16x1xf32> -> vector<16x1xf32>
    %355 = vector.broadcast %354 : vector<16x1xf32> to vector<16x16xf32>
    %356 = arith.mulf %351, %355 : vector<16x16xf32>
    %357 = tpu.transpose %338, [1, 0] : vector<16x16xf32> -> vector<16x16xf32>
    %cst_223 = arith.constant dense<0.000000e+00> : vector<16x16xf32>
    %358 = tpu.matmul %357, %340, %cst_223 {dimension_numbers = #tpu.dot_dimension_numbers<[1], [0], [0], [1], [0, 0, 1, 1], [], []>} : vector<16x16xf32>, vector<16x16xf32>, vector<16x16xf32> -> vector<16x16xf32>
    %cst_224 = arith.constant 0.353553385 : f32
    %359 = vector.broadcast %cst_224 : f32 to vector<16x16xf32>
    %360 = arith.mulf %358, %359 : vector<16x16xf32>
    %cst_225 = arith.constant dense<0xFF800000> : vector<16xf32>
    %361 = vector.multi_reduction <maximumf>, %360, %cst_225 [0] : vector<16x16xf32> to vector<16xf32>
    %362 = vector.shape_cast %361 : vector<16xf32> to vector<1x16xf32>
    %363 = vector.broadcast %362 : vector<1x16xf32> to vector<16x16xf32>
    %364 = arith.subf %360, %363 : vector<16x16xf32>
    %365 = math.exp %364 : vector<16x16xf32>
    %cst_226 = arith.constant dense<0.000000e+00> : vector<16xf32>
    %366 = vector.multi_reduction <add>, %365, %cst_226 [0] : vector<16x16xf32> to vector<16xf32>
    %367 = vector.shape_cast %366 : vector<16xf32> to vector<1x16xf32>
    %368 = tpu.reciprocal %367 : vector<1x16xf32> -> vector<1x16xf32>
    %369 = vector.broadcast %368 : vector<1x16xf32> to vector<16x16xf32>
    %370 = arith.mulf %365, %369 : vector<16x16xf32>
    %cst_227 = arith.constant dense<0.000000e+00> : vector<16x16xf32>
    %371 = tpu.matmul %356, %342, %cst_227 {dimension_numbers = #tpu.dot_dimension_numbers<[1], [0], [0], [1], [0, 0, 1, 1], [], []>} : vector<16x16xf32>, vector<16x16xf32>, vector<16x16xf32> -> vector<16x16xf32>
    %cst_228 = arith.constant dense<0.000000e+00> : vector<16x16xf32>
    %372 = tpu.matmul %371, %370, %cst_228 {dimension_numbers = #tpu.dot_dimension_numbers<[1], [0], [0], [1], [0, 0, 1, 1], [], []>} : vector<16x16xf32>, vector<16x16xf32>, vector<16x16xf32> -> vector<16x16xf32>
    %c0_229 = arith.constant 0 : index
    %c5_230 = arith.constant 5 : index
    %c0_231 = arith.constant 0 : index
    %c0_232 = arith.constant 0 : index
    %373 = vector.load %arg7[%c0_229, %c5_230, %c0_231, %c0_232] : memref<1x8x16x16xf32, #tpu.memory_space<vmem>>, vector<1x1x16x16xf32>
    %374 = vector.shape_cast %373 : vector<1x1x16x16xf32> to vector<16x16xf32>
    %375 = vector.shape_cast %372 : vector<16x16xf32> to vector<1x1x16x16xf32>
    tpu.vector_store %arg7[%c0_229, %c5_230, %c0_231, %c0_232], %375 {strides = array<i32>} : memref<1x8x16x16xf32, #tpu.memory_space<vmem>>, vector<1x1x16x16xf32>,
    %c6_233 = arith.constant 6 : index
    %c0_234 = arith.constant 0 : index
    %c0_235 = arith.constant 0 : index
    %376 = vector.load %arg8[%c6_233, %c0_234, %c0_235] : memref<8x16x16xf32, #tpu.memory_space<vmem>>, vector<1x16x16xf32>
    %377 = vector.shape_cast %376 : vector<1x16x16xf32> to vector<16x16xf32>
    %c6_236 = arith.constant 6 : index
    %c0_237 = arith.constant 0 : index
    %c0_238 = arith.constant 0 : index
    %378 = vector.load %arg9[%c6_236, %c0_237, %c0_238] : memref<16x16x16xf32, #tpu.memory_space<vmem>>, vector<1x16x16xf32>
    %379 = vector.shape_cast %378 : vector<1x16x16xf32> to vector<16x16xf32>
    %c14_239 = arith.constant 14 : index
    %c0_240 = arith.constant 0 : index
    %c0_241 = arith.constant 0 : index
    %380 = vector.load %arg9[%c14_239, %c0_240, %c0_241] : memref<16x16x16xf32, #tpu.memory_space<vmem>>, vector<1x16x16xf32>
    %381 = vector.shape_cast %380 : vector<1x16x16xf32> to vector<16x16xf32>
    %382 = tpu.transpose %379, [1, 0] : vector<16x16xf32> -> vector<16x16xf32>
    %cst_242 = arith.constant dense<0.000000e+00> : vector<16x16xf32>
    %383 = tpu.matmul %377, %382, %cst_242 {dimension_numbers = #tpu.dot_dimension_numbers<[1], [0], [0], [1], [0, 0, 1, 1], [], []>} : vector<16x16xf32>, vector<16x16xf32>, vector<16x16xf32> -> vector<16x16xf32>
    %cst_243 = arith.constant 0.353553385 : f32
    %384 = vector.broadcast %cst_243 : f32 to vector<16x16xf32>
    %385 = arith.mulf %383, %384 : vector<16x16xf32>
    %cst_244 = arith.constant dense<0xFF800000> : vector<16xf32>
    %386 = vector.multi_reduction <maximumf>, %385, %cst_244 [1] : vector<16x16xf32> to vector<16xf32>
    %387 = vector.shape_cast %386 : vector<16xf32> to vector<16x1xf32>
    %388 = vector.broadcast %387 : vector<16x1xf32> to vector<16x16xf32>
    %389 = arith.subf %385, %388 : vector<16x16xf32>
    %390 = math.exp %389 : vector<16x16xf32>
    %cst_245 = arith.constant dense<0.000000e+00> : vector<16xf32>
    %391 = vector.multi_reduction <add>, %390, %cst_245 [1] : vector<16x16xf32> to vector<16xf32>
    %392 = vector.shape_cast %391 : vector<16xf32> to vector<16x1xf32>
    %393 = tpu.reciprocal %392 : vector<16x1xf32> -> vector<16x1xf32>
    %394 = vector.broadcast %393 : vector<16x1xf32> to vector<16x16xf32>
    %395 = arith.mulf %390, %394 : vector<16x16xf32>
    %396 = tpu.transpose %377, [1, 0] : vector<16x16xf32> -> vector<16x16xf32>
    %cst_246 = arith.constant dense<0.000000e+00> : vector<16x16xf32>
    %397 = tpu.matmul %396, %379, %cst_246 {dimension_numbers = #tpu.dot_dimension_numbers<[1], [0], [0], [1], [0, 0, 1, 1], [], []>} : vector<16x16xf32>, vector<16x16xf32>, vector<16x16xf32> -> vector<16x16xf32>
    %cst_247 = arith.constant 0.353553385 : f32
    %398 = vector.broadcast %cst_247 : f32 to vector<16x16xf32>
    %399 = arith.mulf %397, %398 : vector<16x16xf32>
    %cst_248 = arith.constant dense<0xFF800000> : vector<16xf32>
    %400 = vector.multi_reduction <maximumf>, %399, %cst_248 [0] : vector<16x16xf32> to vector<16xf32>
    %401 = vector.shape_cast %400 : vector<16xf32> to vector<1x16xf32>
    %402 = vector.broadcast %401 : vector<1x16xf32> to vector<16x16xf32>
    %403 = arith.subf %399, %402 : vector<16x16xf32>
    %404 = math.exp %403 : vector<16x16xf32>
    %cst_249 = arith.constant dense<0.000000e+00> : vector<16xf32>
    %405 = vector.multi_reduction <add>, %404, %cst_249 [0] : vector<16x16xf32> to vector<16xf32>
    %406 = vector.shape_cast %405 : vector<16xf32> to vector<1x16xf32>
    %407 = tpu.reciprocal %406 : vector<1x16xf32> -> vector<1x16xf32>
    %408 = vector.broadcast %407 : vector<1x16xf32> to vector<16x16xf32>
    %409 = arith.mulf %404, %408 : vector<16x16xf32>
    %cst_250 = arith.constant dense<0.000000e+00> : vector<16x16xf32>
    %410 = tpu.matmul %395, %381, %cst_250 {dimension_numbers = #tpu.dot_dimension_numbers<[1], [0], [0], [1], [0, 0, 1, 1], [], []>} : vector<16x16xf32>, vector<16x16xf32>, vector<16x16xf32> -> vector<16x16xf32>
    %cst_251 = arith.constant dense<0.000000e+00> : vector<16x16xf32>
    %411 = tpu.matmul %410, %409, %cst_251 {dimension_numbers = #tpu.dot_dimension_numbers<[1], [0], [0], [1], [0, 0, 1, 1], [], []>} : vector<16x16xf32>, vector<16x16xf32>, vector<16x16xf32> -> vector<16x16xf32>
    %c0_252 = arith.constant 0 : index
    %c6_253 = arith.constant 6 : index
    %c0_254 = arith.constant 0 : index
    %c0_255 = arith.constant 0 : index
    %412 = vector.load %arg7[%c0_252, %c6_253, %c0_254, %c0_255] : memref<1x8x16x16xf32, #tpu.memory_space<vmem>>, vector<1x1x16x16xf32>
    %413 = vector.shape_cast %412 : vector<1x1x16x16xf32> to vector<16x16xf32>
    %414 = vector.shape_cast %411 : vector<16x16xf32> to vector<1x1x16x16xf32>
    tpu.vector_store %arg7[%c0_252, %c6_253, %c0_254, %c0_255], %414 {strides = array<i32>} : memref<1x8x16x16xf32, #tpu.memory_space<vmem>>, vector<1x1x16x16xf32>,
    %c7_256 = arith.constant 7 : index
    %c0_257 = arith.constant 0 : index
    %c0_258 = arith.constant 0 : index
    %415 = vector.load %arg8[%c7_256, %c0_257, %c0_258] : memref<8x16x16xf32, #tpu.memory_space<vmem>>, vector<1x16x16xf32>
    %416 = vector.shape_cast %415 : vector<1x16x16xf32> to vector<16x16xf32>
    %c7_259 = arith.constant 7 : index
    %c0_260 = arith.constant 0 : index
    %c0_261 = arith.constant 0 : index
    %417 = vector.load %arg9[%c7_259, %c0_260, %c0_261] : memref<16x16x16xf32, #tpu.memory_space<vmem>>, vector<1x16x16xf32>
    %418 = vector.shape_cast %417 : vector<1x16x16xf32> to vector<16x16xf32>
    %c15_262 = arith.constant 15 : index
    %c0_263 = arith.constant 0 : index
    %c0_264 = arith.constant 0 : index
    %419 = vector.load %arg9[%c15_262, %c0_263, %c0_264] : memref<16x16x16xf32, #tpu.memory_space<vmem>>, vector<1x16x16xf32>
    %420 = vector.shape_cast %419 : vector<1x16x16xf32> to vector<16x16xf32>
    %421 = tpu.transpose %418, [1, 0] : vector<16x16xf32> -> vector<16x16xf32>
    %cst_265 = arith.constant dense<0.000000e+00> : vector<16x16xf32>
    %422 = tpu.matmul %416, %421, %cst_265 {dimension_numbers = #tpu.dot_dimension_numbers<[1], [0], [0], [1], [0, 0, 1, 1], [], []>} : vector<16x16xf32>, vector<16x16xf32>, vector<16x16xf32> -> vector<16x16xf32>
    %cst_266 = arith.constant 0.353553385 : f32
    %423 = vector.broadcast %cst_266 : f32 to vector<16x16xf32>
    %424 = arith.mulf %422, %423 : vector<16x16xf32>
    %cst_267 = arith.constant dense<0xFF800000> : vector<16xf32>
    %425 = vector.multi_reduction <maximumf>, %424, %cst_267 [1] : vector<16x16xf32> to vector<16xf32>
    %426 = vector.shape_cast %425 : vector<16xf32> to vector<16x1xf32>
    %427 = vector.broadcast %426 : vector<16x1xf32> to vector<16x16xf32>
    %428 = arith.subf %424, %427 : vector<16x16xf32>
    %429 = math.exp %428 : vector<16x16xf32>
    %cst_268 = arith.constant dense<0.000000e+00> : vector<16xf32>
    %430 = vector.multi_reduction <add>, %429, %cst_268 [1] : vector<16x16xf32> to vector<16xf32>
    %431 = vector.shape_cast %430 : vector<16xf32> to vector<16x1xf32>
    %432 = tpu.reciprocal %431 : vector<16x1xf32> -> vector<16x1xf32>
    %433 = vector.broadcast %432 : vector<16x1xf32> to vector<16x16xf32>
    %434 = arith.mulf %429, %433 : vector<16x16xf32>
    %435 = tpu.transpose %416, [1, 0] : vector<16x16xf32> -> vector<16x16xf32>
    %cst_269 = arith.constant dense<0.000000e+00> : vector<16x16xf32>
    %436 = tpu.matmul %435, %418, %cst_269 {dimension_numbers = #tpu.dot_dimension_numbers<[1], [0], [0], [1], [0, 0, 1, 1], [], []>} : vector<16x16xf32>, vector<16x16xf32>, vector<16x16xf32> -> vector<16x16xf32>
    %cst_270 = arith.constant 0.353553385 : f32
    %437 = vector.broadcast %cst_270 : f32 to vector<16x16xf32>
    %438 = arith.mulf %436, %437 : vector<16x16xf32>
    %cst_271 = arith.constant dense<0xFF800000> : vector<16xf32>
    %439 = vector.multi_reduction <maximumf>, %438, %cst_271 [0] : vector<16x16xf32> to vector<16xf32>
    %440 = vector.shape_cast %439 : vector<16xf32> to vector<1x16xf32>
    %441 = vector.broadcast %440 : vector<1x16xf32> to vector<16x16xf32>
    %442 = arith.subf %438, %441 : vector<16x16xf32>
    %443 = math.exp %442 : vector<16x16xf32>
    %cst_272 = arith.constant dense<0.000000e+00> : vector<16xf32>
    %444 = vector.multi_reduction <add>, %443, %cst_272 [0] : vector<16x16xf32> to vector<16xf32>
    %445 = vector.shape_cast %444 : vector<16xf32> to vector<1x16xf32>
    %446 = tpu.reciprocal %445 : vector<1x16xf32> -> vector<1x16xf32>
    %447 = vector.broadcast %446 : vector<1x16xf32> to vector<16x16xf32>
    %448 = arith.mulf %443, %447 : vector<16x16xf32>
    %cst_273 = arith.constant dense<0.000000e+00> : vector<16x16xf32>
    %449 = tpu.matmul %434, %420, %cst_273 {dimension_numbers = #tpu.dot_dimension_numbers<[1], [0], [0], [1], [0, 0, 1, 1], [], []>} : vector<16x16xf32>, vector<16x16xf32>, vector<16x16xf32> -> vector<16x16xf32>
    %cst_274 = arith.constant dense<0.000000e+00> : vector<16x16xf32>
    %450 = tpu.matmul %449, %448, %cst_274 {dimension_numbers = #tpu.dot_dimension_numbers<[1], [0], [0], [1], [0, 0, 1, 1], [], []>} : vector<16x16xf32>, vector<16x16xf32>, vector<16x16xf32> -> vector<16x16xf32>
    %c0_275 = arith.constant 0 : index
    %c7_276 = arith.constant 7 : index
    %c0_277 = arith.constant 0 : index
    %c0_278 = arith.constant 0 : index
    %451 = vector.load %arg7[%c0_275, %c7_276, %c0_277, %c0_278] : memref<1x8x16x16xf32, #tpu.memory_space<vmem>>, vector<1x1x16x16xf32>
    %452 = vector.shape_cast %451 : vector<1x1x16x16xf32> to vector<16x16xf32>
    %453 = vector.shape_cast %450 : vector<16x16xf32> to vector<1x1x16x16xf32>
    tpu.vector_store %arg7[%c0_275, %c7_276, %c0_277, %c0_278], %453 {strides = array<i32>} : memref<1x8x16x16xf32, #tpu.memory_space<vmem>>, vector<1x1x16x16xf32>,
    return
  }
  func.func @transform_0(%arg0: i32) -> (i32, i32) {
    %c0_i32 = arith.constant 0 : i32
    %c0_i32_0 = arith.constant 0 : i32
    %c0_i32_1 = arith.constant 0 : i32
    return %c0_i32, %c0_i32_0 : i32, i32
  }
  func.func @transform_1(%arg0: i32) -> (i32, i32) {
    %c0_i32 = arith.constant 0 : i32
    %c0_i32_0 = arith.constant 0 : i32
    %c0_i32_1 = arith.constant 0 : i32
    return %c0_i32, %c0_i32_0 : i32, i32
  }
  func.func @transform_2(%arg0: i32) -> (i32, i32) {
    %c0_i32 = arith.constant 0 : i32
    %c0_i32_0 = arith.constant 0 : i32
    %c0_i32_1 = arith.constant 0 : i32
    return %c0_i32, %c0_i32_0 : i32, i32
  }
  func.func @transform_3(%arg0: i32) -> (i32, i32) {
    %c0_i32 = arith.constant 0 : i32
    %c0_i32_0 = arith.constant 0 : i32
    %c0_i32_1 = arith.constant 0 : i32
    return %c0_i32, %c0_i32_0 : i32, i32
  }
  func.func @transform_4(%arg0: i32) -> (i32, i32, i32) {
    %c0_i32 = arith.constant 0 : i32
    %c0_i32_0 = arith.constant 0 : i32
    %c0_i32_1 = arith.constant 0 : i32
    return %arg0, %c0_i32, %c0_i32_0 : i32, i32, i32
  }
  func.func @transform_5(%arg0: i32) -> (i32, i32, i32) {
    %c0_i32 = arith.constant 0 : i32
    %c0_i32_0 = arith.constant 0 : i32
    %c0_i32_1 = arith.constant 0 : i32
    return %arg0, %c0_i32, %c0_i32_0 : i32, i32, i32
  }
  func.func @transform_6(%arg0: i32) -> (i32, i32, i32, i32) {
    %c0_i32 = arith.constant 0 : i32
    %c0_i32_0 = arith.constant 0 : i32
    %c0_i32_1 = arith.constant 0 : i32
    %c0_i32_2 = arith.constant 0 : i32
    return %arg0, %c0_i32, %c0_i32_0, %c0_i32_1 : i32, i32, i32, i32
  }
}

</mosaic_0001>

<bundles_post_ra>
// kernel: encdec_attention_forward.1
= control target key start
LH: loop header
LB: loop body
LE: loop exit
PB: predicated region body
PF: predicated region fallthrough
CT: control target
= control target key end

     0   :  { %11 = vsyncpa [#allocation5], 0  ;;  %s8473_s0 = inlined_call_operand.vmem [shape: f32[8,8], index: 0, kind: input, shape index: {}]   ;;  %s8474_s1 = inlined_call_operand.vmem [shape: f32[8,1], index: 1, kind: input, shape index: {}]   ;;  %s8475_s2 = inlined_call_operand.vmem [shape: f32[16,72], index: 2, kind: input, shape index: {}]   ;;  %s8476_s3 = inlined_call_operand.vmem [shape: f32[16,1], index: 3, kind: input, shape index: {}]   ;;  %s8477_s4 = inlined_call_operand.vmem [shape: f32[2,8,256], index: 4, kind: input, shape index: {}]   ;;  %s8478_s5 = inlined_call_operand.vmem [shape: f32[2,72,256], index: 5, kind: input, shape index: {}]   ;;  %s8479_s6 = inlined_call_operand.hbm [shape: f32[2,8,16,16], index: 6, kind: output, shape index: {}]  }
   0x1   :  { %13 = vsyncpa [#allocation5 + $0x1], 0  ;;  %s6644_s21 = smov 0   ;;  %s6646_s22 = smov 0  }
   0x2   :  { %s6648_s23 = smov 0   ;;  %s6650_s24 = smov 0  }
   0x3 LB: > { %s6665_s25 = sadd.s32 4294967295, %s6594_s24   ;;  %s5905_s26 = sadd.s32 4294967294, %s6594_s24   ;;  %s6594_s24 = sphi %s6650_s24, %s8485_s24   ;;  %s6590_s23 = sphi %s6648_s23, %s8484_s23   ;;  %s6586_s22 = sphi %s6646_s22, %s8483_s22   ;;  %s6582_s21 = sphi %s6644_s21, %s8482_s21  }
   0x4   : > { %s6669_s27 = sadd.s32 1, %s6594_s24   ;;  %s162_s28 = sadd.s32 1, %s6590_s23 }
   0x5   : > { %s159_s29 = ssub.s32 %s6594_s24, %s6669_s27  ;;  %p172_p0 = scmp.ne.s32.totalorder %s6590_s23, %s6586_s22 }
   0x6   : > { %p160_p1 = scmp.eq.s32.totalorder %s159_s29, 0  ;;  %p173_p2 = scmp.eq.s32.totalorder %s6665_s25, 1 }
   0x7   : > { %p178_p3 = scmp.ne.s32.totalorder %s6586_s22, %s6582_s21  ;;  %p179_p4 = scmp.eq.s32.totalorder %s5905_s26, 1 }
   0x8   : > { %s6680_s30 = scalar_select %p160_p1, %s6590_s23, %s162_s28  }
   0x9   : > { %p6682_p5 = por %p173_p2, %p172_p0  ;;  %p6686_p6 = por %p179_p4, %p178_p3 }
   0xa   : > { %p5908_p7 = scmp.ge.s32.totalorder %s6594_s24, 1  ;;  %p225_p8 = scmp.lt.s32.totalorder %s6594_s24, 3 }
   0xc   : > { %p226_p9 = pnand %p5908_p7, %p225_p8 }
   0xd   : > { %p260_p10 = scmp.lt.s32.totalorder (!%p226_p9), %s6665_s25, 1  ;;  %s6600_s14 = smov (!%p226_p9), 112  }
   0xe   : > { %229 = sbr.rel (%p226_p9) target bundleno = 4677 (0x1245), region = 44  ;;  %s6601_s15 = smov (!%p226_p9), 64  }
   0xf   : > { %s6602_s16 = smov (!%p226_p9), 80   ;;  %s6603_s17 = smov (!%p226_p9), 32  }
  0x10   : > { %s6605_s19 = smov (!%p226_p9), 16   ;;  %s257_s28 = sand.u32 (!%p226_p9), 1, %s6586_s22  }
  0x11   : > { %s5909_s29 = sshll.u32 (!%p226_p9), %s257_s28, 7  ;;  %s6016_s10 = sshll.u32 (!%p226_p9), %s6665_s25, 11 }
  0x12   : > { %s7442_s9 = scalar_lea.vmem (!%p226_p9), [#allocation4], %s5909_s29 }
  0x13   : > { %v6596_v0 = vmov 0.0   ;;  %v374_v1 = vld [vmem:[%s8476_s3] sm:$0xff]  ;;  %s261_s11 = scalar_select %p260_p10, %s6665_s25, 1  ;;  %v6597_v2 = vmov 0   ;;  %vm279_vm0 = vcmask 64512   ;;  %vm386_vm1 = vcmask 588800  }
  0x14   : > { %347 = vmatprep.mubr.f32.mxu0 %v6596_v0  ;;  %457 = vmatprep.mubr.f32.mxu1 %v6596_v0  ;;  %v273_v3 = vld [vmem:[%s8474_s1] sm:$0xff]  ;;  %v355_v26 = vld [vmem:[%s8475_s2 + $0x8] sm:$0xff]  ;;  %v6598_v27 = vmov 1966171168   ;;  %v475_v29 = vlaneseq  ;;  %vm528_vm2 = vcmask 122880   ;;  %vm2410_vm3 = vcmask 130048  }
  0x15   : > { %6421 = vset.pattern.permute.xlu0 %v6597_v2  ;;  %s6015_s12 = sshll.u32 %s261_s11, 4  ;;  %s6369_s13 = smul.u32 144, %s261_s11  ;;  %v270_v6 = vld [vmem:[%s8473_s0] sm:$0xff]  ;;  %v473_v28 = vunpack.c.l.s4 %v6598_v27 }
  0x16   : > { %378 = vperm.xlu0 %6421, %v374_v1   ;;  %s264_s18 = scalar_lea.vmem %s8477_s4, %s6015_s12  ;;  %v354_v25 = vld [vmem:[%s8475_s2] sm:$0xff]  ;;  %v476_v32 = vshrl.u32 %v475_v29, 7  ;;  %s5831_s11 = sshll.u32 %s7442_s9, 4  ;;  %s8425_s11 = int_to_ptr.vmem [resolvable:$true] %s5831_s11 }
  0x17   : > { %s6706_s26 = scalar_lea.vmem %s8478_s5, %s6369_s13  ;;  %v272_v4 = vld [vmem:[%s264_s18 + $0x8] sm:$0xff]  ;;  %v271_v5 = vld [vmem:[%s264_s18] sm:$0xff]  ;;  %v474_v31 = vunpack.c.0.s8 %v473_v28  ;;  %s6599_s13 = smov 96  }
  0x18   : > { %313 = vmatprep.subr.mxu0 %v272_v4  ;;  %v373_v7 = vld [vmem:[%s6706_s26 + $0x88] sm:$0xff]  ;;  %v372_v8 = vld [vmem:[%s6706_s26 + $0x80] sm:$0xff]  ;;  %v371_v9 = vld [vmem:[%s6706_s26 + $0x78] sm:$0xff]  ;;  %v6740_v41 = vsub.s32 0, %v476_v32  ;;  %s6604_s18 = smov 48   ;;  %s6534_s25 = scalar_lea.vmem %s8425_s11, 2048 }
  0x19   : > { %314 = vmatpush1.msra.mxu0 %v271_v5  ;;  %407 = vmatprep.subr.mxu1 %v373_v7  ;;  %v370_v10 = vld [vmem:[%s6706_s26 + $0x70] sm:$0xff]  ;;  %v369_v11 = vld [vmem:[%s6706_s26 + $0x68] sm:$0xff]  ;;  %v368_v12 = vld [vmem:[%s6706_s26 + $0x60] sm:$0xff]  ;;  %v6737_v33 = vsub.s32 %v474_v31, %v476_v32  ;;  %p6535_p11 = scmp.ne.s32.totalorder %s8425_s11, %s6534_s25 }
  0x1a   : > { %276 = vperm.xlu0 %6421, %v273_v3   ;;  %5913 = vmatmul.mubr.msk.f32.vlgmr.msra.gmra.mxu0 %vm279_vm0, %v270_v6  ;;  %v367_v13 = vld [vmem:[%s6706_s26 + $0x58] sm:$0xff]  ;;  %v366_v14 = vld [vmem:[%s6706_s26 + $0x50] sm:$0xff]  ;;  %v365_v15 = vld [vmem:[%s6706_s26 + $0x48] sm:$0xff] }
  0x1b   : > { %408 = vmatpush1.msra.mxu1 %v372_v8  ;;  %v364_v16 = vld [vmem:[%s6706_s26 + $0x40] sm:$0xff]  ;;  %v363_v17 = vld [vmem:[%s6706_s26 + $0x38] sm:$0xff]  ;;  %v362_v18 = vld [vmem:[%s6706_s26 + $0x30] sm:$0xff]  ;;  %p6536_p12 = pnand %p6535_p11, %p6682_p5 }
  0x1c   : > { %409 = vmatprep.subr.mxu1 %v371_v9  ;;  %v361_v19 = vld [vmem:[%s6706_s26 + $0x28] sm:$0xff]  ;;  %v360_v20 = vld [vmem:[%s6706_s26 + $0x20] sm:$0xff]  ;;  %v359_v21 = vld [vmem:[%s6706_s26 + $0x18] sm:$0xff] }
  0x1d   : > { %410 = vmatpush1.msra.mxu1 %v370_v10  ;;  %v358_v22 = vld [vmem:[%s6706_s26 + $0x10] sm:$0xff]  ;;  %v357_v23 = vld [vmem:[%s6706_s26 + $0x8] sm:$0xff]  ;;  %v356_v24 = vld [vmem:[%s6706_s26] sm:$0xff]  ;;  %p6537_p13 = pneg %p6536_p12 }
  0x1e   : > { %411 = vmatprep.subr.mxu1 %v369_v11 }
  0x1f   : > { %412 = vmatpush1.msra.mxu1 %v368_v12 }
  0x20   : > { %413 = vmatprep.subr.mxu1 %v367_v13 }
  0x21   : > { %414 = vmatpush1.msra.mxu1 %v366_v14 }
  0x22   : > { %415 = vmatprep.subr.mxu1 %v365_v15 }
  0x23   : > { %416 = vmatpush1.msra.mxu1 %v364_v16 }
  0x24   : > { %417 = vmatprep.subr.mxu1 %v363_v17 }
  0x25   : > { %418 = vmatpush1.msra.mxu1 %v362_v18 }
  0x26   : > { %419 = vmatprep.subr.mxu1 %v361_v19 }
  0x27   : > { %420 = vmatpush1.msra.mxu1 %v360_v20 }
  0x28   : > { %421 = vmatprep.subr.mxu1 %v359_v21 }
  0x29   : > { %422 = vmatpush1.msra.mxu1 %v358_v22 }
  0x2a   : > { %423 = vmatprep.subr.mxu1 %v357_v23 }
  0x2b   : > { %424 = vmatpush1.msra.mxu1 %v356_v24 }
  0x2c   : > { %5914 = vmatmul.mubr.msk.f32.vlgmr.msra.gmra.mxu1 %vm386_vm1, %v354_v25 }
  0x2d   : > { %463 = vmatprep.mubr.f32.mxu1 %v6596_v0 }
  0x30   : > { %5915 = vmatmul.mubr.msk.f32.gmra.mxu1 %vm386_vm1, %v355_v26 }
  0x91   : > { %v6735_v30 = vpop.permute.xlu0 %378 }
  0x95   : > { %v277_v34 = vpop.permute.xlu0 %276 }
  0xda   : > { %v349_v35 = vpop.f32.mrf.mxu0 }
  0xdb   : > { %v350_v36 = vadd.f32 %v349_v35, %v277_v34 }
  0xdc   : > { %v351_v37 = vpop.f32.mrf.mxu0 }
  0xdd   : > { %v471_v38 = vcombine.high %v350_v36, %v350_v36  ;;  %v478_v39 = vrot.slane %v350_v36, %v6737_v33  ;;  %v352_v40 = vadd.f32 %v351_v37, %v277_v34 }
  0xdf   : > { %v485_v42 = vrot.slane %v471_v38, %v6737_v33  ;;  %v486_v43 = vcombine.high %v478_v39, %v478_v39  ;;  %v494_v44 = vrot.slane %v478_v39, %v6737_v33  ;;  %v1438_v45 = vcombine.high %v352_v40, %v352_v40 }
  0xe0   : > { %v1445_v46 = vrot.slane %v352_v40, %v6737_v33 }
  0xe1   : > { %v487_v47 = vcombine.high %v485_v42, %v485_v42  ;;  %v6746_v48 = vrot.slane %v485_v42, %v6737_v33  ;;  %v6749_v49 = vrot.slane %v486_v43, %v6737_v33  ;;  %v6751_v50 = vcombine.high %v494_v44, %v494_v44  ;;  %529 = vst.msk [vmem:[#allocation2] sm:$0x1] %vm528_vm2, %v494_v44  ;;  %v375_v42 = vld [vmem:[%s8476_s3 + $0x8] sm:$0xff] }
  0xe2   : > { %v672_v51 = vrot.slane %v494_v44, %v6740_v41  ;;  %v1452_v52 = vrot.slane %v1438_v45, %v6737_v33  ;;  %v1453_v53 = vcombine.high %v1445_v46, %v1445_v46  ;;  %v1461_v54 = vrot.slane %v1445_v46, %v6737_v33 }
  0xe3   : > { %v6758_v55 = vrot.slane %v487_v47, %v6737_v33  ;;  %v6762_v56 = vcombine.high %v6746_v48, %v6746_v48  ;;  %v6766_v57 = vcombine.high %v6749_v49, %v6749_v49  ;;  %530 = vst.msk [vmem:[#allocation2 + $0x10] sm:$0x1] %vm528_vm2, %v6749_v49  ;;  %531 = vst.msk [vmem:[#allocation2 + $0x20] sm:$0x1] %vm528_vm2, %v6751_v50 }
  0xe4   : > { %533 = vst.msk [vmem:[#allocation2 + $0x40] sm:$0x1] %vm528_vm2, %v6746_v48  ;;  %v1454_v58 = vcombine.high %v1452_v52, %v1452_v52  ;;  %v6775_v59 = vrot.slane %v1452_v52, %v6737_v33  ;;  %1495 = vst.msk [vmem:[#allocation2 + $0x8] sm:$0x1] %vm528_vm2, %v1461_v54  ;;  %861 = vrot.lane.b32.xlu1 %v672_v51, %s6599_s13  ;;  %701 = vrot.lane.b32.xlu0 %v672_v51, %s6600_s14 }
  0xe5   : > { %v6781_v60 = vcombine.high %v6758_v55, %v6758_v55  ;;  %532 = vst.msk [vmem:[#allocation2 + $0x30] sm:$0x1] %vm528_vm2, %v6766_v57  ;;  %534 = vst.msk [vmem:[#allocation2 + $0x50] sm:$0x1] %vm528_vm2, %v6758_v55  ;;  %v6791_v61 = vrot.slane %v1453_v53, %v6737_v33  ;;  %v6796_v63 = vcombine.high %v1461_v54, %v1461_v54 }
  0xe6   : > { %535 = vst.msk [vmem:[#allocation2 + $0x60] sm:$0x1] %vm528_vm2, %v6762_v56  ;;  %v6794_v62 = vrot.slane %v1454_v58, %v6737_v33  ;;  %v6800_v0 = vcombine.high %v6775_v59, %v6775_v59  ;;  %1499 = vst.msk [vmem:[#allocation2 + $0x48] sm:$0x1] %vm528_vm2, %v6775_v59  ;;  %v6832_v6 = vrot.slane %v1461_v54, %v6740_v41 }
  0xe7   : > { %536 = vst.msk [vmem:[#allocation2 + $0x70] sm:$0x1] %vm528_vm2, %v6781_v60  ;;  %v6808_v1 = vcombine.high %v6791_v61, %v6791_v61  ;;  %1496 = vst.msk [vmem:[#allocation2 + $0x18] sm:$0x1] %vm528_vm2, %v6791_v61  ;;  %v676_v37 = vrot.slane %v6749_v49, %v6740_v41  ;;  %v1642_v38 = vrot.slane %v6791_v61, %v6740_v41 }
  0xe8   : > { %v6812_v2 = vcombine.high %v6794_v62, %v6794_v62  ;;  %1497 = vst.msk [vmem:[#allocation2 + $0x28] sm:$0x1] %vm528_vm2, %v6796_v63  ;;  %1500 = vst.msk [vmem:[#allocation2 + $0x58] sm:$0x1] %vm528_vm2, %v6794_v62  ;;  %1053 = vrot.lane.b32.xlu1 %v672_v51, %s6601_s15  ;;  %957 = vrot.lane.b32.xlu0 %v672_v51, %s6602_s16 }
  0xe9   : > { %1501 = vst.msk [vmem:[#allocation2 + $0x68] sm:$0x1] %vm528_vm2, %v6800_v0  ;;  %1498 = vst.msk [vmem:[#allocation2 + $0x38] sm:$0x1] %vm528_vm2, %v6808_v1 }
  0xea   : > { %1502 = vst.msk [vmem:[#allocation2 + $0x78] sm:$0x1] %vm528_vm2, %v6812_v2 }
  0xec   : > { %v459_v3 = vpop.f32.mrf.mxu1  ;;  %1245 = vrot.lane.b32.xlu1 %v672_v51, %s6603_s17  ;;  %1149 = vrot.lane.b32.xlu0 %v672_v51, %s6604_s18 }
  0xed   : > { %v460_v4 = vadd.f32 %v459_v3, %v6735_v30 }
  0xee   : > { %v461_v5 = vpop.f32.mrf.mxu1 }
  0xef   : > { %v539_v7 = vcombine.high %v460_v4, %v460_v4  ;;  %v546_v8 = vrot.slane %v460_v4, %v6737_v33  ;;  %v462_v9 = vadd.f32 %v461_v5, %v6735_v30 }
  0xf0   : > { %1667 = vrot.lane.b32.xlu1 %v6832_v6, %s6600_s14  ;;  %1341 = vrot.lane.b32.xlu0 %v672_v51, %s6605_s19 }
  0xf1   : > { %v553_v10 = vrot.slane %v539_v7, %v6737_v33  ;;  %v554_v11 = vcombine.high %v546_v8, %v546_v8  ;;  %v562_v12 = vrot.slane %v546_v8, %v6737_v33  ;;  %v1505_v13 = vcombine.high %v462_v9, %v462_v9 }
  0xf2   : > { %v1512_v14 = vrot.slane %v462_v9, %v6737_v33 }
  0xf3   : > { %v555_v15 = vcombine.high %v553_v10, %v553_v10  ;;  %v6843_v16 = vrot.slane %v553_v10, %v6737_v33  ;;  %v6846_v17 = vrot.slane %v554_v11, %v6737_v33  ;;  %v6848_v18 = vcombine.high %v562_v12, %v562_v12  ;;  %653 = vst.msk [vmem:[#allocation3] sm:$0x1] %vm528_vm2, %v562_v12 }
  0xf4   : > { %v1519_v19 = vrot.slane %v1505_v13, %v6737_v33  ;;  %v1520_v20 = vcombine.high %v1512_v14, %v1512_v14  ;;  %v1528_v21 = vrot.slane %v1512_v14, %v6737_v33  ;;  %1923 = vrot.lane.b32.xlu1 %v6832_v6, %s6602_s16  ;;  %1827 = vrot.lane.b32.xlu0 %v6832_v6, %s6599_s13 }
  0xf5   : > { %v6854_v22 = vrot.slane %v555_v15, %v6737_v33  ;;  %v6858_v23 = vcombine.high %v6843_v16, %v6843_v16  ;;  %v6862_v24 = vcombine.high %v6846_v17, %v6846_v17  ;;  %654 = vst.msk [vmem:[#allocation3 + $0x10] sm:$0x1] %vm528_vm2, %v6846_v17  ;;  %655 = vst.msk [vmem:[#allocation3 + $0x20] sm:$0x1] %vm528_vm2, %v6848_v18 }
  0xf6   : > { %657 = vst.msk [vmem:[#allocation3 + $0x40] sm:$0x1] %vm528_vm2, %v6843_v16  ;;  %v1521_v25 = vcombine.high %v1519_v19, %v1519_v19  ;;  %v6873_v26 = vrot.slane %v1519_v19, %v6737_v33  ;;  %1619 = vst.msk [vmem:[#allocation3 + $0x8] sm:$0x1] %vm528_vm2, %v1528_v21  ;;  %v736_v28 = vrot.slane %v562_v12, %v6740_v41 }
  0xf7   : > { %v6880_v27 = vcombine.high %v6854_v22, %v6854_v22  ;;  %656 = vst.msk [vmem:[#allocation3 + $0x30] sm:$0x1] %vm528_vm2, %v6862_v24  ;;  %658 = vst.msk [vmem:[#allocation3 + $0x50] sm:$0x1] %vm528_vm2, %v6854_v22  ;;  %v1542_v29 = vrot.slane %v1520_v20, %v6737_v33  ;;  %v6893_v31 = vcombine.high %v1528_v21, %v1528_v21 }
  0xf8   : > { %659 = vst.msk [vmem:[#allocation3 + $0x60] sm:$0x1] %vm528_vm2, %v6858_v23  ;;  %v6891_v30 = vrot.slane %v1521_v25, %v6737_v33  ;;  %v6897_v32 = vcombine.high %v6873_v26, %v6873_v26  ;;  %1623 = vst.msk [vmem:[#allocation3 + $0x48] sm:$0x1] %vm528_vm2, %v6873_v26  ;;  %797 = vrot.lane.b32.xlu1 %v736_v28, %s6600_s14  ;;  %893 = vrot.lane.b32.xlu0 %v736_v28, %s6599_s13 }
  0xf9   : > { %660 = vst.msk [vmem:[#allocation3 + $0x70] sm:$0x1] %vm528_vm2, %v6880_v27  ;;  %v6904_v34 = vcombine.high %v1542_v29, %v1542_v29  ;;  %1620 = vst.msk [vmem:[#allocation3 + $0x18] sm:$0x1] %vm528_vm2, %v1542_v29  ;;  %v1702_v36 = vrot.slane %v1528_v21, %v6740_v41  ;;  %v740_v39 = vrot.slane %v6846_v17, %v6740_v41 }
  0xfa   : > { %v6908_v35 = vcombine.high %v6891_v30, %v6891_v30  ;;  %1621 = vst.msk [vmem:[#allocation3 + $0x28] sm:$0x1] %vm528_vm2, %v6893_v31  ;;  %1624 = vst.msk [vmem:[#allocation3 + $0x58] sm:$0x1] %vm528_vm2, %v6891_v30  ;;  %v1706_v40 = vrot.slane %v1542_v29, %v6740_v41 }
  0xfb   : > { %1625 = vst.msk [vmem:[#allocation3 + $0x68] sm:$0x1] %vm528_vm2, %v6897_v32  ;;  %1622 = vst.msk [vmem:[#allocation3 + $0x38] sm:$0x1] %vm528_vm2, %v6904_v34 }
  0xfc   : > { %1626 = vst.msk [vmem:[#allocation3 + $0x78] sm:$0x1] %vm528_vm2, %v6908_v35  ;;  %989 = vrot.lane.b32.xlu1 %v736_v28, %s6602_s16  ;;  %1085 = vrot.lane.b32.xlu0 %v736_v28, %s6601_s15 }
 0x100   : > { %1181 = vrot.lane.b32.xlu1 %v736_v28, %s6604_s18  ;;  %1277 = vrot.lane.b32.xlu0 %v736_v28, %s6603_s17 }
 0x104   : > { %1373 = vrot.lane.b32.xlu1 %v736_v28, %s6605_s19  ;;  %1955 = vrot.lane.b32.xlu0 %v1702_v36, %s6602_s16 }
 0x108   : > { %1763 = vrot.lane.b32.xlu1 %v1702_v36, %s6600_s14  ;;  %2147 = vrot.lane.b32.xlu0 %v1702_v36, %s6604_s18 }
 0x10c   : > { %1859 = vrot.lane.b32.xlu1 %v1702_v36, %s6599_s13  ;;  %2339 = vrot.lane.b32.xlu0 %v1702_v36, %s6605_s19 }
 0x110   : > { %2051 = vrot.lane.b32.xlu1 %v1702_v36, %s6601_s15  ;;  %2019 = vrot.lane.b32.xlu0 %v6832_v6, %s6601_s15 }
 0x114   : > { %2243 = vrot.lane.b32.xlu1 %v1702_v36, %s6603_s17  ;;  %2211 = vrot.lane.b32.xlu0 %v6832_v6, %s6603_s17 }
 0x118   : > { %2115 = vrot.lane.b32.xlu1 %v6832_v6, %s6604_s18  ;;  %703 = vrot.lane.b32.xlu0 %v676_v37, %s6600_s14 }
 0x11c   : > { %2307 = vrot.lane.b32.xlu1 %v6832_v6, %s6605_s19  ;;  %959 = vrot.lane.b32.xlu0 %v676_v37, %s6602_s16 }
 0x120   : > { %863 = vrot.lane.b32.xlu1 %v676_v37, %s6599_s13  ;;  %1151 = vrot.lane.b32.xlu0 %v676_v37, %s6604_s18 }
 0x124   : > { %1055 = vrot.lane.b32.xlu1 %v676_v37, %s6601_s15  ;;  %1343 = vrot.lane.b32.xlu0 %v676_v37, %s6605_s19 }
 0x128   : > { %1247 = vrot.lane.b32.xlu1 %v676_v37, %s6603_s17  ;;  %1829 = vrot.lane.b32.xlu0 %v1642_v38, %s6599_s13 }
 0x12c   : > { %1669 = vrot.lane.b32.xlu1 %v1642_v38, %s6600_s14  ;;  %895 = vrot.lane.b32.xlu0 %v740_v39, %s6599_s13 }
 0x130   : > { %1925 = vrot.lane.b32.xlu1 %v1642_v38, %s6602_s16  ;;  %1087 = vrot.lane.b32.xlu0 %v740_v39, %s6601_s15 }
 0x134   : > { %799 = vrot.lane.b32.xlu1 %v740_v39, %s6600_s14  ;;  %1279 = vrot.lane.b32.xlu0 %v740_v39, %s6603_s17 }
 0x138   : > { %991 = vrot.lane.b32.xlu1 %v740_v39, %s6602_s16  ;;  %1765 = vrot.lane.b32.xlu0 %v1706_v40, %s6600_s14 }
 0x13c   : > { %1183 = vrot.lane.b32.xlu1 %v740_v39, %s6604_s18  ;;  %1957 = vrot.lane.b32.xlu0 %v1706_v40, %s6602_s16 }
 0x140   : > { %1375 = vrot.lane.b32.xlu1 %v740_v39, %s6605_s19  ;;  %2149 = vrot.lane.b32.xlu0 %v1706_v40, %s6604_s18 }
 0x144   : > { %1861 = vrot.lane.b32.xlu1 %v1706_v40, %s6599_s13  ;;  %2341 = vrot.lane.b32.xlu0 %v1706_v40, %s6605_s19 }
 0x148   : > { %2053 = vrot.lane.b32.xlu1 %v1706_v40, %s6601_s15  ;;  %2021 = vrot.lane.b32.xlu0 %v1642_v38, %s6601_s15 }
 0x14c   : > { %2245 = vrot.lane.b32.xlu1 %v1706_v40, %s6603_s17  ;;  %2213 = vrot.lane.b32.xlu0 %v1642_v38, %s6603_s17 }
 0x150   : > { %2117 = vrot.lane.b32.xlu1 %v1642_v38, %s6604_s18  ;;  %383 = vperm.xlu0 %6421, %v375_v42  }
 0x154   : > { %2309 = vrot.lane.b32.xlu1 %v1642_v38, %s6605_s19 }
 0x156   : > { %v862_v43 = vpop.permute.xlu1 %861  ;;  %v702_v44 = vpop.permute.xlu0 %701 }
 0x157   : > { %885 = vst.msk [vmem:[#allocation2 + $0x2] sm:$0x1] %vm528_vm2, %v862_v43  ;;  %725 = vst.msk [vmem:[#allocation2 + $0x1] sm:$0x1] %vm528_vm2, %v702_v44 }
 0x15a   : > { %v1054_v45 = vpop.permute.xlu1 %1053  ;;  %v958_v46 = vpop.permute.xlu0 %957 }
 0x15b   : > { %1077 = vst.msk [vmem:[#allocation2 + $0x4] sm:$0x1] %vm528_vm2, %v1054_v45  ;;  %981 = vst.msk [vmem:[#allocation2 + $0x3] sm:$0x1] %vm528_vm2, %v958_v46 }
 0x15e   : > { %v1246_v47 = vpop.permute.xlu1 %1245  ;;  %v1150_v49 = vpop.permute.xlu0 %1149 }
 0x15f   : > { %1269 = vst.msk [vmem:[#allocation2 + $0x6] sm:$0x1] %vm528_vm2, %v1246_v47  ;;  %1173 = vst.msk [vmem:[#allocation2 + $0x5] sm:$0x1] %vm528_vm2, %v1150_v49 }
 0x162   : > { %v1668_v51 = vpop.permute.xlu1 %1667  ;;  %v1342_v52 = vpop.permute.xlu0 %1341 }
 0x163   : > { %1691 = vst.msk [vmem:[#allocation2 + $0x9] sm:$0x1] %vm528_vm2, %v1668_v51  ;;  %1365 = vst.msk [vmem:[#allocation2 + $0x7] sm:$0x1] %vm528_vm2, %v1342_v52 }
 0x166   : > { %v1924_v53 = vpop.permute.xlu1 %1923  ;;  %v1828_v54 = vpop.permute.xlu0 %1827 }
 0x167   : > { %1947 = vst.msk [vmem:[#allocation2 + $0xb] sm:$0x1] %vm528_vm2, %v1924_v53  ;;  %1851 = vst.msk [vmem:[#allocation2 + $0xa] sm:$0x1] %vm528_vm2, %v1828_v54 }
 0x16a   : > { %v798_v58 = vpop.permute.xlu1 %797  ;;  %v894_v61 = vpop.permute.xlu0 %893  ;;  %v6992_v3 = vld [vmem:[#allocation2] sm:$0xff] }
 0x16b   : > { %845 = vst.msk [vmem:[#allocation3 + $0x1] sm:$0x1] %vm528_vm2, %v798_v58  ;;  %941 = vst.msk [vmem:[#allocation3 + $0x2] sm:$0x1] %vm528_vm2, %v894_v61  ;;  %6149 = vmatprep.mubr.msk.f32.mxu0 %vm2410_vm3, %v6992_v3 }
 0x16e   : > { %v990_v4 = vpop.permute.xlu1 %989  ;;  %v1086_v5 = vpop.permute.xlu0 %1085 }
 0x16f   : > { %1037 = vst.msk [vmem:[#allocation3 + $0x3] sm:$0x1] %vm528_vm2, %v990_v4  ;;  %1133 = vst.msk [vmem:[#allocation3 + $0x4] sm:$0x1] %vm528_vm2, %v1086_v5 }
 0x172   : > { %v1182_v6 = vpop.permute.xlu1 %1181  ;;  %v1278_v7 = vpop.permute.xlu0 %1277 }
 0x173   : > { %1229 = vst.msk [vmem:[#allocation3 + $0x5] sm:$0x1] %vm528_vm2, %v1182_v6  ;;  %1325 = vst.msk [vmem:[#allocation3 + $0x6] sm:$0x1] %vm528_vm2, %v1278_v7 }
 0x176   : > { %v1374_v8 = vpop.permute.xlu1 %1373  ;;  %v1956_v9 = vpop.permute.xlu0 %1955 }
 0x177   : > { %1421 = vst.msk [vmem:[#allocation3 + $0x7] sm:$0x1] %vm528_vm2, %v1374_v8  ;;  %2003 = vst.msk [vmem:[#allocation3 + $0xb] sm:$0x1] %vm528_vm2, %v1956_v9 }
 0x17a   : > { %v1764_v10 = vpop.permute.xlu1 %1763  ;;  %v2148_v11 = vpop.permute.xlu0 %2147 }
 0x17b   : > { %1811 = vst.msk [vmem:[#allocation3 + $0x9] sm:$0x1] %vm528_vm2, %v1764_v10  ;;  %2195 = vst.msk [vmem:[#allocation3 + $0xd] sm:$0x1] %vm528_vm2, %v2148_v11 }
 0x17e   : > { %v1860_v12 = vpop.permute.xlu1 %1859  ;;  %v2340_v13 = vpop.permute.xlu0 %2339  ;;  %v2405_v36 = vld [vmem:[#allocation3] sm:$0xff] }
 0x17f   : > { %1907 = vst.msk [vmem:[#allocation3 + $0xa] sm:$0x1] %vm528_vm2, %v1860_v12  ;;  %2387 = vst.msk [vmem:[#allocation3 + $0xf] sm:$0x1] %vm528_vm2, %v2340_v13 }
 0x182   : > { %v2052_v14 = vpop.permute.xlu1 %2051  ;;  %v2020_v15 = vpop.permute.xlu0 %2019 }
 0x183   : > { %2099 = vst.msk [vmem:[#allocation3 + $0xc] sm:$0x1] %vm528_vm2, %v2052_v14  ;;  %2043 = vst.msk [vmem:[#allocation2 + $0xc] sm:$0x1] %vm528_vm2, %v2020_v15 }
 0x186   : > { %v2244_v17 = vpop.permute.xlu1 %2243  ;;  %v2212_v19 = vpop.permute.xlu0 %2211 }
 0x187   : > { %2291 = vst.msk [vmem:[#allocation3 + $0xe] sm:$0x1] %vm528_vm2, %v2244_v17  ;;  %2235 = vst.msk [vmem:[#allocation2 + $0xe] sm:$0x1] %vm528_vm2, %v2212_v19  ;;  %v465_v17 = vpop.f32.mrf.mxu1 }
 0x18a   : > { %v2116_v20 = vpop.permute.xlu1 %2115  ;;  %v704_v21 = vpop.permute.xlu0 %703 }
 0x18b   : > { %2139 = vst.msk [vmem:[#allocation2 + $0xd] sm:$0x1] %vm528_vm2, %v2116_v20  ;;  %726 = vst.msk [vmem:[#allocation2 + $0x11] sm:$0x1] %vm528_vm2, %v704_v21  ;;  %v467_v20 = vpop.f32.mrf.mxu1 }
 0x18e   : > { %v2308_v25 = vpop.permute.xlu1 %2307  ;;  %v2406_v28 = vld [vmem:[#allocation3 + $0x8] sm:$0xff]  ;;  %v960_v29 = vpop.permute.xlu0 %959 }
 0x18f   : > { %2331 = vst.msk [vmem:[#allocation2 + $0xf] sm:$0x1] %vm528_vm2, %v2308_v25  ;;  %6145 = vmatprep.subr.msk.mxu0 %vm2410_vm3, %v2406_v28  ;;  %982 = vst.msk [vmem:[#allocation2 + $0x13] sm:$0x1] %vm528_vm2, %v960_v29 }
 0x190   : > { %6146 = vmatpush3.xpose.msk.msra.mxu0 %vm2410_vm3, %v2406_v28 }
 0x191   : > { %6147 = vmatprep.subr.msk.mxu0 %vm2410_vm3, %v2405_v36 }
 0x192   : > { %v864_v37 = vpop.permute.xlu1 %863  ;;  %v1152_v38 = vpop.permute.xlu0 %1151 }
 0x193   : > { %886 = vst.msk [vmem:[#allocation2 + $0x12] sm:$0x1] %vm528_vm2, %v864_v37  ;;  %1174 = vst.msk [vmem:[#allocation2 + $0x15] sm:$0x1] %vm528_vm2, %v1152_v38 }
 0x194   : > { %6148 = vmatpush3.xpose.msk.msra.mxu0 %vm2410_vm3, %v2405_v36 }
 0x195   : > { %6152 = vmatprep.subr.mxu0 %v2406_v28 }
 0x196   : > { %v1056_v39 = vpop.permute.xlu1 %1055  ;;  %v7021_v40 = vld [vmem:[#allocation2 + $0x8] sm:$0xff]  ;;  %v1344_v42 = vpop.permute.xlu0 %1343 }
 0x197   : > { %1078 = vst.msk [vmem:[#allocation2 + $0x14] sm:$0x1] %vm528_vm2, %v1056_v39  ;;  %6150 = vmatmul.mubr.msk.f32.vlgmr.msra.gmra.mxu0 %vm2410_vm3, %v7021_v40  ;;  %1366 = vst.msk [vmem:[#allocation2 + $0x17] sm:$0x1] %vm528_vm2, %v1344_v42 }
 0x198   : > { %6153 = vmatpush3.msra.mxu0 %v2406_v28 }
 0x199   : > { %6154 = vmatprep.subr.mxu0 %v2405_v36 }
 0x19a   : > { %6155 = vmatpush3.msra.mxu0 %v2405_v36  ;;  %v1248_v43 = vpop.permute.xlu1 %1247  ;;  %v1830_v44 = vpop.permute.xlu0 %1829 }
 0x19b   : > { %1270 = vst.msk [vmem:[#allocation2 + $0x16] sm:$0x1] %vm528_vm2, %v1248_v43  ;;  %1852 = vst.msk [vmem:[#allocation2 + $0x1a] sm:$0x1] %vm528_vm2, %v1830_v44 }
 0x19e   : > { %v1670_v45 = vpop.permute.xlu1 %1669  ;;  %v896_v46 = vpop.permute.xlu0 %895 }
 0x19f   : > { %1692 = vst.msk [vmem:[#allocation2 + $0x19] sm:$0x1] %vm528_vm2, %v1670_v45  ;;  %942 = vst.msk [vmem:[#allocation3 + $0x12] sm:$0x1] %vm528_vm2, %v896_v46 }
 0x1a2   : > { %v1926_v47 = vpop.permute.xlu1 %1925  ;;  %v7031_v49 = vld [vmem:[#allocation2 + $0x10] sm:$0xff]  ;;  %v1088_v51 = vpop.permute.xlu0 %1087 }
 0x1a3   : > { %1948 = vst.msk [vmem:[#allocation2 + $0x1b] sm:$0x1] %vm528_vm2, %v1926_v47  ;;  %6177 = vmatprep.mubr.msk.f32.mxu1 %vm2410_vm3, %v7031_v49  ;;  %1134 = vst.msk [vmem:[#allocation3 + $0x14] sm:$0x1] %vm528_vm2, %v1088_v51 }
 0x1a6   : > { %v800_v52 = vpop.permute.xlu1 %799  ;;  %v1280_v53 = vpop.permute.xlu0 %1279 }
 0x1a7   : > { %846 = vst.msk [vmem:[#allocation3 + $0x11] sm:$0x1] %vm528_vm2, %v800_v52  ;;  %1326 = vst.msk [vmem:[#allocation3 + $0x16] sm:$0x1] %vm528_vm2, %v1280_v53 }
 0x1aa   : > { %v992_v54 = vpop.permute.xlu1 %991  ;;  %v1766_v58 = vpop.permute.xlu0 %1765 }
 0x1ab   : > { %1038 = vst.msk [vmem:[#allocation3 + $0x13] sm:$0x1] %vm528_vm2, %v992_v54  ;;  %1812 = vst.msk [vmem:[#allocation3 + $0x19] sm:$0x1] %vm528_vm2, %v1766_v58 }
 0x1ae   : > { %v1184_v61 = vpop.permute.xlu1 %1183  ;;  %v1958_v4 = vpop.permute.xlu0 %1957 }
 0x1af   : > { %1230 = vst.msk [vmem:[#allocation3 + $0x15] sm:$0x1] %vm528_vm2, %v1184_v61  ;;  %2004 = vst.msk [vmem:[#allocation3 + $0x1b] sm:$0x1] %vm528_vm2, %v1958_v4 }
 0x1b2   : > { %v1376_v5 = vpop.permute.xlu1 %1375  ;;  %v2150_v6 = vpop.permute.xlu0 %2149 }
 0x1b3   : > { %1422 = vst.msk [vmem:[#allocation3 + $0x17] sm:$0x1] %vm528_vm2, %v1376_v5  ;;  %2196 = vst.msk [vmem:[#allocation3 + $0x1d] sm:$0x1] %vm528_vm2, %v2150_v6 }
 0x1b6   : > { %v1862_v7 = vpop.permute.xlu1 %1861  ;;  %v2342_v8 = vpop.permute.xlu0 %2341 }
 0x1b7   : > { %1908 = vst.msk [vmem:[#allocation3 + $0x1a] sm:$0x1] %vm528_vm2, %v1862_v7  ;;  %2388 = vst.msk [vmem:[#allocation3 + $0x1f] sm:$0x1] %vm528_vm2, %v2342_v8 }
 0x1ba   : > { %v2054_v9 = vpop.permute.xlu1 %2053  ;;  %v2022_v10 = vpop.permute.xlu0 %2021  ;;  %v7059_v19 = vld [vmem:[#allocation3 + $0x10] sm:$0xff] }
 0x1bb   : > { %2100 = vst.msk [vmem:[#allocation3 + $0x1c] sm:$0x1] %vm528_vm2, %v2054_v9  ;;  %2044 = vst.msk [vmem:[#allocation2 + $0x1c] sm:$0x1] %vm528_vm2, %v2022_v10 }
 0x1be   : > { %v2246_v11 = vpop.permute.xlu1 %2245  ;;  %v2214_v12 = vpop.permute.xlu0 %2213 }
 0x1bf   : > { %2292 = vst.msk [vmem:[#allocation3 + $0x1e] sm:$0x1] %vm528_vm2, %v2246_v11  ;;  %2236 = vst.msk [vmem:[#allocation2 + $0x1e] sm:$0x1] %vm528_vm2, %v2214_v12 }
 0x1c2   : > { %v2118_v13 = vpop.permute.xlu1 %2117 }
 0x1c3   : > { %2140 = vst.msk [vmem:[#allocation2 + $0x1d] sm:$0x1] %vm528_vm2, %v2118_v13 }
 0x1c6   : > { %v2310_v14 = vpop.permute.xlu1 %2309  ;;  %v7052_v15 = vld [vmem:[#allocation3 + $0x18] sm:$0xff] }
 0x1c7   : > { %2332 = vst.msk [vmem:[#allocation2 + $0x1f] sm:$0x1] %vm528_vm2, %v2310_v14  ;;  %6173 = vmatprep.subr.msk.mxu1 %vm2410_vm3, %v7052_v15 }
 0x1c8   : > { %6174 = vmatpush3.xpose.msk.msra.mxu1 %vm2410_vm3, %v7052_v15 }
 0x1c9   : > { %6175 = vmatprep.subr.msk.mxu1 %vm2410_vm3, %v7059_v19 }
 0x1cb   : > { %v384_v21 = vpop.permute.xlu0 %383 }
 0x1cc   : > { %6176 = vmatpush3.xpose.msk.msra.mxu1 %vm2410_vm3, %v7059_v19  ;;  %v466_v25 = vadd.f32 %v465_v17, %v384_v21  ;;  %v468_v28 = vadd.f32 %v467_v20, %v384_v21 }
 0x1ce   : > { %v7065_v29 = vld [vmem:[#allocation2 + $0x18] sm:$0xff]  ;;  %v588_v36 = vcombine.high %v466_v25, %v466_v25  ;;  %v595_v37 = vrot.slane %v466_v25, %v6737_v33  ;;  %v1554_v38 = vcombine.high %v468_v28, %v468_v28  ;;  %v1561_v39 = vrot.slane %v468_v28, %v6737_v33 }
 0x1cf   : > { %6178 = vmatmul.mubr.msk.f32.vlgmr.msra.gmra.mxu1 %vm2410_vm3, %v7065_v29 }
 0x1d0   : > { %v602_v42 = vrot.slane %v588_v36, %v6737_v33  ;;  %v603_v43 = vcombine.high %v595_v37, %v595_v37  ;;  %v611_v44 = vrot.slane %v595_v37, %v6737_v33  ;;  %v1568_v45 = vrot.slane %v1554_v38, %v6737_v33 }
 0x1d1   : > { %v1569_v46 = vcombine.high %v1561_v39, %v1561_v39  ;;  %v1577_v47 = vrot.slane %v1561_v39, %v6737_v33 }
 0x1d2   : > { %v604_v51 = vcombine.high %v602_v42, %v602_v42  ;;  %v7076_v52 = vrot.slane %v602_v42, %v6737_v33  ;;  %v7079_v53 = vrot.slane %v603_v43, %v6737_v33  ;;  %v7081_v54 = vcombine.high %v611_v44, %v611_v44  ;;  %661 = vst.msk [vmem:[#allocation3 + $0x80] sm:$0x1] %vm528_vm2, %v611_v44 }
 0x1d3   : > { %v1570_v58 = vcombine.high %v1568_v45, %v1568_v45  ;;  %v7085_v61 = vrot.slane %v1568_v45, %v6737_v33  ;;  %v7088_v4 = vrot.slane %v1569_v46, %v6737_v33  ;;  %1627 = vst.msk [vmem:[#allocation3 + $0x88] sm:$0x1] %vm528_vm2, %v1577_v47  ;;  %v7111_v9 = vcombine.high %v1577_v47, %v1577_v47 }
 0x1d4   : > { %v7092_v5 = vrot.slane %v604_v51, %v6737_v33  ;;  %v7096_v6 = vcombine.high %v7076_v52, %v7076_v52  ;;  %v7100_v7 = vcombine.high %v7079_v53, %v7079_v53  ;;  %662 = vst.msk [vmem:[#allocation3 + $0x90] sm:$0x1] %vm528_vm2, %v7079_v53  ;;  %663 = vst.msk [vmem:[#allocation3 + $0xa0] sm:$0x1] %vm528_vm2, %v7081_v54 }
 0x1d5   : > { %665 = vst.msk [vmem:[#allocation3 + $0xc0] sm:$0x1] %vm528_vm2, %v7076_v52  ;;  %v7109_v8 = vrot.slane %v1570_v58, %v6737_v33  ;;  %1628 = vst.msk [vmem:[#allocation3 + $0x98] sm:$0x1] %vm528_vm2, %v7088_v4  ;;  %v7129_v33 = vcombine.high %v7085_v61, %v7085_v61  ;;  %v7133_v11 = vcombine.high %v7088_v4, %v7088_v4 }
 0x1d6   : > { %1631 = vst.msk [vmem:[#allocation3 + $0xc8] sm:$0x1] %vm528_vm2, %v7085_v61  ;;  %v7119_v10 = vcombine.high %v7092_v5, %v7092_v5  ;;  %664 = vst.msk [vmem:[#allocation3 + $0xb0] sm:$0x1] %vm528_vm2, %v7100_v7  ;;  %v1734_v13 = vrot.slane %v1577_v47, %v6740_v41  ;;  %v768_v37 = vrot.slane %v611_v44, %v6740_v41 }
 0x1d7   : > { %666 = vst.msk [vmem:[#allocation3 + $0xd0] sm:$0x1] %vm528_vm2, %v7092_v5  ;;  %667 = vst.msk [vmem:[#allocation3 + $0xe0] sm:$0x1] %vm528_vm2, %v7096_v6  ;;  %v7137_v12 = vcombine.high %v7109_v8, %v7109_v8 }
 0x1d8   : > { %1629 = vst.msk [vmem:[#allocation3 + $0xa8] sm:$0x1] %vm528_vm2, %v7111_v9  ;;  %1632 = vst.msk [vmem:[#allocation3 + $0xd8] sm:$0x1] %vm528_vm2, %v7109_v8  ;;  %1779 = vrot.lane.b32.xlu0 %v1734_v13, %s6600_s14 }
 0x1d9   : > { %668 = vst.msk [vmem:[#allocation3 + $0xf0] sm:$0x1] %vm528_vm2, %v7119_v10  ;;  %1630 = vst.msk [vmem:[#allocation3 + $0xb8] sm:$0x1] %vm528_vm2, %v7133_v11 }
 0x1da   : > { %1633 = vst.msk [vmem:[#allocation3 + $0xe8] sm:$0x1] %vm528_vm2, %v7129_v33  ;;  %1634 = vst.msk [vmem:[#allocation3 + $0xf8] sm:$0x1] %vm528_vm2, %v7137_v12 }
 0x24a   : > { %v1780_v14 = vpop.permute.xlu0 %1779 }
 0x24b   : > { %1819 = vst.msk [vmem:[#allocation3 + $0x89] sm:$0x1] %vm528_vm2, %v1780_v14 }
 0x257   : > { %v6151_v17 = vpop.f32.mrf.mxu0 }
 0x258   : > { %v2499_v20 = vmul.f32 0.35355338, %v6151_v17  ;;  %v7182_v17 = vrot.slane %v7088_v4, %v6740_v41 }
 0x259   : > { %v2489_v21 = vpop.f32.mrf.mxu0 }
 0x25a   : > { %v2498_v25 = vmul.f32 0.35355338, %v2489_v21  ;;  %v2503_v28 = vsel %vm2410_vm3, %v2499_v20, -inf }
 0x25b   : > { %2504 = vmax.xlane.f32.xlu1 %v2503_v28 }
 0x25c   : > { %v2500_v36 = vsel %vm2410_vm3, %v2498_v25, -inf }
 0x25d   : > { %2501 = vmax.xlane.f32.xlu0 %v2500_v36  ;;  %v772_v36 = vrot.slane %v7079_v53, %v6740_v41 }
 0x273   : > { %1971 = vrot.lane.b32.xlu0 %v1734_v13, %s6602_s16 }
 0x277   : > { %2067 = vrot.lane.b32.xlu0 %v1734_v13, %s6601_s15 }
 0x27b   : > { %2163 = vrot.lane.b32.xlu0 %v1734_v13, %s6604_s18 }
 0x27f   : > { %2355 = vrot.lane.b32.xlu0 %v1734_v13, %s6605_s19 }
 0x283   : > { %909 = vrot.lane.b32.xlu0 %v768_v37, %s6599_s13 }
 0x287   : > { %1101 = vrot.lane.b32.xlu0 %v768_v37, %s6601_s15 }
 0x28e   : > { %2522 = vxpose.xlu1.b32.start [1/2] (short) (narrow) %v6992_v3, 16 }
 0x28f   : > { %v6179_v38 = vpop.f32.mrf.mxu1 }
 0x290   : > { %v7171_v39 = vmul.f32 0.35355338, %v6179_v38 }
 0x292   : > { %2523 = vxpose.xlu1.b32.end [2/2] (short) (narrow) %v7021_v40, 16  ;;  %v2929_v45 = vsel %vm2410_vm3, %v7171_v39, -inf }
 0x2b0   : > { %1875 = vrot.lane.b32.xlu1 %v1734_v13, %s6599_s13 }
 0x2b4   : > { %2259 = vrot.lane.b32.xlu1 %v1734_v13, %s6603_s17 }
 0x2b8   : > { %813 = vrot.lane.b32.xlu1 %v768_v37, %s6600_s14 }
 0x2bc   : > { %1005 = vrot.lane.b32.xlu1 %v768_v37, %s6602_s16 }
 0x2c0   : > { %1197 = vrot.lane.b32.xlu1 %v768_v37, %s6604_s18 }
 0x2c4   : > { %1389 = vrot.lane.b32.xlu1 %v768_v37, %s6605_s19 }
 0x2e4   : > { %v2505_v42 = vpop.xlane.xlu1 %2504 }
 0x2e5   : > { %v2507_v43 = vsub.f32 %v2499_v20, %v2505_v42 }
 0x2e6   : > { %v2502_v3 = vpop.xlane.xlu0 %2501 }
 0x2e7   : > { %v2510_v44 = vmul.f32 1.442695, %v2507_v43  ;;  %v2506_v40 = vsub.f32 %v2498_v25, %v2502_v3  ;;  %v1710_v43 = vrot.slane %v6893_v31, %v6740_v41  ;;  %v744_v3 = vrot.slane %v6848_v18, %v6740_v41 }
 0x2e8   : > { %2930 = vmax.xlane.f32.xlu1 %v2929_v45 }
 0x2e9   : > { %6422 = vpow2.f32 %v2510_v44  ;;  %v2508_v46 = vmul.f32 1.442695, %v2506_v40  ;;  %v2915_v44 = vpop.f32.mrf.mxu1 }
 0x2ea   : > { %v1972_v47 = vpop.permute.xlu0 %1971  ;;  %v7222_v40 = vmul.f32 0.35355338, %v2915_v44 }
 0x2eb   : > { %6424 = vpow2.f32 %v2508_v46  ;;  %2011 = vst.msk [vmem:[#allocation3 + $0x8b] sm:$0x1] %vm528_vm2, %v1972_v47 }
 0x2ec   : > { %v2926_v18 = vsel %vm2410_vm3, %v7222_v40, -inf }
 0x2ee   : > { %v2068_v51 = vpop.permute.xlu0 %2067 }
 0x2ef   : > { %2107 = vst.msk [vmem:[#allocation3 + $0x8c] sm:$0x1] %vm528_vm2, %v2068_v51  ;;  %v680_v51 = vrot.slane %v6751_v50, %v6740_v41  ;;  %v7254_v50 = vrot.slane %v7111_v9, %v6740_v41 }
 0x2f2   : > { %v2164_v58 = vpop.permute.xlu0 %2163 }
 0x2f3   : > { %2203 = vst.msk [vmem:[#allocation3 + $0x8d] sm:$0x1] %vm528_vm2, %v2164_v58 }
 0x2f6   : > { %v7178_v13 = vpop.eup %6422  ;;  %v2356_v14 = vpop.permute.xlu0 %2355 }
 0x2f7   : > { %2395 = vst.msk [vmem:[#allocation3 + $0x8f] sm:$0x1] %vm528_vm2, %v2356_v14  ;;  %v2515_v20 = vsel %vm2410_vm3, %v7178_v13, 0.0  ;;  %v7238_v14 = vrot.slane %v6796_v63, %v6740_v41  ;;  %v7277_v63 = vrot.slane %v7081_v54, %v6740_v41 }
 0x2f8   : > { %v7187_v21 = vpop.eup %6424  ;;  %2516 = vadd.xlane.f32.xlu0 %v2515_v20 }
 0x2f9   : > { %1877 = vrot.lane.b32.xlu1 %v7182_v17, %s6599_s13  ;;  %v2512_v28 = vsel %vm2410_vm3, %v7187_v21, 0.0 }
 0x2fa   : > { %v910_v25 = vpop.permute.xlu0 %909 }
 0x2fb   : > { %949 = vst.msk [vmem:[#allocation3 + $0x82] sm:$0x1] %vm528_vm2, %v910_v25  ;;  %v7302_v25 = vrot.slane %v6904_v34, %v6740_v41 }
 0x2fc   : > { %2513 = vadd.xlane.f32.xlu0 %v2512_v28 }
 0x2fd   : > { %1973 = vrot.lane.b32.xlu1 %v7182_v17, %s6602_s16 }
 0x2fe   : > { %v1102_v4 = vpop.permute.xlu0 %1101 }
 0x2ff   : > { %1141 = vst.msk [vmem:[#allocation3 + $0x84] sm:$0x1] %vm528_vm2, %v1102_v4 }
 0x301   : > { %2069 = vrot.lane.b32.xlu1 %v7182_v17, %s6601_s15 }
 0x305   : > { %2261 = vrot.lane.b32.xlu1 %v7182_v17, %s6603_s17 }
 0x309   : > { %815 = vrot.lane.b32.xlu1 %v772_v36, %s6600_s14 }
 0x30a   : > { %v2538_v38 = vpop.trf.xlu1 }
 0x30b   : > { %6156 = vmatprep.mubr.msk.f32.mxu0 %vm2410_vm3, %v2538_v38 }
 0x30d   : > { %1007 = vrot.lane.b32.xlu1 %v772_v36, %s6602_s16 }
 0x30e   : > { %v2539_v42 = vpop.trf.xlu1 }
 0x30f   : > { %6157 = vmatmul.mubr.msk.f32.vlgmr.msra.gmra.mxu0 %vm2410_vm3, %v2539_v42 }
 0x311   : > { %1199 = vrot.lane.b32.xlu1 %v772_v36, %s6604_s18 }
 0x312   : > { %1293 = vrot.lane.b32.xlu0 %v768_v37, %s6603_s17 }
 0x315   : > { %1391 = vrot.lane.b32.xlu1 %v772_v36, %s6605_s19 }
 0x319   : > { %1863 = vrot.lane.b32.xlu1 %v1710_v43, %s6599_s13 }
 0x31d   : > { %2055 = vrot.lane.b32.xlu1 %v1710_v43, %s6601_s15 }
 0x321   : > { %2247 = vrot.lane.b32.xlu1 %v1710_v43, %s6603_s17 }
 0x322   : > { %v1876_v53 = vpop.permute.xlu1 %1875 }
 0x323   : > { %1915 = vst.msk [vmem:[#allocation3 + $0x8a] sm:$0x1] %vm528_vm2, %v1876_v53 }
 0x325   : > { %801 = vrot.lane.b32.xlu1 %v744_v3, %s6600_s14 }
 0x326   : > { %v2260_v37 = vpop.permute.xlu1 %2259 }
 0x327   : > { %2299 = vst.msk [vmem:[#allocation3 + $0x8e] sm:$0x1] %vm528_vm2, %v2260_v37 }
 0x329   : > { %993 = vrot.lane.b32.xlu1 %v744_v3, %s6602_s16 }
 0x32a   : > { %v814_v31 = vpop.permute.xlu1 %813 }
 0x32b   : > { %853 = vst.msk [vmem:[#allocation3 + $0x81] sm:$0x1] %vm528_vm2, %v814_v31 }
 0x32d   : > { %1185 = vrot.lane.b32.xlu1 %v744_v3, %s6604_s18 }
 0x32e   : > { %v1006_v45 = vpop.permute.xlu1 %1005  ;;  %v2409_v46 = vld [vmem:[#allocation3 + $0x88] sm:$0xff] }
 0x32f   : > { %1045 = vst.msk [vmem:[#allocation3 + $0x83] sm:$0x1] %vm528_vm2, %v1006_v45  ;;  %6159 = vmatprep.subr.mxu0 %v2409_v46 }
 0x330   : > { %6160 = vmatpush3.msra.mxu0 %v2409_v46 }
 0x331   : > { %1377 = vrot.lane.b32.xlu1 %v744_v3, %s6605_s19  ;;  %2927 = vmax.xlane.f32.xlu0 %v2926_v18 }
 0x332   : > { %v1198_v47 = vpop.permute.xlu1 %1197 }
 0x333   : > { %1237 = vst.msk [vmem:[#allocation3 + $0x85] sm:$0x1] %vm528_vm2, %v1198_v47 }
 0x335   : > { %865 = vrot.lane.b32.xlu1 %v680_v51, %s6599_s13 }
 0x336   : > { %v1390_v58 = vpop.permute.xlu1 %1389 }
 0x337   : > { %1429 = vst.msk [vmem:[#allocation3 + $0x87] sm:$0x1] %vm528_vm2, %v1390_v58 }
 0x339   : > { %1057 = vrot.lane.b32.xlu1 %v680_v51, %s6601_s15 }
 0x33d   : > { %1249 = vrot.lane.b32.xlu1 %v680_v51, %s6603_s17 }
 0x341   : > { %1671 = vrot.lane.b32.xlu1 %v7238_v14, %s6600_s14 }
 0x345   : > { %1927 = vrot.lane.b32.xlu1 %v7238_v14, %s6602_s16 }
 0x347   : > { %1781 = vrot.lane.b32.xlu0 %v7182_v17, %s6600_s14 }
 0x349   : > { %2119 = vrot.lane.b32.xlu1 %v7238_v14, %s6604_s18 }
 0x34b   : > { %2165 = vrot.lane.b32.xlu0 %v7182_v17, %s6604_s18 }
 0x34d   : > { %2311 = vrot.lane.b32.xlu1 %v7238_v14, %s6605_s19 }
 0x34f   : > { %2357 = vrot.lane.b32.xlu0 %v7182_v17, %s6605_s19 }
 0x351   : > { %1783 = vrot.lane.b32.xlu1 %v7254_v50, %s6600_s14 }
 0x353   : > { %911 = vrot.lane.b32.xlu0 %v772_v36, %s6599_s13 }
 0x355   : > { %1879 = vrot.lane.b32.xlu1 %v7254_v50, %s6599_s13 }
 0x357   : > { %1103 = vrot.lane.b32.xlu0 %v772_v36, %s6601_s15 }
 0x359   : > { %1975 = vrot.lane.b32.xlu1 %v7254_v50, %s6602_s16 }
 0x35b   : > { %1295 = vrot.lane.b32.xlu0 %v772_v36, %s6603_s17 }
 0x35d   : > { %2071 = vrot.lane.b32.xlu1 %v7254_v50, %s6601_s15 }
 0x35f   : > { %1767 = vrot.lane.b32.xlu0 %v1710_v43, %s6600_s14 }
 0x361   : > { %2167 = vrot.lane.b32.xlu1 %v7254_v50, %s6604_s18 }
 0x363   : > { %1959 = vrot.lane.b32.xlu0 %v1710_v43, %s6602_s16 }
 0x365   : > { %2359 = vrot.lane.b32.xlu1 %v7254_v50, %s6605_s19 }
 0x367   : > { %2151 = vrot.lane.b32.xlu0 %v1710_v43, %s6604_s18 }
 0x369   : > { %817 = vrot.lane.b32.xlu1 %v7277_v63, %s6600_s14 }
 0x36b   : > { %2343 = vrot.lane.b32.xlu0 %v1710_v43, %s6605_s19  ;;  %v7319_v43 = vrot.slane %v6862_v24, %v6740_v41 }
 0x36d   : > { %913 = vrot.lane.b32.xlu1 %v7277_v63, %s6599_s13 }
 0x36f   : > { %897 = vrot.lane.b32.xlu0 %v744_v3, %s6599_s13 }
 0x371   : > { %1009 = vrot.lane.b32.xlu1 %v7277_v63, %s6602_s16  ;;  %v2931_v9 = vpop.xlane.xlu1 %2930 }
 0x372   : > { %v2933_v18 = vsub.f32 %v7171_v39, %v2931_v9 }
 0x373   : > { %1089 = vrot.lane.b32.xlu0 %v744_v3, %s6601_s15 }
 0x375   : > { %1105 = vrot.lane.b32.xlu1 %v7277_v63, %s6601_s15  ;;  %v1878_v54 = vpop.permute.xlu1 %1877 }
 0x376   : > { %1916 = vst.msk [vmem:[#allocation3 + $0x9a] sm:$0x1] %vm528_vm2, %v1878_v54 }
 0x377   : > { %1281 = vrot.lane.b32.xlu0 %v744_v3, %s6603_s17 }
 0x379   : > { %1201 = vrot.lane.b32.xlu1 %v7277_v63, %s6604_s18  ;;  %v1974_v17 = vpop.permute.xlu1 %1973 }
 0x37a   : > { %2012 = vst.msk [vmem:[#allocation3 + $0x9b] sm:$0x1] %vm528_vm2, %v1974_v17 }
 0x37b   : > { %705 = vrot.lane.b32.xlu0 %v680_v51, %s6600_s14 }
 0x37d   : > { %1393 = vrot.lane.b32.xlu1 %v7277_v63, %s6605_s19  ;;  %v2070_v20 = vpop.permute.xlu1 %2069 }
 0x37e   : > { %2108 = vst.msk [vmem:[#allocation3 + $0x9c] sm:$0x1] %vm528_vm2, %v2070_v20 }
 0x37f   : > { %961 = vrot.lane.b32.xlu0 %v680_v51, %s6602_s16 }
 0x381   : > { %v2517_v28 = vpop.xlane.xlu0 %2516  ;;  %1865 = vrot.lane.b32.xlu1 %v7302_v25, %s6599_s13  ;;  %v2262_v4 = vpop.permute.xlu1 %2261 }
 0x382   : > { %2300 = vst.msk [vmem:[#allocation3 + $0x9e] sm:$0x1] %vm528_vm2, %v2262_v4  ;;  %6426 = vrcp.f32 %v2517_v28 }
 0x383   : > { %1153 = vrot.lane.b32.xlu0 %v680_v51, %s6604_s18 }
 0x385   : > { %v2514_v36 = vpop.xlane.xlu0 %2513  ;;  %2057 = vrot.lane.b32.xlu1 %v7302_v25, %s6601_s15  ;;  %v816_v38 = vpop.permute.xlu1 %815 }
 0x386   : > { %6428 = vrcp.f32 %v2514_v36  ;;  %854 = vst.msk [vmem:[#allocation3 + $0x91] sm:$0x1] %vm528_vm2, %v816_v38 }
 0x387   : > { %1345 = vrot.lane.b32.xlu0 %v680_v51, %s6605_s19  ;;  %v2936_v51 = vmul.f32 1.442695, %v2933_v18 }
 0x389   : > { %v1294_v34 = vpop.permute.xlu0 %1293  ;;  %2249 = vrot.lane.b32.xlu1 %v7302_v25, %s6603_s17  ;;  %v1008_v42 = vpop.permute.xlu1 %1007  ;;  %6430 = vpow2.f32 %v2936_v51 }
 0x38a   : > { %1333 = vst.msk [vmem:[#allocation3 + $0x86] sm:$0x1] %vm528_vm2, %v1294_v34  ;;  %1046 = vst.msk [vmem:[#allocation3 + $0x93] sm:$0x1] %vm528_vm2, %v1008_v42 }
 0x38b   : > { %1831 = vrot.lane.b32.xlu0 %v7238_v14, %s6599_s13 }
 0x38d   : > { %803 = vrot.lane.b32.xlu1 %v7319_v43, %s6600_s14  ;;  %v1200_v53 = vpop.permute.xlu1 %1199 }
 0x38e   : > { %1238 = vst.msk [vmem:[#allocation3 + $0x95] sm:$0x1] %vm528_vm2, %v1200_v53 }
 0x38f   : > { %2023 = vrot.lane.b32.xlu0 %v7238_v14, %s6601_s15  ;;  %v6427_v44 = vpop.eup %6426 }
 0x390   : > { %v2521_v46 = vmul.f32 %v6427_v44, %v7178_v13 }
 0x391   : > { %995 = vrot.lane.b32.xlu1 %v7319_v43, %s6602_s16  ;;  %v1392_v3 = vpop.permute.xlu1 %1391  ;;  %v2408_v37 = vld [vmem:[#allocation3 + $0x80] sm:$0xff] }
 0x392   : > { %1430 = vst.msk [vmem:[#allocation3 + $0x97] sm:$0x1] %vm528_vm2, %v1392_v3  ;;  %6161 = vmatprep.subr.mxu0 %v2408_v37 }
 0x393   : > { %v6429_v24 = vpop.eup %6428  ;;  %6162 = vmatpush3.msra.mxu0 %v2408_v37  ;;  %2215 = vrot.lane.b32.xlu0 %v7238_v14, %s6603_s17 }
 0x394   : > { %v2520_v31 = vmul.f32 %v6429_v24, %v7187_v21 }
 0x395   : > { %1187 = vrot.lane.b32.xlu1 %v7319_v43, %s6604_s18  ;;  %v1864_v45 = vpop.permute.xlu1 %1863 }
 0x396   : > { %1909 = vst.msk [vmem:[#allocation3 + $0x2a] sm:$0x1] %vm528_vm2, %v1864_v45  ;;  %6163 = vmatprep.mubr.msk.f32.mxu0 %vm2410_vm3, %v2520_v31  ;;  %v7346_v17 = vpop.eup %6430 }
 0x397   : > { %6164 = vmatmul.mubr.msk.f32.vlgmr.msra.gmra.mxu0 %vm2410_vm3, %v2521_v46  ;;  %v2941_v9 = vsel %vm2410_vm3, %v7346_v17, 0.0 }
 0x399   : > { %v2056_v47 = vpop.permute.xlu1 %2055 }
 0x39a   : > { %2101 = vst.msk [vmem:[#allocation3 + $0x2c] sm:$0x1] %vm528_vm2, %v2056_v47 }
 0x39d   : > { %v2248_v58 = vpop.permute.xlu1 %2247 }
 0x39e   : > { %2293 = vst.msk [vmem:[#allocation3 + $0x2e] sm:$0x1] %vm528_vm2, %v2248_v58 }
 0x3a1   : > { %v802_v21 = vpop.permute.xlu1 %801 }
 0x3a2   : > { %847 = vst.msk [vmem:[#allocation3 + $0x21] sm:$0x1] %vm528_vm2, %v802_v21 }
 0x3a5   : > { %v994_v13 = vpop.permute.xlu1 %993 }
 0x3a6   : > { %1039 = vst.msk [vmem:[#allocation3 + $0x23] sm:$0x1] %vm528_vm2, %v994_v13 }
 0x3a9   : > { %v1186_v14 = vpop.permute.xlu1 %1185 }
 0x3aa   : > { %1231 = vst.msk [vmem:[#allocation3 + $0x25] sm:$0x1] %vm528_vm2, %v1186_v14 }
 0x3ad   : > { %v1378_v54 = vpop.permute.xlu1 %1377 }
 0x3ae   : > { %1423 = vst.msk [vmem:[#allocation3 + $0x27] sm:$0x1] %vm528_vm2, %v1378_v54 }
 0x3b1   : > { %v866_v39 = vpop.permute.xlu1 %865 }
 0x3b2   : > { %887 = vst.msk [vmem:[#allocation2 + $0x22] sm:$0x1] %vm528_vm2, %v866_v39  ;;  %2942 = vadd.xlane.f32.xlu0 %v2941_v9 }
 0x3b5   : > { %v1058_v20 = vpop.permute.xlu1 %1057 }
 0x3b6   : > { %1079 = vst.msk [vmem:[#allocation2 + $0x24] sm:$0x1] %vm528_vm2, %v1058_v20 }
 0x3b9   : > { %v1250_v28 = vpop.permute.xlu1 %1249 }
 0x3ba   : > { %1271 = vst.msk [vmem:[#allocation2 + $0x26] sm:$0x1] %vm528_vm2, %v1250_v28  ;;  %v2928_v4 = vpop.xlane.xlu0 %2927 }
 0x3bb   : > { %v2932_v36 = vsub.f32 %v7222_v40, %v2928_v4 }
 0x3bd   : > { %v2934_v38 = vmul.f32 1.442695, %v2932_v36  ;;  %v1672_v34 = vpop.permute.xlu1 %1671 }
 0x3be   : > { %1693 = vst.msk [vmem:[#allocation2 + $0x29] sm:$0x1] %vm528_vm2, %v1672_v34  ;;  %v1782_v42 = vpop.permute.xlu0 %1781 }
 0x3bf   : > { %6432 = vpow2.f32 %v2934_v38  ;;  %1820 = vst.msk [vmem:[#allocation3 + $0x99] sm:$0x1] %vm528_vm2, %v1782_v42 }
 0x3c1   : > { %v1928_v53 = vpop.permute.xlu1 %1927 }
 0x3c2   : > { %1949 = vst.msk [vmem:[#allocation2 + $0x2b] sm:$0x1] %vm528_vm2, %v1928_v53  ;;  %v2166_v3 = vpop.permute.xlu0 %2165 }
 0x3c3   : > { %2204 = vst.msk [vmem:[#allocation3 + $0x9d] sm:$0x1] %vm528_vm2, %v2166_v3 }
 0x3c5   : > { %v2120_v37 = vpop.permute.xlu1 %2119 }
 0x3c6   : > { %2141 = vst.msk [vmem:[#allocation2 + $0x2d] sm:$0x1] %vm528_vm2, %v2120_v37  ;;  %v2358_v44 = vpop.permute.xlu0 %2357 }
 0x3c7   : > { %2396 = vst.msk [vmem:[#allocation3 + $0x9f] sm:$0x1] %vm528_vm2, %v2358_v44 }
 0x3c9   : > { %v2312_v40 = vpop.permute.xlu1 %2311 }
 0x3ca   : > { %2333 = vst.msk [vmem:[#allocation2 + $0x2f] sm:$0x1] %vm528_vm2, %v2312_v40  ;;  %v912_v24 = vpop.permute.xlu0 %911 }
 0x3cb   : > { %950 = vst.msk [vmem:[#allocation3 + $0x92] sm:$0x1] %vm528_vm2, %v912_v24 }
 0x3cc   : > { %v7363_v31 = vpop.eup %6432 }
 0x3cd   : > { %v1784_v45 = vpop.permute.xlu1 %1783  ;;  %v2938_v46 = vsel %vm2410_vm3, %v7363_v31, 0.0 }
 0x3ce   : > { %1821 = vst.msk [vmem:[#allocation3 + $0xa9] sm:$0x1] %vm528_vm2, %v1784_v45  ;;  %2939 = vadd.xlane.f32.xlu0 %v2938_v46  ;;  %v1104_v18 = vpop.permute.xlu0 %1103 }
 0x3cf   : > { %1142 = vst.msk [vmem:[#allocation3 + $0x94] sm:$0x1] %vm528_vm2, %v1104_v18  ;;  %v6158_v47 = vpop.f32.mrf.mxu0 }
 0x3d0   : > { %v2636_v51 = vmul.f32 0.35355338, %v6158_v47 }
 0x3d1   : > { %v2626_v58 = vpop.f32.mrf.mxu0  ;;  %v1880_v21 = vpop.permute.xlu1 %1879 }
 0x3d2   : > { %v2638_v13 = vsel %vm2410_vm3, %v2636_v51, -inf  ;;  %v2635_v14 = vmul.f32 0.35355338, %v2626_v58  ;;  %1917 = vst.msk [vmem:[#allocation3 + $0xaa] sm:$0x1] %vm528_vm2, %v1880_v21  ;;  %v1296_v54 = vpop.permute.xlu0 %1295 }
 0x3d3   : > { %1334 = vst.msk [vmem:[#allocation3 + $0x96] sm:$0x1] %vm528_vm2, %v1296_v54 }
 0x3d4   : > { %v2637_v39 = vsel %vm2410_vm3, %v2635_v14, -inf }
 0x3d5   : > { %v2639_v9 = vmax.f32 %v2637_v39, %v2638_v13  ;;  %v1976_v20 = vpop.permute.xlu1 %1975 }
 0x3d6   : > { %2013 = vst.msk [vmem:[#allocation3 + $0xab] sm:$0x1] %vm528_vm2, %v1976_v20  ;;  %v1768_v28 = vpop.permute.xlu0 %1767 }
 0x3d7   : > { %v2640_v4 = vrot.slane %v2639_v9, 4  ;;  %1813 = vst.msk [vmem:[#allocation3 + $0x29] sm:$0x1] %vm528_vm2, %v1768_v28 }
 0x3d9   : > { %v2641_v36 = vmax.f32 %v2639_v9, %v2640_v4  ;;  %v2072_v38 = vpop.permute.xlu1 %2071 }
 0x3da   : > { %2109 = vst.msk [vmem:[#allocation3 + $0xac] sm:$0x1] %vm528_vm2, %v2072_v38  ;;  %v1960_v34 = vpop.permute.xlu0 %1959 }
 0x3db   : > { %v2642_v42 = vrot.slane %v2641_v36, 2  ;;  %2005 = vst.msk [vmem:[#allocation3 + $0x2b] sm:$0x1] %vm528_vm2, %v1960_v34 }
 0x3dd   : > { %v2643_v53 = vmax.f32 %v2641_v36, %v2642_v42  ;;  %v2168_v3 = vpop.permute.xlu1 %2167 }
 0x3de   : > { %2205 = vst.msk [vmem:[#allocation3 + $0xad] sm:$0x1] %vm528_vm2, %v2168_v3  ;;  %v2152_v37 = vpop.permute.xlu0 %2151 }
 0x3df   : > { %v2644_v44 = vrot.slane %v2643_v53, 1  ;;  %2197 = vst.msk [vmem:[#allocation3 + $0x2d] sm:$0x1] %vm528_vm2, %v2152_v37 }
 0x3e1   : > { %v2645_v40 = vmax.f32 %v2643_v53, %v2644_v44  ;;  %v2360_v24 = vpop.permute.xlu1 %2359 }
 0x3e2   : > { %2397 = vst.msk [vmem:[#allocation3 + $0xaf] sm:$0x1] %vm528_vm2, %v2360_v24  ;;  %v2344_v45 = vpop.permute.xlu0 %2343 }
 0x3e3   : > { %v2646_v46 = vsub.f32 %v2635_v14, %v2645_v40  ;;  %v2647_v18 = vsub.f32 %v2636_v51, %v2645_v40  ;;  %2389 = vst.msk [vmem:[#allocation3 + $0x2f] sm:$0x1] %vm528_vm2, %v2344_v45 }
 0x3e5   : > { %v2648_v47 = vmul.f32 1.442695, %v2646_v46  ;;  %v2650_v58 = vmul.f32 1.442695, %v2647_v18  ;;  %v818_v21 = vpop.permute.xlu1 %817 }
 0x3e6   : > { %855 = vst.msk [vmem:[#allocation3 + $0xa1] sm:$0x1] %vm528_vm2, %v818_v21  ;;  %v898_v13 = vpop.permute.xlu0 %897 }
 0x3e7   : > { %6434 = vpow2.f32 %v2648_v47  ;;  %943 = vst.msk [vmem:[#allocation3 + $0x22] sm:$0x1] %vm528_vm2, %v898_v13 }
 0x3e8   : > { %6436 = vpow2.f32 %v2650_v58 }
 0x3e9   : > { %v914_v54 = vpop.permute.xlu1 %913 }
 0x3ea   : > { %951 = vst.msk [vmem:[#allocation3 + $0xa2] sm:$0x1] %vm528_vm2, %v914_v54  ;;  %v1090_v39 = vpop.permute.xlu0 %1089 }
 0x3eb   : > { %1135 = vst.msk [vmem:[#allocation3 + $0x24] sm:$0x1] %vm528_vm2, %v1090_v39 }
 0x3ed   : > { %v1010_v14 = vpop.permute.xlu1 %1009 }
 0x3ee   : > { %1047 = vst.msk [vmem:[#allocation3 + $0xa3] sm:$0x1] %vm528_vm2, %v1010_v14  ;;  %v1282_v51 = vpop.permute.xlu0 %1281 }
 0x3ef   : > { %1327 = vst.msk [vmem:[#allocation3 + $0x26] sm:$0x1] %vm528_vm2, %v1282_v51 }
 0x3f1   : > { %v1106_v9 = vpop.permute.xlu1 %1105 }
 0x3f2   : > { %1143 = vst.msk [vmem:[#allocation3 + $0xa4] sm:$0x1] %vm528_vm2, %v1106_v9  ;;  %v706_v20 = vpop.permute.xlu0 %705 }
 0x3f3   : > { %727 = vst.msk [vmem:[#allocation2 + $0x21] sm:$0x1] %vm528_vm2, %v706_v20 }
 0x3f4   : > { %v6435_v28 = vpop.eup %6434 }
 0x3f5   : > { %v6437_v4 = vpop.eup %6436  ;;  %v2652_v36 = vsel %vm2410_vm3, %v6435_v28, 0.0  ;;  %v1202_v38 = vpop.permute.xlu1 %1201 }
 0x3f6   : > { %v2653_v34 = vsel %vm2410_vm3, %v6437_v4, 0.0  ;;  %1239 = vst.msk [vmem:[#allocation3 + $0xa5] sm:$0x1] %vm528_vm2, %v1202_v38  ;;  %v962_v42 = vpop.permute.xlu0 %961 }
 0x3f7   : > { %v2654_v53 = vadd.f32 %v2653_v34, %v2652_v36  ;;  %983 = vst.msk [vmem:[#allocation2 + $0x23] sm:$0x1] %vm528_vm2, %v962_v42 }
 0x3f9   : > { %v2655_v3 = vrot.slane %v2654_v53, 4  ;;  %v1394_v37 = vpop.permute.xlu1 %1393 }
 0x3fa   : > { %1431 = vst.msk [vmem:[#allocation3 + $0xa7] sm:$0x1] %vm528_vm2, %v1394_v37  ;;  %v1154_v44 = vpop.permute.xlu0 %1153 }
 0x3fb   : > { %v2656_v40 = vadd.f32 %v2655_v3, %v2654_v53  ;;  %1175 = vst.msk [vmem:[#allocation2 + $0x25] sm:$0x1] %vm528_vm2, %v1154_v44  ;;  %2948 = vxpose.xlu0.b32.start [1/2] (short) (narrow) %v7031_v49, 16 }
 0x3fd   : > { %v1866_v24 = vpop.permute.xlu1 %1865  ;;  %v2657_v45 = vrot.slane %v2656_v40, 2 }
 0x3fe   : > { %1910 = vst.msk [vmem:[#allocation3 + $0x3a] sm:$0x1] %vm528_vm2, %v1866_v24  ;;  %v1346_v46 = vpop.permute.xlu0 %1345  ;;  %v7418_v24 = vld [vmem:[#allocation3 + $0x28] sm:$0xff] }
 0x3ff   : > { %1367 = vst.msk [vmem:[#allocation2 + $0x27] sm:$0x1] %vm528_vm2, %v1346_v46  ;;  %2949 = vxpose.xlu0.b32.end [2/2] (short) (narrow) %v7065_v29, 16  ;;  %v2658_v18 = vadd.f32 %v2657_v45, %v2656_v40  ;;  %v7427_v45 = vld [vmem:[#allocation3 + $0x20] sm:$0xff] }
 0x401   : > { %v2058_v47 = vpop.permute.xlu1 %2057  ;;  %v2659_v58 = vrot.slane %v2658_v18, 1 }
 0x402   : > { %2102 = vst.msk [vmem:[#allocation3 + $0x3c] sm:$0x1] %vm528_vm2, %v2058_v47  ;;  %v1832_v21 = vpop.permute.xlu0 %1831 }
 0x403   : > { %1853 = vst.msk [vmem:[#allocation2 + $0x2a] sm:$0x1] %vm528_vm2, %v1832_v21  ;;  %v2660_v13 = vadd.f32 %v2659_v58, %v2658_v18 }
 0x405   : > { %v2250_v54 = vpop.permute.xlu1 %2249  ;;  %6438 = vrcp.f32 %v2660_v13 }
 0x406   : > { %2294 = vst.msk [vmem:[#allocation3 + $0x3e] sm:$0x1] %vm528_vm2, %v2250_v54  ;;  %v2024_v49 = vpop.permute.xlu0 %2023 }
 0x407   : > { %2045 = vst.msk [vmem:[#allocation2 + $0x2c] sm:$0x1] %vm528_vm2, %v2024_v49 }
 0x409   : > { %v804_v39 = vpop.permute.xlu1 %803 }
 0x40a   : > { %848 = vst.msk [vmem:[#allocation3 + $0x31] sm:$0x1] %vm528_vm2, %v804_v39  ;;  %v2216_v29 = vpop.permute.xlu0 %2215 }
 0x40b   : > { %2237 = vst.msk [vmem:[#allocation2 + $0x2e] sm:$0x1] %vm528_vm2, %v2216_v29 }
 0x40d   : > { %v996_v14 = vpop.permute.xlu1 %995 }
 0x40e   : > { %1040 = vst.msk [vmem:[#allocation3 + $0x33] sm:$0x1] %vm528_vm2, %v996_v14 }
 0x411   : > { %v1188_v51 = vpop.permute.xlu1 %1187 }
 0x412   : > { %v6439_v9 = vpop.eup %6438  ;;  %1232 = vst.msk [vmem:[#allocation3 + $0x35] sm:$0x1] %vm528_vm2, %v1188_v51 }
 0x413   : > { %v2663_v20 = vmul.f32 %v6439_v9, %v6437_v4  ;;  %v2662_v36 = vmul.f32 %v6439_v9, %v6435_v28  ;;  %v2836_v4 = vld [vmem:[#allocation3 + $0x98] sm:$0xff] }
 0x415   : > { %6166 = vmatprep.subr.mxu0 %v2663_v20 }
 0x416   : > { %6167 = vmatpush3.msra.mxu0 %v2663_v20 }
 0x417   : > { %6168 = vmatprep.subr.mxu0 %v2662_v36 }
 0x418   : > { %6169 = vmatpush3.msra.mxu0 %v2662_v36 }
 0x419   : > { %6180 = vmatprep.subr.mxu0 %v7052_v15 }
 0x43b   : > { %v2943_v28 = vpop.xlane.xlu0 %2942 }
 0x457   : > { %v6165_v38 = vpop.f32.mrf.mxu0  ;;  %v2940_v42 = vpop.xlane.xlu0 %2939 }
 0x458   : > { %6440 = vrcp.f32 %v2940_v42 }
 0x459   : > { %v2736_v34 = vpop.f32.mrf.mxu0  ;;  %6442 = vrcp.f32 %v2943_v28 }
 0x45a   : > { %6170 = vmatprep.mubr.msk.f32.mxu0 %vm2410_vm3, %v2736_v34 }
 0x45b   : > { %6171 = vmatmul.mubr.msk.f32.vlgmr.msra.gmra.mxu0 %vm2410_vm3, %v6165_v38 }
 0x45c   : > { %6181 = vmatpush3.msra.mxu0 %v7052_v15  ;;  %v2835_v15 = vld [vmem:[#allocation3 + $0x90] sm:$0xff] }
 0x45d   : > { %6182 = vmatprep.subr.mxu0 %v7059_v19 }
 0x45e   : > { %6183 = vmatpush3.msra.mxu0 %v7059_v19 }
 0x45f   : > { %6187 = vmatprep.subr.mxu0 %v2836_v4 }
 0x465   : > { %v6441_v3 = vpop.eup %6440 }
 0x466   : > { %v6443_v37 = vpop.eup %6442  ;;  %v2946_v40 = vmul.f32 %v6441_v3, %v7363_v31  ;;  %v7423_v31 = vld [vmem:[#allocation2 + $0x20] sm:$0xff] }
 0x467   : > { %v2947_v19 = vmul.f32 %v6443_v37, %v7346_v17  ;;  %v7435_v17 = vld [vmem:[#allocation2 + $0x28] sm:$0xff] }
 0x477   : > { %v2964_v53 = vpop.trf.xlu0 }
 0x478   : > { %6184 = vmatprep.mubr.msk.f32.mxu0 %vm2410_vm3, %v2964_v53 }
 0x47b   : > { %v2965_v44 = vpop.trf.xlu0 }
 0x47c   : > { %6185 = vmatmul.mubr.msk.f32.vlgmr.msra.gmra.mxu0 %vm2410_vm3, %v2965_v44 }
 0x47d   : > { %6188 = vmatpush3.msra.mxu0 %v2836_v4  ;;  %6191 = vmatprep.mubr.msk.f32.mxu0 %vm2410_vm3, %v2946_v40 }
 0x47e   : > { %6189 = vmatprep.subr.mxu0 %v2835_v15 }
 0x47f   : > { %6190 = vmatpush3.msra.mxu0 %v2835_v15 }
 0x480   : > { %6201 = vmatprep.subr.msk.mxu0 %vm2410_vm3, %v7418_v24  ;;  %6192 = vmatmul.mubr.msk.f32.vlgmr.msra.gmra.mxu0 %vm2410_vm3, %v2947_v19 }
 0x481   : > { %6202 = vmatpush3.xpose.msk.msra.mxu0 %vm2410_vm3, %v7418_v24  ;;  %6205 = vmatprep.mubr.msk.f32.mxu0 %vm2410_vm3, %v7423_v31 }
 0x482   : > { %6203 = vmatprep.subr.msk.mxu0 %vm2410_vm3, %v7427_v45 }
 0x485   : > { %6204 = vmatpush3.xpose.msk.msra.mxu0 %vm2410_vm3, %v7427_v45 }
 0x488   : > { %6206 = vmatmul.mubr.msk.f32.vlgmr.msra.gmra.mxu0 %vm2410_vm3, %v7435_v17 }
 0x51b   : > { %v6172_v46 = vpop.f32.mrf.mxu0 }
 0x51c   : > { %2827 = vst.msk [vmem:[%s7442_s9 + $0x8] sm:$0xff] %vm2410_vm3, %v6172_v46 }
 0x51d   : > { %v2817_v18 = vpop.f32.mrf.mxu0 }
 0x51e   : > { %2826 = vst.msk [vmem:[%s7442_s9] sm:$0xff] %vm2410_vm3, %v2817_v18  ;;  %v684_v18 = vrot.slane %v6766_v57, %v6740_v41 }
 0x53c   : > { %v6186_v47 = vpop.f32.mrf.mxu0 }
 0x53d   : > { %v3062_v58 = vmul.f32 0.35355338, %v6186_v47 }
 0x53e   : > { %v3052_v21 = vpop.f32.mrf.mxu0 }
 0x53f   : > { %v3061_v13 = vmul.f32 0.35355338, %v3052_v21  ;;  %v3064_v49 = vsel %vm2410_vm3, %v3062_v58, -inf }
 0x540   : > { %v7448_v54 = vpop.f32.mrf.mxu0 }
 0x541   : > { %v3063_v39 = vsel %vm2410_vm3, %v3061_v13, -inf }
 0x542   : > { %v3065_v29 = vmax.f32 %v3063_v39, %v3064_v49  ;;  %v3162_v14 = vpop.f32.mrf.mxu0 }
 0x543   : > { %6198 = vmatprep.mubr.msk.f32.mxu1 %vm2410_vm3, %v3162_v14 }
 0x544   : > { %v3066_v51 = vrot.slane %v3065_v29, 4 }
 0x546   : > { %v3067_v9 = vmax.f32 %v3065_v29, %v3066_v51 }
 0x548   : > { %v3068_v20 = vrot.slane %v3067_v9, 2  ;;  %v6207_v36 = vpop.f32.mrf.mxu0 }
 0x549   : > { %v7453_v38 = vmul.f32 0.35355338, %v6207_v36 }
 0x54a   : > { %v3069_v34 = vmax.f32 %v3067_v9, %v3068_v20  ;;  %v3342_v4 = vpop.f32.mrf.mxu0 }
 0x54b   : > { %v7455_v28 = vmul.f32 0.35355338, %v3342_v4  ;;  %v3356_v42 = vsel %vm2410_vm3, %v7453_v38, -inf }
 0x54c   : > { %v3070_v53 = vrot.slane %v3069_v34, 1  ;;  %3357 = vmax.xlane.f32.xlu0 %v3356_v42 }
 0x54d   : > { %v3353_v3 = vsel %vm2410_vm3, %v7455_v28, -inf }
 0x54e   : > { %v3071_v37 = vmax.f32 %v3069_v34, %v3070_v53  ;;  %3354 = vmax.xlane.f32.xlu1 %v3353_v3 }
 0x550   : > { %v3072_v44 = vsub.f32 %v3061_v13, %v3071_v37  ;;  %v3073_v40 = vsub.f32 %v3062_v58, %v3071_v37 }
 0x552   : > { %v3074_v15 = vmul.f32 1.442695, %v3072_v44  ;;  %v3076_v19 = vmul.f32 1.442695, %v3073_v40 }
 0x554   : > { %6444 = vpow2.f32 %v3074_v15 }
 0x555   : > { %6446 = vpow2.f32 %v3076_v19 }
 0x55f   : > { %1379 = vrot.lane.b32.xlu1 %v7319_v43, %s6605_s19 }
 0x561   : > { %v6445_v46 = vpop.eup %6444 }
 0x562   : > { %v6447_v47 = vpop.eup %6446  ;;  %v3078_v21 = vsel %vm2410_vm3, %v6445_v46, 0.0  ;;  %2263 = vrot.lane.b32.xlu0 %v7254_v50, %s6603_s17  ;;  %v7478_v50 = vrot.slane %v6808_v1, %v6740_v41 }
 0x563   : > { %v3079_v13 = vsel %vm2410_vm3, %v6447_v47, 0.0  ;;  %867 = vrot.lane.b32.xlu1 %v684_v18, %s6599_s13 }
 0x564   : > { %v3080_v58 = vadd.f32 %v3079_v13, %v3078_v21 }
 0x566   : > { %v3081_v49 = vrot.slane %v3080_v58, 4  ;;  %1297 = vrot.lane.b32.xlu0 %v7277_v63, %s6603_s17 }
 0x567   : > { %1059 = vrot.lane.b32.xlu1 %v684_v18, %s6601_s15 }
 0x568   : > { %v3082_v39 = vadd.f32 %v3081_v49, %v3080_v58 }
 0x56a   : > { %1769 = vrot.lane.b32.xlu0 %v7302_v25, %s6600_s14  ;;  %v3083_v57 = vrot.slane %v3082_v39, 2 }
 0x56b   : > { %1251 = vrot.lane.b32.xlu1 %v684_v18, %s6603_s17 }
 0x56c   : > { %v3084_v29 = vadd.f32 %v3083_v57, %v3082_v39  ;;  %v7550_v39 = vrot.slane %v7133_v11, %v6740_v41 }
 0x56e   : > { %1961 = vrot.lane.b32.xlu0 %v7302_v25, %s6602_s16  ;;  %v3085_v14 = vrot.slane %v3084_v29, 1 }
 0x56f   : > { %1673 = vrot.lane.b32.xlu1 %v7478_v50, %s6600_s14 }
 0x570   : > { %v3086_v63 = vadd.f32 %v3085_v14, %v3084_v29 }
 0x572   : > { %2153 = vrot.lane.b32.xlu0 %v7302_v25, %s6604_s18  ;;  %6448 = vrcp.f32 %v3086_v63 }
 0x573   : > { %1929 = vrot.lane.b32.xlu1 %v7478_v50, %s6602_s16 }
 0x576   : > { %2345 = vrot.lane.b32.xlu0 %v7302_v25, %s6605_s19 }
 0x577   : > { %2121 = vrot.lane.b32.xlu1 %v7478_v50, %s6604_s18 }
 0x57a   : > { %899 = vrot.lane.b32.xlu0 %v7319_v43, %s6599_s13 }
 0x57e   : > { %1091 = vrot.lane.b32.xlu0 %v7319_v43, %s6601_s15 }
 0x57f   : > { %v6449_v1 = vpop.eup %6448 }
 0x580   : > { %v3089_v51 = vmul.f32 %v6449_v1, %v6447_v47  ;;  %v3088_v9 = vmul.f32 %v6449_v1, %v6445_v46  ;;  %v7572_v1 = vrot.slane %v7100_v7, %v6740_v41  ;;  %v7588_v7 = vrot.slane %v6873_v26, %v6740_v41 }
 0x582   : > { %1283 = vrot.lane.b32.xlu0 %v7319_v43, %s6603_s17  ;;  %6194 = vmatprep.subr.mxu1 %v3089_v51 }
 0x583   : > { %6195 = vmatpush3.msra.mxu1 %v3089_v51 }
 0x584   : > { %6196 = vmatprep.subr.mxu1 %v3088_v9 }
 0x585   : > { %6197 = vmatpush3.msra.mxu1 %v3088_v9  ;;  %v7599_v9 = vrot.slane %v6843_v16, %v6740_v41 }
 0x586   : > { %6199 = vmatmul.mubr.msk.f32.vlgmr.msra.gmra.mxu1 %vm2410_vm3, %v7448_v54  ;;  %6208 = vmatprep.subr.mxu1 %v7418_v24 }
 0x587   : > { %707 = vrot.lane.b32.xlu0 %v684_v18, %s6600_s14  ;;  %6209 = vmatpush3.msra.mxu1 %v7418_v24 }
 0x588   : > { %6210 = vmatprep.subr.mxu1 %v7427_v45 }
 0x589   : > { %6211 = vmatpush3.msra.mxu1 %v7427_v45 }
 0x58b   : > { %963 = vrot.lane.b32.xlu0 %v684_v18, %s6602_s16 }
 0x58f   : > { %1155 = vrot.lane.b32.xlu0 %v684_v18, %s6604_s18 }
 0x593   : > { %1347 = vrot.lane.b32.xlu0 %v684_v18, %s6605_s19 }
 0x597   : > { %1833 = vrot.lane.b32.xlu0 %v7478_v50, %s6599_s13 }
 0x59b   : > { %2025 = vrot.lane.b32.xlu0 %v7478_v50, %s6601_s15 }
 0x59f   : > { %2217 = vrot.lane.b32.xlu0 %v7478_v50, %s6603_s17 }
 0x5bd   : > { %3375 = vxpose.xlu0.b32.start [1/2] (short) (narrow) %v7423_v31, 16 }
 0x5c1   : > { %3376 = vxpose.xlu0.b32.end [2/2] (short) (narrow) %v7435_v17, 16 }
 0x5d5   : > { %v3358_v25 = vpop.xlane.xlu0 %3357 }
 0x5d6   : > { %v3360_v43 = vsub.f32 %v7453_v38, %v3358_v25 }
 0x5d7   : > { %v3355_v24 = vpop.xlane.xlu1 %3354 }
 0x5d8   : > { %v3363_v45 = vmul.f32 1.442695, %v3360_v43  ;;  %v3359_v54 = vsub.f32 %v7455_v28, %v3355_v24 }
 0x5d9   : > { %v2264_v20 = vpop.permute.xlu0 %2263 }
 0x5da   : > { %6450 = vpow2.f32 %v3363_v45  ;;  %v3361_v36 = vmul.f32 1.442695, %v3359_v54  ;;  %2301 = vst.msk [vmem:[#allocation3 + $0xae] sm:$0x1] %vm528_vm2, %v2264_v20 }
 0x5db   : > { %v1380_v34 = vpop.permute.xlu1 %1379 }
 0x5dc   : > { %6452 = vpow2.f32 %v3361_v36  ;;  %1424 = vst.msk [vmem:[#allocation3 + $0x37] sm:$0x1] %vm528_vm2, %v1380_v34 }
 0x5dd   : > { %v1298_v4 = vpop.permute.xlu0 %1297 }
 0x5de   : > { %1335 = vst.msk [vmem:[#allocation3 + $0xa6] sm:$0x1] %vm528_vm2, %v1298_v4 }
 0x5df   : > { %v868_v31 = vpop.permute.xlu1 %867 }
 0x5e0   : > { %888 = vst.msk [vmem:[#allocation2 + $0x32] sm:$0x1] %vm528_vm2, %v868_v31 }
 0x5e1   : > { %v1770_v17 = vpop.permute.xlu0 %1769  ;;  %v7522_v38 = vld [vmem:[#allocation3 + $0xa8] sm:$0xff] }
 0x5e2   : > { %1814 = vst.msk [vmem:[#allocation3 + $0x39] sm:$0x1] %vm528_vm2, %v1770_v17  ;;  %6215 = vmatprep.subr.mxu1 %v7522_v38 }
 0x5e3   : > { %v1060_v28 = vpop.permute.xlu1 %1059 }
 0x5e4   : > { %1080 = vst.msk [vmem:[#allocation2 + $0x34] sm:$0x1] %vm528_vm2, %v1060_v28 }
 0x5e5   : > { %v1962_v42 = vpop.permute.xlu0 %1961  ;;  %v3262_v25 = vld [vmem:[#allocation3 + $0xa0] sm:$0xff] }
 0x5e6   : > { %2006 = vst.msk [vmem:[#allocation3 + $0x3b] sm:$0x1] %vm528_vm2, %v1962_v42 }
 0x5e7   : > { %v7528_v53 = vpop.eup %6450  ;;  %v1252_v3 = vpop.permute.xlu1 %1251 }
 0x5e8   : > { %1272 = vst.msk [vmem:[#allocation2 + $0x36] sm:$0x1] %vm528_vm2, %v1252_v3  ;;  %v3368_v37 = vsel %vm2410_vm3, %v7528_v53, 0.0 }
 0x5e9   : > { %v7533_v44 = vpop.eup %6452  ;;  %v2154_v40 = vpop.permute.xlu0 %2153  ;;  %3369 = vadd.xlane.f32.xlu1 %v3368_v37 }
 0x5ea   : > { %2198 = vst.msk [vmem:[#allocation3 + $0x3d] sm:$0x1] %vm528_vm2, %v2154_v40  ;;  %v3365_v19 = vsel %vm2410_vm3, %v7533_v44, 0.0 }
 0x5eb   : > { %v1674_v15 = vpop.permute.xlu1 %1673 }
 0x5ec   : > { %1694 = vst.msk [vmem:[#allocation2 + $0x39] sm:$0x1] %vm528_vm2, %v1674_v15 }
 0x5ed   : > { %v2346_v46 = vpop.permute.xlu0 %2345  ;;  %3366 = vadd.xlane.f32.xlu1 %v3365_v19 }
 0x5ee   : > { %2390 = vst.msk [vmem:[#allocation3 + $0x3f] sm:$0x1] %vm528_vm2, %v2346_v46 }
 0x5ef   : > { %v1930_v18 = vpop.permute.xlu1 %1929 }
 0x5f0   : > { %1950 = vst.msk [vmem:[#allocation2 + $0x3b] sm:$0x1] %vm528_vm2, %v1930_v18 }
 0x5f1   : > { %v900_v47 = vpop.permute.xlu0 %899 }
 0x5f2   : > { %944 = vst.msk [vmem:[#allocation3 + $0x32] sm:$0x1] %vm528_vm2, %v900_v47 }
 0x5f3   : > { %v2122_v21 = vpop.permute.xlu1 %2121 }
 0x5f4   : > { %2142 = vst.msk [vmem:[#allocation2 + $0x3d] sm:$0x1] %vm528_vm2, %v2122_v21 }
 0x5f5   : > { %v1092_v13 = vpop.permute.xlu0 %1091  ;;  %v7605_v43 = vld [vmem:[#allocation3 + $0x38] sm:$0xff] }
 0x5f6   : > { %1136 = vst.msk [vmem:[#allocation3 + $0x34] sm:$0x1] %vm528_vm2, %v1092_v13 }
 0x5f9   : > { %v1284_v58 = vpop.permute.xlu0 %1283 }
 0x5fa   : > { %1328 = vst.msk [vmem:[#allocation3 + $0x36] sm:$0x1] %vm528_vm2, %v1284_v58 }
 0x5fd   : > { %v708_v49 = vpop.permute.xlu0 %707 }
 0x5fe   : > { %728 = vst.msk [vmem:[#allocation2 + $0x31] sm:$0x1] %vm528_vm2, %v708_v49  ;;  %2313 = vrot.lane.b32.xlu1 %v7478_v50, %s6605_s19 }
 0x601   : > { %v964_v57 = vpop.permute.xlu0 %963  ;;  %v7629_v3 = vld [vmem:[#allocation3 + $0x30] sm:$0xff] }
 0x602   : > { %984 = vst.msk [vmem:[#allocation2 + $0x33] sm:$0x1] %vm528_vm2, %v964_v57  ;;  %1785 = vrot.lane.b32.xlu1 %v7550_v39, %s6600_s14 }
 0x605   : > { %v1156_v29 = vpop.permute.xlu0 %1155 }
 0x606   : > { %1176 = vst.msk [vmem:[#allocation2 + $0x35] sm:$0x1] %vm528_vm2, %v1156_v29  ;;  %1881 = vrot.lane.b32.xlu1 %v7550_v39, %s6599_s13 }
 0x609   : > { %v1348_v14 = vpop.permute.xlu0 %1347 }
 0x60a   : > { %1368 = vst.msk [vmem:[#allocation2 + $0x37] sm:$0x1] %vm528_vm2, %v1348_v14  ;;  %1977 = vrot.lane.b32.xlu1 %v7550_v39, %s6602_s16 }
 0x60d   : > { %v1834_v11 = vpop.permute.xlu0 %1833 }
 0x60e   : > { %1854 = vst.msk [vmem:[#allocation2 + $0x3a] sm:$0x1] %vm528_vm2, %v1834_v11  ;;  %2073 = vrot.lane.b32.xlu1 %v7550_v39, %s6601_s15 }
 0x611   : > { %v2026_v50 = vpop.permute.xlu0 %2025  ;;  %v7625_v42 = vld [vmem:[#allocation2 + $0x30] sm:$0xff] }
 0x612   : > { %2046 = vst.msk [vmem:[#allocation2 + $0x3c] sm:$0x1] %vm528_vm2, %v2026_v50  ;;  %2169 = vrot.lane.b32.xlu1 %v7550_v39, %s6604_s18 }
 0x615   : > { %v2218_v63 = vpop.permute.xlu0 %2217 }
 0x616   : > { %2238 = vst.msk [vmem:[#allocation2 + $0x3e] sm:$0x1] %vm528_vm2, %v2218_v63  ;;  %2361 = vrot.lane.b32.xlu1 %v7550_v39, %s6605_s19 }
 0x61a   : > { %819 = vrot.lane.b32.xlu1 %v7572_v1, %s6600_s14 }
 0x61e   : > { %915 = vrot.lane.b32.xlu1 %v7572_v1, %s6599_s13 }
 0x622   : > { %1011 = vrot.lane.b32.xlu1 %v7572_v1, %s6602_s16 }
 0x626   : > { %1107 = vrot.lane.b32.xlu1 %v7572_v1, %s6601_s15 }
 0x62a   : > { %1203 = vrot.lane.b32.xlu1 %v7572_v1, %s6604_s18 }
 0x62e   : > { %1395 = vrot.lane.b32.xlu1 %v7572_v1, %s6605_s19 }
 0x632   : > { %1867 = vrot.lane.b32.xlu1 %v7588_v7, %s6599_s13 }
 0x636   : > { %2059 = vrot.lane.b32.xlu1 %v7588_v7, %s6601_s15 }
 0x639   : > { %v3391_v51 = vpop.trf.xlu0 }
 0x63a   : > { %2251 = vrot.lane.b32.xlu1 %v7588_v7, %s6603_s17  ;;  %6212 = vmatprep.mubr.msk.f32.mxu1 %vm2410_vm3, %v3391_v51 }
 0x63d   : > { %v3392_v26 = vpop.trf.xlu0 }
 0x63e   : > { %6213 = vmatmul.mubr.msk.f32.vlgmr.msra.gmra.mxu1 %vm2410_vm3, %v3392_v26  ;;  %805 = vrot.lane.b32.xlu1 %v7599_v9, %s6600_s14 }
 0x63f   : > { %6216 = vmatpush3.msra.mxu1 %v7522_v38 }
 0x640   : > { %6217 = vmatprep.subr.mxu1 %v3262_v25 }
 0x641   : > { %6218 = vmatpush3.msra.mxu1 %v3262_v25 }
 0x642   : > { %6229 = vmatprep.subr.msk.mxu1 %vm2410_vm3, %v7605_v43  ;;  %997 = vrot.lane.b32.xlu1 %v7599_v9, %s6602_s16 }
 0x646   : > { %v6200_v16 = vpop.f32.mrf.mxu1  ;;  %1189 = vrot.lane.b32.xlu1 %v7599_v9, %s6604_s18 }
 0x647   : > { %5937 = vst.msk [vmem:[%s7442_s9 + $0x18] sm:$0xff] %vm2410_vm3, %v6200_v16 }
 0x648   : > { %v3243_v24 = vpop.f32.mrf.mxu1 }
 0x649   : > { %5936 = vst.msk [vmem:[%s7442_s9 + $0x10] sm:$0xff] %vm2410_vm3, %v3243_v24 }
 0x672   : > { %v3370_v45 = vpop.xlane.xlu1 %3369 }
 0x673   : > { %6454 = vrcp.f32 %v3370_v45 }
 0x676   : > { %v3367_v54 = vpop.xlane.xlu1 %3366 }
 0x677   : > { %6456 = vrcp.f32 %v3367_v54 }
 0x67a   : > { %v2314_v20 = vpop.permute.xlu1 %2313 }
 0x67b   : > { %2334 = vst.msk [vmem:[#allocation2 + $0x3f] sm:$0x1] %vm528_vm2, %v2314_v20 }
 0x67e   : > { %v1786_v36 = vpop.permute.xlu1 %1785 }
 0x67f   : > { %1822 = vst.msk [vmem:[#allocation3 + $0xb9] sm:$0x1] %vm528_vm2, %v1786_v36 }
 0x680   : > { %v6455_v4 = vpop.eup %6454 }
 0x681   : > { %v3374_v28 = vmul.f32 %v6455_v4, %v7528_v53 }
 0x682   : > { %v1882_v34 = vpop.permute.xlu1 %1881 }
 0x683   : > { %1918 = vst.msk [vmem:[#allocation3 + $0xba] sm:$0x1] %vm528_vm2, %v1882_v34 }
 0x684   : > { %v6457_v31 = vpop.eup %6456 }
 0x685   : > { %v3373_v17 = vmul.f32 %v6457_v31, %v7533_v44  ;;  %v7639_v44 = vld [vmem:[#allocation2 + $0x38] sm:$0xff] }
 0x686   : > { %v1978_v38 = vpop.permute.xlu1 %1977 }
 0x687   : > { %2014 = vst.msk [vmem:[#allocation3 + $0xbb] sm:$0x1] %vm528_vm2, %v1978_v38  ;;  %6219 = vmatprep.mubr.msk.f32.mxu1 %vm2410_vm3, %v3373_v17 }
 0x688   : > { %6220 = vmatmul.mubr.msk.f32.vlgmr.msra.gmra.mxu1 %vm2410_vm3, %v3374_v28 }
 0x689   : > { %6230 = vmatpush3.xpose.msk.msra.mxu1 %vm2410_vm3, %v7605_v43  ;;  %6233 = vmatprep.mubr.msk.f32.mxu1 %vm2410_vm3, %v7625_v42 }
 0x68a   : > { %6231 = vmatprep.subr.msk.mxu1 %vm2410_vm3, %v7629_v3  ;;  %v2074_v53 = vpop.permute.xlu1 %2073 }
 0x68b   : > { %2110 = vst.msk [vmem:[#allocation3 + $0xbc] sm:$0x1] %vm528_vm2, %v2074_v53 }
 0x68d   : > { %6232 = vmatpush3.xpose.msk.msra.mxu1 %vm2410_vm3, %v7629_v3 }
 0x68e   : > { %v2170_v37 = vpop.permute.xlu1 %2169 }
 0x68f   : > { %2206 = vst.msk [vmem:[#allocation3 + $0xbd] sm:$0x1] %vm528_vm2, %v2170_v37 }
 0x690   : > { %6234 = vmatmul.mubr.msk.f32.vlgmr.msra.gmra.mxu1 %vm2410_vm3, %v7639_v44 }
 0x692   : > { %v2362_v40 = vpop.permute.xlu1 %2361 }
 0x693   : > { %2398 = vst.msk [vmem:[#allocation3 + $0xbf] sm:$0x1] %vm528_vm2, %v2362_v40 }
 0x696   : > { %v820_v15 = vpop.permute.xlu1 %819 }
 0x697   : > { %856 = vst.msk [vmem:[#allocation3 + $0xb1] sm:$0x1] %vm528_vm2, %v820_v15 }
 0x69a   : > { %v916_v19 = vpop.permute.xlu1 %915 }
 0x69b   : > { %952 = vst.msk [vmem:[#allocation3 + $0xb2] sm:$0x1] %vm528_vm2, %v916_v19 }
 0x69e   : > { %v1012_v46 = vpop.permute.xlu1 %1011 }
 0x69f   : > { %1048 = vst.msk [vmem:[#allocation3 + $0xb3] sm:$0x1] %vm528_vm2, %v1012_v46 }
 0x6a2   : > { %v1108_v18 = vpop.permute.xlu1 %1107 }
 0x6a3   : > { %1144 = vst.msk [vmem:[#allocation3 + $0xb4] sm:$0x1] %vm528_vm2, %v1108_v18 }
 0x6a6   : > { %v1204_v47 = vpop.permute.xlu1 %1203 }
 0x6a7   : > { %1240 = vst.msk [vmem:[#allocation3 + $0xb5] sm:$0x1] %vm528_vm2, %v1204_v47 }
 0x6aa   : > { %v1396_v21 = vpop.permute.xlu1 %1395 }
 0x6ab   : > { %1432 = vst.msk [vmem:[#allocation3 + $0xb7] sm:$0x1] %vm528_vm2, %v1396_v21 }
 0x6ae   : > { %v1868_v13 = vpop.permute.xlu1 %1867 }
 0x6af   : > { %1911 = vst.msk [vmem:[#allocation3 + $0x4a] sm:$0x1] %vm528_vm2, %v1868_v13 }
 0x6b2   : > { %v2060_v58 = vpop.permute.xlu1 %2059 }
 0x6b3   : > { %2103 = vst.msk [vmem:[#allocation3 + $0x4c] sm:$0x1] %vm528_vm2, %v2060_v58 }
 0x6b6   : > { %v2252_v49 = vpop.permute.xlu1 %2251 }
 0x6b7   : > { %2295 = vst.msk [vmem:[#allocation3 + $0x4e] sm:$0x1] %vm528_vm2, %v2252_v49 }
 0x6ba   : > { %v806_v57 = vpop.permute.xlu1 %805 }
 0x6bb   : > { %849 = vst.msk [vmem:[#allocation3 + $0x41] sm:$0x1] %vm528_vm2, %v806_v57 }
 0x6be   : > { %v998_v29 = vpop.permute.xlu1 %997 }
 0x6bf   : > { %1041 = vst.msk [vmem:[#allocation3 + $0x43] sm:$0x1] %vm528_vm2, %v998_v29 }
 0x6c2   : > { %v1190_v14 = vpop.permute.xlu1 %1189 }
 0x6c3   : > { %1233 = vst.msk [vmem:[#allocation3 + $0x45] sm:$0x1] %vm528_vm2, %v1190_v14 }
 0x6fe   : > { %v6214_v11 = vpop.f32.mrf.mxu1 }
 0x6ff   : > { %v3489_v50 = vmul.f32 0.35355338, %v6214_v11 }
 0x700   : > { %v3479_v63 = vpop.f32.mrf.mxu1 }
 0x701   : > { %v3491_v51 = vsel %vm2410_vm3, %v3489_v50, -inf  ;;  %v3488_v26 = vmul.f32 0.35355338, %v3479_v63 }
 0x703   : > { %v3490_v25 = vsel %vm2410_vm3, %v3488_v26, -inf }
 0x704   : > { %v3492_v16 = vmax.f32 %v3490_v25, %v3491_v51 }
 0x706   : > { %v3493_v24 = vrot.slane %v3492_v16, 4 }
 0x708   : > { %v3494_v45 = vmax.f32 %v3492_v16, %v3493_v24 }
 0x70a   : > { %v3495_v54 = vrot.slane %v3494_v45, 2 }
 0x70c   : > { %v3496_v20 = vmax.f32 %v3494_v45, %v3495_v54 }
 0x70e   : > { %v3497_v36 = vrot.slane %v3496_v20, 1 }
 0x710   : > { %v3498_v34 = vmax.f32 %v3496_v20, %v3497_v36 }
 0x712   : > { %v3499_v4 = vsub.f32 %v3488_v26, %v3498_v34  ;;  %v3500_v31 = vsub.f32 %v3489_v50, %v3498_v34 }
 0x714   : > { %v3501_v17 = vmul.f32 1.442695, %v3499_v4  ;;  %v3503_v38 = vmul.f32 1.442695, %v3500_v31 }
 0x716   : > { %6458 = vpow2.f32 %v3501_v17 }
 0x717   : > { %6460 = vpow2.f32 %v3503_v38 }
 0x723   : > { %v6459_v28 = vpop.eup %6458 }
 0x724   : > { %v6461_v53 = vpop.eup %6460  ;;  %v3505_v37 = vsel %vm2410_vm3, %v6459_v28, 0.0 }
 0x725   : > { %v3506_v40 = vsel %vm2410_vm3, %v6461_v53, 0.0 }
 0x726   : > { %v3507_v15 = vadd.f32 %v3506_v40, %v3505_v37 }
 0x728   : > { %v3508_v19 = vrot.slane %v3507_v15, 4 }
 0x72a   : > { %v3509_v46 = vadd.f32 %v3508_v19, %v3507_v15 }
 0x72c   : > { %v3510_v18 = vrot.slane %v3509_v46, 2 }
 0x72e   : > { %v3511_v47 = vadd.f32 %v3510_v18, %v3509_v46 }
 0x730   : > { %v3512_v21 = vrot.slane %v3511_v47, 1 }
 0x732   : > { %v3513_v13 = vadd.f32 %v3512_v21, %v3511_v47  ;;  %v7747_v21 = vrot.slane %v7085_v61, %v6740_v41 }
 0x734   : > { %6462 = vrcp.f32 %v3513_v13 }
 0x741   : > { %v6463_v58 = vpop.eup %6462 }
 0x742   : > { %v3516_v49 = vmul.f32 %v6463_v58, %v6461_v53  ;;  %v3515_v57 = vmul.f32 %v6463_v58, %v6459_v28 }
 0x744   : > { %6222 = vmatprep.subr.mxu0 %v3516_v49 }
 0x745   : > { %6223 = vmatpush3.msra.mxu0 %v3516_v49 }
 0x746   : > { %6224 = vmatprep.subr.mxu0 %v3515_v57 }
 0x747   : > { %6225 = vmatpush3.msra.mxu0 %v3515_v57 }
 0x748   : > { %6236 = vmatprep.subr.mxu0 %v7605_v43  ;;  %v6221_v29 = vpop.f32.mrf.mxu1 }
 0x74a   : > { %v3589_v14 = vpop.f32.mrf.mxu1 }
 0x74b   : > { %6226 = vmatprep.mubr.msk.f32.mxu0 %vm2410_vm3, %v3589_v14 }
 0x74c   : > { %6227 = vmatmul.mubr.msk.f32.vlgmr.msra.gmra.mxu0 %vm2410_vm3, %v6221_v29 }
 0x74d   : > { %6237 = vmatpush3.msra.mxu0 %v7605_v43  ;;  %v688_v43 = vrot.slane %v6746_v48, %v6740_v41 }
 0x74e   : > { %6238 = vmatprep.subr.mxu0 %v7629_v3 }
 0x74f   : > { %6239 = vmatpush3.msra.mxu0 %v7629_v3  ;;  %v7683_v3 = vrot.slane %v6775_v59, %v6740_v41 }
 0x750   : > { %v6235_v11 = vpop.f32.mrf.mxu1 }
 0x751   : > { %v3779_v50 = vmul.f32 0.35355338, %v6235_v11 }
 0x752   : > { %v3769_v63 = vpop.f32.mrf.mxu1 }
 0x753   : > { %v3778_v51 = vmul.f32 0.35355338, %v3769_v63  ;;  %v3783_v26 = vsel %vm2410_vm3, %v3779_v50, -inf }
 0x754   : > { %3784 = vmax.xlane.f32.xlu0 %v3783_v26 }
 0x755   : > { %v3780_v25 = vsel %vm2410_vm3, %v3778_v51, -inf }
 0x756   : > { %3781 = vmax.xlane.f32.xlu1 %v3780_v25 }
 0x767   : > { %1381 = vrot.lane.b32.xlu1 %v7599_v9, %s6605_s19 }
 0x76a   : > { %2265 = vrot.lane.b32.xlu0 %v7550_v39, %s6603_s17 }
 0x76b   : > { %869 = vrot.lane.b32.xlu1 %v688_v43, %s6599_s13 }
 0x76e   : > { %1299 = vrot.lane.b32.xlu0 %v7572_v1, %s6603_s17 }
 0x76f   : > { %1061 = vrot.lane.b32.xlu1 %v688_v43, %s6601_s15 }
 0x772   : > { %1771 = vrot.lane.b32.xlu0 %v7588_v7, %s6600_s14 }
 0x773   : > { %1253 = vrot.lane.b32.xlu1 %v688_v43, %s6603_s17 }
 0x776   : > { %1963 = vrot.lane.b32.xlu0 %v7588_v7, %s6602_s16 }
 0x777   : > { %1675 = vrot.lane.b32.xlu1 %v7683_v3, %s6600_s14 }
 0x77a   : > { %2155 = vrot.lane.b32.xlu0 %v7588_v7, %s6604_s18 }
 0x77b   : > { %1931 = vrot.lane.b32.xlu1 %v7683_v3, %s6602_s16 }
 0x77e   : > { %2347 = vrot.lane.b32.xlu0 %v7588_v7, %s6605_s19 }
 0x77f   : > { %2123 = vrot.lane.b32.xlu1 %v7683_v3, %s6604_s18 }
 0x782   : > { %901 = vrot.lane.b32.xlu0 %v7599_v9, %s6599_s13 }
 0x786   : > { %1093 = vrot.lane.b32.xlu0 %v7599_v9, %s6601_s15 }
 0x78a   : > { %1285 = vrot.lane.b32.xlu0 %v7599_v9, %s6603_s17 }
 0x78e   : > { %709 = vrot.lane.b32.xlu0 %v688_v43, %s6600_s14 }
 0x792   : > { %965 = vrot.lane.b32.xlu0 %v688_v43, %s6602_s16 }
 0x796   : > { %1157 = vrot.lane.b32.xlu0 %v688_v43, %s6604_s18 }
 0x79a   : > { %1349 = vrot.lane.b32.xlu0 %v688_v43, %s6605_s19 }
 0x79e   : > { %1835 = vrot.lane.b32.xlu0 %v7683_v3, %s6599_s13 }
 0x7a2   : > { %2027 = vrot.lane.b32.xlu0 %v7683_v3, %s6601_s15 }
 0x7a6   : > { %2219 = vrot.lane.b32.xlu0 %v7683_v3, %s6603_s17 }
 0x7c4   : > { %3802 = vxpose.xlu0.b32.start [1/2] (short) (narrow) %v7625_v42, 16 }
 0x7c8   : > { %3803 = vxpose.xlu0.b32.end [2/2] (short) (narrow) %v7639_v44, 16 }
 0x7dd   : > { %v3785_v48 = vpop.xlane.xlu0 %3784 }
 0x7de   : > { %v3787_v59 = vsub.f32 %v3779_v50, %v3785_v48  ;;  %v7773_v50 = vrot.slane %v7076_v52, %v6740_v41  ;;  %v7789_v52 = vrot.slane %v6891_v30, %v6740_v41 }
 0x7df   : > { %v3782_v39 = vpop.xlane.xlu1 %3781 }
 0x7e0   : > { %v3790_v1 = vmul.f32 1.442695, %v3787_v59  ;;  %v3786_v7 = vsub.f32 %v3778_v51, %v3782_v39  ;;  %v7800_v51 = vrot.slane %v6854_v22, %v6740_v41 }
 0x7e1   : > { %v2266_v9 = vpop.permute.xlu0 %2265 }
 0x7e2   : > { %6464 = vpow2.f32 %v3790_v1  ;;  %v3788_v16 = vmul.f32 1.442695, %v3786_v7  ;;  %2302 = vst.msk [vmem:[#allocation3 + $0xbe] sm:$0x1] %vm528_vm2, %v2266_v9 }
 0x7e3   : > { %v1382_v24 = vpop.permute.xlu1 %1381 }
 0x7e4   : > { %6466 = vpow2.f32 %v3788_v16  ;;  %1425 = vst.msk [vmem:[#allocation3 + $0x47] sm:$0x1] %vm528_vm2, %v1382_v24 }
 0x7e5   : > { %v1300_v45 = vpop.permute.xlu0 %1299 }
 0x7e6   : > { %1336 = vst.msk [vmem:[#allocation3 + $0xb6] sm:$0x1] %vm528_vm2, %v1300_v45 }
 0x7e7   : > { %v870_v42 = vpop.permute.xlu1 %869 }
 0x7e8   : > { %889 = vst.msk [vmem:[#allocation2 + $0x42] sm:$0x1] %vm528_vm2, %v870_v42 }
 0x7e9   : > { %v1772_v44 = vpop.permute.xlu0 %1771  ;;  %v7719_v54 = vld [vmem:[#allocation3 + $0xb8] sm:$0xff] }
 0x7ea   : > { %1815 = vst.msk [vmem:[#allocation3 + $0x49] sm:$0x1] %vm528_vm2, %v1772_v44  ;;  %6243 = vmatprep.subr.mxu0 %v7719_v54 }
 0x7eb   : > { %v1062_v20 = vpop.permute.xlu1 %1061 }
 0x7ec   : > { %1081 = vst.msk [vmem:[#allocation2 + $0x44] sm:$0x1] %vm528_vm2, %v1062_v20 }
 0x7ed   : > { %v1964_v36 = vpop.permute.xlu0 %1963  ;;  %v3689_v30 = vld [vmem:[#allocation3 + $0xb0] sm:$0xff] }
 0x7ee   : > { %2007 = vst.msk [vmem:[#allocation3 + $0x4b] sm:$0x1] %vm528_vm2, %v1964_v36 }
 0x7ef   : > { %v7725_v34 = vpop.eup %6464  ;;  %v1254_v4 = vpop.permute.xlu1 %1253 }
 0x7f0   : > { %1273 = vst.msk [vmem:[#allocation2 + $0x46] sm:$0x1] %vm528_vm2, %v1254_v4  ;;  %v3795_v31 = vsel %vm2410_vm3, %v7725_v34, 0.0 }
 0x7f1   : > { %v7730_v17 = vpop.eup %6466  ;;  %v2156_v38 = vpop.permute.xlu0 %2155  ;;  %3796 = vadd.xlane.f32.xlu1 %v3795_v31 }
 0x7f2   : > { %2199 = vst.msk [vmem:[#allocation3 + $0x4d] sm:$0x1] %vm528_vm2, %v2156_v38  ;;  %v3792_v53 = vsel %vm2410_vm3, %v7730_v17, 0.0 }
 0x7f3   : > { %v1676_v28 = vpop.permute.xlu1 %1675 }
 0x7f4   : > { %1695 = vst.msk [vmem:[#allocation2 + $0x49] sm:$0x1] %vm528_vm2, %v1676_v28 }
 0x7f5   : > { %v2348_v37 = vpop.permute.xlu0 %2347  ;;  %3793 = vadd.xlane.f32.xlu1 %v3792_v53 }
 0x7f6   : > { %2391 = vst.msk [vmem:[#allocation3 + $0x4f] sm:$0x1] %vm528_vm2, %v2348_v37 }
 0x7f7   : > { %v1932_v40 = vpop.permute.xlu1 %1931 }
 0x7f8   : > { %1951 = vst.msk [vmem:[#allocation2 + $0x4b] sm:$0x1] %vm528_vm2, %v1932_v40 }
 0x7f9   : > { %v902_v15 = vpop.permute.xlu0 %901 }
 0x7fa   : > { %945 = vst.msk [vmem:[#allocation3 + $0x42] sm:$0x1] %vm528_vm2, %v902_v15 }
 0x7fb   : > { %v2124_v19 = vpop.permute.xlu1 %2123 }
 0x7fc   : > { %2143 = vst.msk [vmem:[#allocation2 + $0x4d] sm:$0x1] %vm528_vm2, %v2124_v19 }
 0x7fd   : > { %v1094_v46 = vpop.permute.xlu0 %1093  ;;  %v7806_v25 = vld [vmem:[#allocation3 + $0x48] sm:$0xff] }
 0x7fe   : > { %1137 = vst.msk [vmem:[#allocation3 + $0x44] sm:$0x1] %vm528_vm2, %v1094_v46 }
 0x801   : > { %v1286_v18 = vpop.permute.xlu0 %1285 }
 0x802   : > { %1329 = vst.msk [vmem:[#allocation3 + $0x46] sm:$0x1] %vm528_vm2, %v1286_v18 }
 0x805   : > { %v710_v47 = vpop.permute.xlu0 %709 }
 0x806   : > { %729 = vst.msk [vmem:[#allocation2 + $0x41] sm:$0x1] %vm528_vm2, %v710_v47  ;;  %2315 = vrot.lane.b32.xlu1 %v7683_v3, %s6605_s19 }
 0x809   : > { %v966_v13 = vpop.permute.xlu0 %965  ;;  %v7826_v45 = vld [vmem:[#allocation3 + $0x40] sm:$0xff] }
 0x80a   : > { %985 = vst.msk [vmem:[#allocation2 + $0x43] sm:$0x1] %vm528_vm2, %v966_v13  ;;  %1787 = vrot.lane.b32.xlu1 %v7747_v21, %s6600_s14 }
 0x80c   : > { %v6228_v58 = vpop.f32.mrf.mxu0 }
 0x80d   : > { %5949 = vst.msk [vmem:[%s7442_s9 + $0x28] sm:$0xff] %vm2410_vm3, %v6228_v58  ;;  %v1158_v49 = vpop.permute.xlu0 %1157 }
 0x80e   : > { %1177 = vst.msk [vmem:[#allocation2 + $0x45] sm:$0x1] %vm528_vm2, %v1158_v49  ;;  %1883 = vrot.lane.b32.xlu1 %v7747_v21, %s6599_s13  ;;  %v3670_v57 = vpop.f32.mrf.mxu0 }
 0x80f   : > { %5948 = vst.msk [vmem:[%s7442_s9 + $0x20] sm:$0xff] %vm2410_vm3, %v3670_v57 }
 0x811   : > { %v1350_v61 = vpop.permute.xlu0 %1349 }
 0x812   : > { %1369 = vst.msk [vmem:[#allocation2 + $0x47] sm:$0x1] %vm528_vm2, %v1350_v61  ;;  %1979 = vrot.lane.b32.xlu1 %v7747_v21, %s6602_s16 }
 0x815   : > { %v1836_v29 = vpop.permute.xlu0 %1835 }
 0x816   : > { %1855 = vst.msk [vmem:[#allocation2 + $0x4a] sm:$0x1] %vm528_vm2, %v1836_v29  ;;  %2075 = vrot.lane.b32.xlu1 %v7747_v21, %s6601_s15 }
 0x819   : > { %v2028_v14 = vpop.permute.xlu0 %2027  ;;  %v7822_v24 = vld [vmem:[#allocation2 + $0x40] sm:$0xff] }
 0x81a   : > { %2047 = vst.msk [vmem:[#allocation2 + $0x4c] sm:$0x1] %vm528_vm2, %v2028_v14  ;;  %2171 = vrot.lane.b32.xlu1 %v7747_v21, %s6604_s18 }
 0x81d   : > { %v2220_v11 = vpop.permute.xlu0 %2219 }
 0x81e   : > { %2239 = vst.msk [vmem:[#allocation2 + $0x4e] sm:$0x1] %vm528_vm2, %v2220_v11  ;;  %2363 = vrot.lane.b32.xlu1 %v7747_v21, %s6605_s19 }
 0x822   : > { %821 = vrot.lane.b32.xlu1 %v7773_v50, %s6600_s14 }
 0x826   : > { %917 = vrot.lane.b32.xlu1 %v7773_v50, %s6599_s13 }
 0x82a   : > { %1013 = vrot.lane.b32.xlu1 %v7773_v50, %s6602_s16 }
 0x82e   : > { %1109 = vrot.lane.b32.xlu1 %v7773_v50, %s6601_s15 }
 0x832   : > { %1205 = vrot.lane.b32.xlu1 %v7773_v50, %s6604_s18 }
 0x836   : > { %1397 = vrot.lane.b32.xlu1 %v7773_v50, %s6605_s19 }
 0x83a   : > { %1869 = vrot.lane.b32.xlu1 %v7789_v52, %s6599_s13 }
 0x83e   : > { %2061 = vrot.lane.b32.xlu1 %v7789_v52, %s6601_s15 }
 0x840   : > { %v3818_v63 = vpop.trf.xlu0 }
 0x841   : > { %6240 = vmatprep.mubr.msk.f32.mxu0 %vm2410_vm3, %v3818_v63 }
 0x842   : > { %2253 = vrot.lane.b32.xlu1 %v7789_v52, %s6603_s17 }
 0x844   : > { %v3819_v26 = vpop.trf.xlu0 }
 0x845   : > { %6241 = vmatmul.mubr.msk.f32.vlgmr.msra.gmra.mxu0 %vm2410_vm3, %v3819_v26 }
 0x846   : > { %6244 = vmatpush3.msra.mxu0 %v7719_v54  ;;  %807 = vrot.lane.b32.xlu1 %v7800_v51, %s6600_s14 }
 0x847   : > { %6245 = vmatprep.subr.mxu0 %v3689_v30 }
 0x848   : > { %6246 = vmatpush3.msra.mxu0 %v3689_v30 }
 0x849   : > { %6257 = vmatprep.subr.msk.mxu0 %vm2410_vm3, %v7806_v25 }
 0x84a   : > { %999 = vrot.lane.b32.xlu1 %v7800_v51, %s6602_s16 }
 0x84e   : > { %1191 = vrot.lane.b32.xlu1 %v7800_v51, %s6604_s18 }
 0x87a   : > { %v3797_v22 = vpop.xlane.xlu1 %3796 }
 0x87b   : > { %6468 = vrcp.f32 %v3797_v22 }
 0x87e   : > { %v3794_v43 = vpop.xlane.xlu1 %3793 }
 0x87f   : > { %6470 = vrcp.f32 %v3794_v43 }
 0x882   : > { %v2316_v3 = vpop.permute.xlu1 %2315 }
 0x883   : > { %2335 = vst.msk [vmem:[#allocation2 + $0x4f] sm:$0x1] %vm528_vm2, %v2316_v3 }
 0x886   : > { %v1788_v48 = vpop.permute.xlu1 %1787 }
 0x887   : > { %1823 = vst.msk [vmem:[#allocation3 + $0xc9] sm:$0x1] %vm528_vm2, %v1788_v48 }
 0x888   : > { %v6469_v39 = vpop.eup %6468 }
 0x889   : > { %v3801_v16 = vmul.f32 %v6469_v39, %v7725_v34 }
 0x88a   : > { %v1884_v59 = vpop.permute.xlu1 %1883  ;;  %v7836_v54 = vld [vmem:[#allocation2 + $0x48] sm:$0xff] }
 0x88b   : > { %1919 = vst.msk [vmem:[#allocation3 + $0xca] sm:$0x1] %vm528_vm2, %v1884_v59 }
 0x88c   : > { %v6471_v1 = vpop.eup %6470 }
 0x88d   : > { %v3800_v7 = vmul.f32 %v6471_v1, %v7730_v17 }
 0x88e   : > { %v1980_v9 = vpop.permute.xlu1 %1979 }
 0x88f   : > { %2015 = vst.msk [vmem:[#allocation3 + $0xcb] sm:$0x1] %vm528_vm2, %v1980_v9  ;;  %6247 = vmatprep.mubr.msk.f32.mxu0 %vm2410_vm3, %v3800_v7 }
 0x890   : > { %6248 = vmatmul.mubr.msk.f32.vlgmr.msra.gmra.mxu0 %vm2410_vm3, %v3801_v16 }
 0x891   : > { %6258 = vmatpush3.xpose.msk.msra.mxu0 %vm2410_vm3, %v7806_v25  ;;  %6261 = vmatprep.mubr.msk.f32.mxu0 %vm2410_vm3, %v7822_v24 }
 0x892   : > { %6259 = vmatprep.subr.msk.mxu0 %vm2410_vm3, %v7826_v45  ;;  %v2076_v42 = vpop.permute.xlu1 %2075 }
 0x893   : > { %2111 = vst.msk [vmem:[#allocation3 + $0xcc] sm:$0x1] %vm528_vm2, %v2076_v42 }
 0x895   : > { %6260 = vmatpush3.xpose.msk.msra.mxu0 %vm2410_vm3, %v7826_v45 }
 0x896   : > { %v2172_v44 = vpop.permute.xlu1 %2171 }
 0x897   : > { %2207 = vst.msk [vmem:[#allocation3 + $0xcd] sm:$0x1] %vm528_vm2, %v2172_v44 }
 0x898   : > { %6262 = vmatmul.mubr.msk.f32.vlgmr.msra.gmra.mxu0 %vm2410_vm3, %v7836_v54 }
 0x89a   : > { %v2364_v20 = vpop.permute.xlu1 %2363 }
 0x89b   : > { %2399 = vst.msk [vmem:[#allocation3 + $0xcf] sm:$0x1] %vm528_vm2, %v2364_v20 }
 0x89e   : > { %v822_v36 = vpop.permute.xlu1 %821 }
 0x89f   : > { %857 = vst.msk [vmem:[#allocation3 + $0xc1] sm:$0x1] %vm528_vm2, %v822_v36 }
 0x8a2   : > { %v918_v34 = vpop.permute.xlu1 %917 }
 0x8a3   : > { %953 = vst.msk [vmem:[#allocation3 + $0xc2] sm:$0x1] %vm528_vm2, %v918_v34 }
 0x8a6   : > { %v1014_v4 = vpop.permute.xlu1 %1013 }
 0x8a7   : > { %1049 = vst.msk [vmem:[#allocation3 + $0xc3] sm:$0x1] %vm528_vm2, %v1014_v4 }
 0x8aa   : > { %v1110_v31 = vpop.permute.xlu1 %1109 }
 0x8ab   : > { %1145 = vst.msk [vmem:[#allocation3 + $0xc4] sm:$0x1] %vm528_vm2, %v1110_v31 }
 0x8ae   : > { %v1206_v17 = vpop.permute.xlu1 %1205 }
 0x8af   : > { %1241 = vst.msk [vmem:[#allocation3 + $0xc5] sm:$0x1] %vm528_vm2, %v1206_v17 }
 0x8b2   : > { %v1398_v38 = vpop.permute.xlu1 %1397 }
 0x8b3   : > { %1433 = vst.msk [vmem:[#allocation3 + $0xc7] sm:$0x1] %vm528_vm2, %v1398_v38 }
 0x8b6   : > { %v1870_v28 = vpop.permute.xlu1 %1869 }
 0x8b7   : > { %1912 = vst.msk [vmem:[#allocation3 + $0x5a] sm:$0x1] %vm528_vm2, %v1870_v28 }
 0x8ba   : > { %v2062_v53 = vpop.permute.xlu1 %2061 }
 0x8bb   : > { %2104 = vst.msk [vmem:[#allocation3 + $0x5c] sm:$0x1] %vm528_vm2, %v2062_v53 }
 0x8be   : > { %v2254_v37 = vpop.permute.xlu1 %2253 }
 0x8bf   : > { %2296 = vst.msk [vmem:[#allocation3 + $0x5e] sm:$0x1] %vm528_vm2, %v2254_v37 }
 0x8c2   : > { %v808_v40 = vpop.permute.xlu1 %807 }
 0x8c3   : > { %850 = vst.msk [vmem:[#allocation3 + $0x51] sm:$0x1] %vm528_vm2, %v808_v40 }
 0x8c6   : > { %v1000_v15 = vpop.permute.xlu1 %999 }
 0x8c7   : > { %1042 = vst.msk [vmem:[#allocation3 + $0x53] sm:$0x1] %vm528_vm2, %v1000_v15 }
 0x8ca   : > { %v1192_v19 = vpop.permute.xlu1 %1191 }
 0x8cb   : > { %1234 = vst.msk [vmem:[#allocation3 + $0x55] sm:$0x1] %vm528_vm2, %v1192_v19 }
 0x905   : > { %v6242_v46 = vpop.f32.mrf.mxu0 }
 0x906   : > { %v3916_v18 = vmul.f32 0.35355338, %v6242_v46 }
 0x907   : > { %v3906_v47 = vpop.f32.mrf.mxu0 }
 0x908   : > { %v3918_v13 = vsel %vm2410_vm3, %v3916_v18, -inf  ;;  %v3915_v58 = vmul.f32 0.35355338, %v3906_v47 }
 0x90a   : > { %v3917_v49 = vsel %vm2410_vm3, %v3915_v58, -inf }
 0x90b   : > { %v3919_v57 = vmax.f32 %v3917_v49, %v3918_v13 }
 0x90d   : > { %v3920_v61 = vrot.slane %v3919_v57, 4 }
 0x90f   : > { %v3921_v29 = vmax.f32 %v3919_v57, %v3920_v61 }
 0x911   : > { %v3922_v14 = vrot.slane %v3921_v29, 2 }
 0x913   : > { %v3923_v11 = vmax.f32 %v3921_v29, %v3922_v14 }
 0x915   : > { %v3924_v63 = vrot.slane %v3923_v11, 1 }
 0x917   : > { %v3925_v26 = vmax.f32 %v3923_v11, %v3924_v63 }
 0x919   : > { %v3926_v30 = vsub.f32 %v3915_v58, %v3925_v26  ;;  %v3927_v22 = vsub.f32 %v3916_v18, %v3925_v26 }
 0x91b   : > { %v3928_v43 = vmul.f32 1.442695, %v3926_v30  ;;  %v3930_v3 = vmul.f32 1.442695, %v3927_v22 }
 0x91d   : > { %6472 = vpow2.f32 %v3928_v43 }
 0x91e   : > { %6474 = vpow2.f32 %v3930_v3 }
 0x92a   : > { %v6473_v48 = vpop.eup %6472 }
 0x92b   : > { %v6475_v59 = vpop.eup %6474  ;;  %v3932_v39 = vsel %vm2410_vm3, %v6473_v48, 0.0 }
 0x92c   : > { %v3933_v1 = vsel %vm2410_vm3, %v6475_v59, 0.0 }
 0x92d   : > { %v3934_v7 = vadd.f32 %v3933_v1, %v3932_v39  ;;  %v7944_v1 = vrot.slane %v7109_v8, %v6740_v41 }
 0x92f   : > { %v3935_v9 = vrot.slane %v3934_v7, 4 }
 0x931   : > { %v3936_v16 = vadd.f32 %v3935_v9, %v3934_v7 }
 0x933   : > { %v3937_v42 = vrot.slane %v3936_v16, 2 }
 0x935   : > { %v3938_v44 = vadd.f32 %v3937_v42, %v3936_v16 }
 0x937   : > { %v3939_v20 = vrot.slane %v3938_v44, 1 }
 0x939   : > { %v3940_v36 = vadd.f32 %v3939_v20, %v3938_v44 }
 0x93b   : > { %6476 = vrcp.f32 %v3940_v36 }
 0x948   : > { %v6477_v34 = vpop.eup %6476 }
 0x949   : > { %v3943_v4 = vmul.f32 %v6477_v34, %v6475_v59  ;;  %v3942_v31 = vmul.f32 %v6477_v34, %v6473_v48  ;;  %v7970_v34 = vrot.slane %v7092_v5, %v6740_v41  ;;  %v7986_v5 = vrot.slane %v6897_v32, %v6740_v41 }
 0x94b   : > { %6250 = vmatprep.subr.mxu1 %v3943_v4 }
 0x94c   : > { %6251 = vmatpush3.msra.mxu1 %v3943_v4 }
 0x94d   : > { %6252 = vmatprep.subr.mxu1 %v3942_v31 }
 0x94e   : > { %6253 = vmatpush3.msra.mxu1 %v3942_v31  ;;  %v7997_v31 = vrot.slane %v6858_v23, %v6740_v41 }
 0x94f   : > { %6264 = vmatprep.subr.mxu1 %v7806_v25 }
 0x950   : > { %v6249_v17 = vpop.f32.mrf.mxu0 }
 0x952   : > { %v4016_v38 = vpop.f32.mrf.mxu0 }
 0x953   : > { %6254 = vmatprep.mubr.msk.f32.mxu1 %vm2410_vm3, %v4016_v38 }
 0x954   : > { %6255 = vmatmul.mubr.msk.f32.vlgmr.msra.gmra.mxu1 %vm2410_vm3, %v6249_v17 }
 0x955   : > { %6265 = vmatpush3.msra.mxu1 %v7806_v25  ;;  %v692_v25 = vrot.slane %v6758_v55, %v6740_v41 }
 0x956   : > { %6266 = vmatprep.subr.mxu1 %v7826_v45 }
 0x957   : > { %6267 = vmatpush3.msra.mxu1 %v7826_v45  ;;  %v7880_v45 = vrot.slane %v6794_v62, %v6740_v41 }
 0x958   : > { %v6263_v28 = vpop.f32.mrf.mxu0 }
 0x959   : > { %v4206_v53 = vmul.f32 0.35355338, %v6263_v28 }
 0x95a   : > { %v4196_v37 = vpop.f32.mrf.mxu0 }
 0x95b   : > { %v4205_v40 = vmul.f32 0.35355338, %v4196_v37  ;;  %v4210_v15 = vsel %vm2410_vm3, %v4206_v53, -inf }
 0x95c   : > { %4211 = vmax.xlane.f32.xlu0 %v4210_v15 }
 0x95d   : > { %v4207_v19 = vsel %vm2410_vm3, %v4205_v40, -inf }
 0x95e   : > { %4208 = vmax.xlane.f32.xlu1 %v4207_v19 }
 0x96f   : > { %1383 = vrot.lane.b32.xlu1 %v7800_v51, %s6605_s19 }
 0x972   : > { %2267 = vrot.lane.b32.xlu0 %v7747_v21, %s6603_s17 }
 0x973   : > { %871 = vrot.lane.b32.xlu1 %v692_v25, %s6599_s13 }
 0x976   : > { %1301 = vrot.lane.b32.xlu0 %v7773_v50, %s6603_s17 }
 0x977   : > { %1063 = vrot.lane.b32.xlu1 %v692_v25, %s6601_s15 }
 0x97a   : > { %1773 = vrot.lane.b32.xlu0 %v7789_v52, %s6600_s14 }
 0x97b   : > { %1255 = vrot.lane.b32.xlu1 %v692_v25, %s6603_s17 }
 0x97e   : > { %1965 = vrot.lane.b32.xlu0 %v7789_v52, %s6602_s16 }
 0x97f   : > { %1677 = vrot.lane.b32.xlu1 %v7880_v45, %s6600_s14 }
 0x982   : > { %2157 = vrot.lane.b32.xlu0 %v7789_v52, %s6604_s18 }
 0x983   : > { %1933 = vrot.lane.b32.xlu1 %v7880_v45, %s6602_s16 }
 0x986   : > { %2349 = vrot.lane.b32.xlu0 %v7789_v52, %s6605_s19 }
 0x987   : > { %2125 = vrot.lane.b32.xlu1 %v7880_v45, %s6604_s18 }
 0x98a   : > { %903 = vrot.lane.b32.xlu0 %v7800_v51, %s6599_s13 }
 0x98e   : > { %1095 = vrot.lane.b32.xlu0 %v7800_v51, %s6601_s15 }
 0x992   : > { %1287 = vrot.lane.b32.xlu0 %v7800_v51, %s6603_s17 }
 0x996   : > { %711 = vrot.lane.b32.xlu0 %v692_v25, %s6600_s14 }
 0x99a   : > { %967 = vrot.lane.b32.xlu0 %v692_v25, %s6602_s16 }
 0x99e   : > { %1159 = vrot.lane.b32.xlu0 %v692_v25, %s6604_s18 }
 0x9a2   : > { %1351 = vrot.lane.b32.xlu0 %v692_v25, %s6605_s19 }
 0x9a6   : > { %1837 = vrot.lane.b32.xlu0 %v7880_v45, %s6599_s13 }
 0x9aa   : > { %2029 = vrot.lane.b32.xlu0 %v7880_v45, %s6601_s15 }
 0x9ae   : > { %2221 = vrot.lane.b32.xlu0 %v7880_v45, %s6603_s17 }
 0x9cc   : > { %4229 = vxpose.xlu0.b32.start [1/2] (short) (narrow) %v7822_v24, 16 }
 0x9d0   : > { %4230 = vxpose.xlu0.b32.end [2/2] (short) (narrow) %v7836_v54, 16 }
 0x9e5   : > { %v4212_v55 = vpop.xlane.xlu0 %4211 }
 0x9e6   : > { %v4214_v62 = vsub.f32 %v4206_v53, %v4212_v55 }
 0x9e7   : > { %v4209_v21 = vpop.xlane.xlu1 %4208 }
 0x9e8   : > { %v4217_v50 = vmul.f32 1.442695, %v4214_v62  ;;  %v4213_v52 = vsub.f32 %v4205_v40, %v4209_v21 }
 0x9e9   : > { %v2268_v51 = vpop.permute.xlu0 %2267 }
 0x9ea   : > { %6478 = vpow2.f32 %v4217_v50  ;;  %v4215_v46 = vmul.f32 1.442695, %v4213_v52  ;;  %2303 = vst.msk [vmem:[#allocation3 + $0xce] sm:$0x1] %vm528_vm2, %v2268_v51 }
 0x9eb   : > { %v1384_v18 = vpop.permute.xlu1 %1383 }
 0x9ec   : > { %6480 = vpow2.f32 %v4215_v46  ;;  %1426 = vst.msk [vmem:[#allocation3 + $0x57] sm:$0x1] %vm528_vm2, %v1384_v18 }
 0x9ed   : > { %v1302_v47 = vpop.permute.xlu0 %1301 }
 0x9ee   : > { %1337 = vst.msk [vmem:[#allocation3 + $0xc6] sm:$0x1] %vm528_vm2, %v1302_v47 }
 0x9ef   : > { %v872_v24 = vpop.permute.xlu1 %871 }
 0x9f0   : > { %890 = vst.msk [vmem:[#allocation2 + $0x52] sm:$0x1] %vm528_vm2, %v872_v24 }
 0x9f1   : > { %v1774_v54 = vpop.permute.xlu0 %1773  ;;  %v7916_v13 = vld [vmem:[#allocation3 + $0xc8] sm:$0xff] }
 0x9f2   : > { %1816 = vst.msk [vmem:[#allocation3 + $0x59] sm:$0x1] %vm528_vm2, %v1774_v54  ;;  %6271 = vmatprep.subr.mxu1 %v7916_v13 }
 0x9f3   : > { %v1064_v58 = vpop.permute.xlu1 %1063 }
 0x9f4   : > { %1082 = vst.msk [vmem:[#allocation2 + $0x54] sm:$0x1] %vm528_vm2, %v1064_v58 }
 0x9f5   : > { %v1966_v49 = vpop.permute.xlu0 %1965  ;;  %v4116_v32 = vld [vmem:[#allocation3 + $0xc0] sm:$0xff] }
 0x9f6   : > { %2008 = vst.msk [vmem:[#allocation3 + $0x5b] sm:$0x1] %vm528_vm2, %v1966_v49 }
 0x9f7   : > { %v7922_v57 = vpop.eup %6478  ;;  %v1256_v61 = vpop.permute.xlu1 %1255 }
 0x9f8   : > { %1274 = vst.msk [vmem:[#allocation2 + $0x56] sm:$0x1] %vm528_vm2, %v1256_v61  ;;  %v4222_v29 = vsel %vm2410_vm3, %v7922_v57, 0.0 }
 0x9f9   : > { %v7927_v14 = vpop.eup %6480  ;;  %v2158_v11 = vpop.permute.xlu0 %2157  ;;  %4223 = vadd.xlane.f32.xlu1 %v4222_v29 }
 0x9fa   : > { %2200 = vst.msk [vmem:[#allocation3 + $0x5d] sm:$0x1] %vm528_vm2, %v2158_v11  ;;  %v4219_v26 = vsel %vm2410_vm3, %v7927_v14, 0.0 }
 0x9fb   : > { %v1678_v63 = vpop.permute.xlu1 %1677 }
 0x9fc   : > { %1696 = vst.msk [vmem:[#allocation2 + $0x59] sm:$0x1] %vm528_vm2, %v1678_v63 }
 0x9fd   : > { %v2350_v30 = vpop.permute.xlu0 %2349  ;;  %4220 = vadd.xlane.f32.xlu1 %v4219_v26 }
 0x9fe   : > { %2392 = vst.msk [vmem:[#allocation3 + $0x5f] sm:$0x1] %vm528_vm2, %v2350_v30 }
 0x9ff   : > { %v1934_v22 = vpop.permute.xlu1 %1933 }
 0xa00   : > { %1952 = vst.msk [vmem:[#allocation2 + $0x5b] sm:$0x1] %vm528_vm2, %v1934_v22 }
 0xa01   : > { %v904_v43 = vpop.permute.xlu0 %903 }
 0xa02   : > { %946 = vst.msk [vmem:[#allocation3 + $0x52] sm:$0x1] %vm528_vm2, %v904_v43 }
 0xa03   : > { %v2126_v3 = vpop.permute.xlu1 %2125 }
 0xa04   : > { %2144 = vst.msk [vmem:[#allocation2 + $0x5d] sm:$0x1] %vm528_vm2, %v2126_v3 }
 0xa05   : > { %v1096_v48 = vpop.permute.xlu0 %1095  ;;  %v8003_v38 = vld [vmem:[#allocation3 + $0x58] sm:$0xff] }
 0xa06   : > { %1138 = vst.msk [vmem:[#allocation3 + $0x54] sm:$0x1] %vm528_vm2, %v1096_v48 }
 0xa09   : > { %v1288_v59 = vpop.permute.xlu0 %1287 }
 0xa0a   : > { %1330 = vst.msk [vmem:[#allocation3 + $0x56] sm:$0x1] %vm528_vm2, %v1288_v59 }
 0xa0d   : > { %v712_v39 = vpop.permute.xlu0 %711 }
 0xa0e   : > { %730 = vst.msk [vmem:[#allocation2 + $0x51] sm:$0x1] %vm528_vm2, %v712_v39  ;;  %2317 = vrot.lane.b32.xlu1 %v7880_v45, %s6605_s19 }
 0xa11   : > { %v968_v7 = vpop.permute.xlu0 %967  ;;  %v8023_v21 = vld [vmem:[#allocation3 + $0x50] sm:$0xff] }
 0xa12   : > { %986 = vst.msk [vmem:[#allocation2 + $0x53] sm:$0x1] %vm528_vm2, %v968_v7  ;;  %1789 = vrot.lane.b32.xlu1 %v7944_v1, %s6600_s14 }
 0xa14   : > { %v6256_v9 = vpop.f32.mrf.mxu1 }
 0xa15   : > { %5961 = vst.msk [vmem:[%s7442_s9 + $0x38] sm:$0xff] %vm2410_vm3, %v6256_v9  ;;  %v1160_v16 = vpop.permute.xlu0 %1159 }
 0xa16   : > { %1178 = vst.msk [vmem:[#allocation2 + $0x55] sm:$0x1] %vm528_vm2, %v1160_v16  ;;  %1885 = vrot.lane.b32.xlu1 %v7944_v1, %s6599_s13  ;;  %v4097_v42 = vpop.f32.mrf.mxu1 }
 0xa17   : > { %5960 = vst.msk [vmem:[%s7442_s9 + $0x30] sm:$0xff] %vm2410_vm3, %v4097_v42 }
 0xa19   : > { %v1352_v8 = vpop.permute.xlu0 %1351 }
 0xa1a   : > { %1370 = vst.msk [vmem:[#allocation2 + $0x57] sm:$0x1] %vm528_vm2, %v1352_v8  ;;  %1981 = vrot.lane.b32.xlu1 %v7944_v1, %s6602_s16 }
 0xa1d   : > { %v1838_v44 = vpop.permute.xlu0 %1837 }
 0xa1e   : > { %1856 = vst.msk [vmem:[#allocation2 + $0x5a] sm:$0x1] %vm528_vm2, %v1838_v44  ;;  %2077 = vrot.lane.b32.xlu1 %v7944_v1, %s6601_s15 }
 0xa21   : > { %v2030_v20 = vpop.permute.xlu0 %2029  ;;  %v8019_v62 = vld [vmem:[#allocation2 + $0x50] sm:$0xff] }
 0xa22   : > { %2048 = vst.msk [vmem:[#allocation2 + $0x5c] sm:$0x1] %vm528_vm2, %v2030_v20  ;;  %2173 = vrot.lane.b32.xlu1 %v7944_v1, %s6604_s18 }
 0xa25   : > { %v2222_v36 = vpop.permute.xlu0 %2221 }
 0xa26   : > { %2240 = vst.msk [vmem:[#allocation2 + $0x5e] sm:$0x1] %vm528_vm2, %v2222_v36  ;;  %2365 = vrot.lane.b32.xlu1 %v7944_v1, %s6605_s19 }
 0xa2a   : > { %823 = vrot.lane.b32.xlu1 %v7970_v34, %s6600_s14 }
 0xa2e   : > { %919 = vrot.lane.b32.xlu1 %v7970_v34, %s6599_s13 }
 0xa32   : > { %1015 = vrot.lane.b32.xlu1 %v7970_v34, %s6602_s16 }
 0xa36   : > { %1111 = vrot.lane.b32.xlu1 %v7970_v34, %s6601_s15 }
 0xa3a   : > { %1207 = vrot.lane.b32.xlu1 %v7970_v34, %s6604_s18 }
 0xa3e   : > { %1399 = vrot.lane.b32.xlu1 %v7970_v34, %s6605_s19 }
 0xa42   : > { %1871 = vrot.lane.b32.xlu1 %v7986_v5, %s6599_s13 }
 0xa46   : > { %2063 = vrot.lane.b32.xlu1 %v7986_v5, %s6601_s15 }
 0xa48   : > { %v4245_v4 = vpop.trf.xlu0 }
 0xa49   : > { %6268 = vmatprep.mubr.msk.f32.mxu1 %vm2410_vm3, %v4245_v4 }
 0xa4a   : > { %2255 = vrot.lane.b32.xlu1 %v7986_v5, %s6603_s17 }
 0xa4c   : > { %v4246_v17 = vpop.trf.xlu0 }
 0xa4d   : > { %6269 = vmatmul.mubr.msk.f32.vlgmr.msra.gmra.mxu1 %vm2410_vm3, %v4246_v17 }
 0xa4e   : > { %6272 = vmatpush3.msra.mxu1 %v7916_v13  ;;  %809 = vrot.lane.b32.xlu1 %v7997_v31, %s6600_s14 }
 0xa4f   : > { %6273 = vmatprep.subr.mxu1 %v4116_v32 }
 0xa50   : > { %6274 = vmatpush3.msra.mxu1 %v4116_v32 }
 0xa51   : > { %6285 = vmatprep.subr.msk.mxu1 %vm2410_vm3, %v8003_v38 }
 0xa52   : > { %1001 = vrot.lane.b32.xlu1 %v7997_v31, %s6602_s16 }
 0xa56   : > { %1193 = vrot.lane.b32.xlu1 %v7997_v31, %s6604_s18 }
 0xa82   : > { %v4224_v23 = vpop.xlane.xlu1 %4223 }
 0xa83   : > { %6482 = vrcp.f32 %v4224_v23 }
 0xa86   : > { %v4221_v28 = vpop.xlane.xlu1 %4220 }
 0xa87   : > { %6484 = vrcp.f32 %v4221_v28 }
 0xa8a   : > { %v2318_v53 = vpop.permute.xlu1 %2317 }
 0xa8b   : > { %2336 = vst.msk [vmem:[#allocation2 + $0x5f] sm:$0x1] %vm528_vm2, %v2318_v53 }
 0xa8e   : > { %v1790_v37 = vpop.permute.xlu1 %1789 }
 0xa8f   : > { %1824 = vst.msk [vmem:[#allocation3 + $0xd9] sm:$0x1] %vm528_vm2, %v1790_v37 }
 0xa90   : > { %v6483_v15 = vpop.eup %6482 }
 0xa91   : > { %v4228_v55 = vmul.f32 %v6483_v15, %v7922_v57 }
 0xa92   : > { %v1886_v40 = vpop.permute.xlu1 %1885  ;;  %v8033_v51 = vld [vmem:[#allocation2 + $0x58] sm:$0xff] }
 0xa93   : > { %1920 = vst.msk [vmem:[#allocation3 + $0xda] sm:$0x1] %vm528_vm2, %v1886_v40 }
 0xa94   : > { %v6485_v19 = vpop.eup %6484 }
 0xa95   : > { %v4227_v25 = vmul.f32 %v6485_v19, %v7927_v14 }
 0xa96   : > { %v1982_v45 = vpop.permute.xlu1 %1981 }
 0xa97   : > { %2016 = vst.msk [vmem:[#allocation3 + $0xdb] sm:$0x1] %vm528_vm2, %v1982_v45  ;;  %6275 = vmatprep.mubr.msk.f32.mxu1 %vm2410_vm3, %v4227_v25 }
 0xa98   : > { %6276 = vmatmul.mubr.msk.f32.vlgmr.msra.gmra.mxu1 %vm2410_vm3, %v4228_v55 }
 0xa99   : > { %6286 = vmatpush3.xpose.msk.msra.mxu1 %vm2410_vm3, %v8003_v38  ;;  %6289 = vmatprep.mubr.msk.f32.mxu1 %vm2410_vm3, %v8019_v62 }
 0xa9a   : > { %6287 = vmatprep.subr.msk.mxu1 %vm2410_vm3, %v8023_v21  ;;  %v2078_v50 = vpop.permute.xlu1 %2077 }
 0xa9b   : > { %2112 = vst.msk [vmem:[#allocation3 + $0xdc] sm:$0x1] %vm528_vm2, %v2078_v50 }
 0xa9d   : > { %6288 = vmatpush3.xpose.msk.msra.mxu1 %vm2410_vm3, %v8023_v21 }
 0xa9e   : > { %v2174_v52 = vpop.permute.xlu1 %2173 }
 0xa9f   : > { %2208 = vst.msk [vmem:[#allocation3 + $0xdd] sm:$0x1] %vm528_vm2, %v2174_v52 }
 0xaa0   : > { %6290 = vmatmul.mubr.msk.f32.vlgmr.msra.gmra.mxu1 %vm2410_vm3, %v8033_v51 }
 0xaa2   : > { %v2366_v46 = vpop.permute.xlu1 %2365 }
 0xaa3   : > { %2400 = vst.msk [vmem:[#allocation3 + $0xdf] sm:$0x1] %vm528_vm2, %v2366_v46 }
 0xaa6   : > { %v824_v18 = vpop.permute.xlu1 %823 }
 0xaa7   : > { %858 = vst.msk [vmem:[#allocation3 + $0xd1] sm:$0x1] %vm528_vm2, %v824_v18 }
 0xaaa   : > { %v920_v47 = vpop.permute.xlu1 %919 }
 0xaab   : > { %954 = vst.msk [vmem:[#allocation3 + $0xd2] sm:$0x1] %vm528_vm2, %v920_v47 }
 0xaae   : > { %v1016_v24 = vpop.permute.xlu1 %1015 }
 0xaaf   : > { %1050 = vst.msk [vmem:[#allocation3 + $0xd3] sm:$0x1] %vm528_vm2, %v1016_v24 }
 0xab2   : > { %v1112_v54 = vpop.permute.xlu1 %1111 }
 0xab3   : > { %1146 = vst.msk [vmem:[#allocation3 + $0xd4] sm:$0x1] %vm528_vm2, %v1112_v54 }
 0xab6   : > { %v1208_v13 = vpop.permute.xlu1 %1207 }
 0xab7   : > { %1242 = vst.msk [vmem:[#allocation3 + $0xd5] sm:$0x1] %vm528_vm2, %v1208_v13 }
 0xaba   : > { %v1400_v58 = vpop.permute.xlu1 %1399 }
 0xabb   : > { %1434 = vst.msk [vmem:[#allocation3 + $0xd7] sm:$0x1] %vm528_vm2, %v1400_v58 }
 0xabe   : > { %v1872_v49 = vpop.permute.xlu1 %1871 }
 0xabf   : > { %1913 = vst.msk [vmem:[#allocation3 + $0x6a] sm:$0x1] %vm528_vm2, %v1872_v49 }
 0xac2   : > { %v2064_v57 = vpop.permute.xlu1 %2063 }
 0xac3   : > { %2105 = vst.msk [vmem:[#allocation3 + $0x6c] sm:$0x1] %vm528_vm2, %v2064_v57 }
 0xac6   : > { %v2256_v61 = vpop.permute.xlu1 %2255 }
 0xac7   : > { %2297 = vst.msk [vmem:[#allocation3 + $0x6e] sm:$0x1] %vm528_vm2, %v2256_v61 }
 0xaca   : > { %v810_v29 = vpop.permute.xlu1 %809 }
 0xacb   : > { %851 = vst.msk [vmem:[#allocation3 + $0x61] sm:$0x1] %vm528_vm2, %v810_v29 }
 0xace   : > { %v1002_v14 = vpop.permute.xlu1 %1001 }
 0xacf   : > { %1043 = vst.msk [vmem:[#allocation3 + $0x63] sm:$0x1] %vm528_vm2, %v1002_v14 }
 0xad2   : > { %v1194_v11 = vpop.permute.xlu1 %1193 }
 0xad3   : > { %1235 = vst.msk [vmem:[#allocation3 + $0x65] sm:$0x1] %vm528_vm2, %v1194_v11 }
 0xb0d   : > { %v6270_v63 = vpop.f32.mrf.mxu1 }
 0xb0e   : > { %v4343_v26 = vmul.f32 0.35355338, %v6270_v63 }
 0xb0f   : > { %v4333_v30 = vpop.f32.mrf.mxu1 }
 0xb10   : > { %v4345_v22 = vsel %vm2410_vm3, %v4343_v26, -inf  ;;  %v4342_v43 = vmul.f32 0.35355338, %v4333_v30 }
 0xb12   : > { %v4344_v3 = vsel %vm2410_vm3, %v4342_v43, -inf }
 0xb13   : > { %v4346_v48 = vmax.f32 %v4344_v3, %v4345_v22 }
 0xb15   : > { %v4347_v59 = vrot.slane %v4346_v48, 4 }
 0xb17   : > { %v4348_v39 = vmax.f32 %v4346_v48, %v4347_v59 }
 0xb19   : > { %v4349_v7 = vrot.slane %v4348_v39, 2 }
 0xb1b   : > { %v4350_v9 = vmax.f32 %v4348_v39, %v4349_v7 }
 0xb1d   : > { %v4351_v16 = vrot.slane %v4350_v9, 1 }
 0xb1f   : > { %v4352_v42 = vmax.f32 %v4350_v9, %v4351_v16 }
 0xb21   : > { %v4353_v8 = vsub.f32 %v4342_v43, %v4352_v42  ;;  %v4354_v44 = vsub.f32 %v4343_v26, %v4352_v42 }
 0xb23   : > { %v4355_v20 = vmul.f32 1.442695, %v4353_v8  ;;  %v4357_v36 = vmul.f32 1.442695, %v4354_v44  ;;  %v8141_v44 = vrot.slane %v7129_v33, %v6740_v41 }
 0xb25   : > { %6486 = vpow2.f32 %v4355_v20 }
 0xb26   : > { %6488 = vpow2.f32 %v4357_v36 }
 0xb32   : > { %v6487_v4 = vpop.eup %6486 }
 0xb33   : > { %v6489_v17 = vpop.eup %6488  ;;  %v4359_v32 = vsel %vm2410_vm3, %v6487_v4, 0.0 }
 0xb34   : > { %v4360_v23 = vsel %vm2410_vm3, %v6489_v17, 0.0 }
 0xb35   : > { %v4361_v28 = vadd.f32 %v4360_v23, %v4359_v32 }
 0xb37   : > { %v4362_v53 = vrot.slane %v4361_v28, 4 }
 0xb39   : > { %v4363_v37 = vadd.f32 %v4362_v53, %v4361_v28  ;;  %v8167_v53 = vrot.slane %v7096_v6, %v6740_v41  ;;  %v8183_v6 = vrot.slane %v6908_v35, %v6740_v41 }
 0xb3b   : > { %v4364_v40 = vrot.slane %v4363_v37, 2 }
 0xb3d   : > { %v4365_v15 = vadd.f32 %v4364_v40, %v4363_v37  ;;  %v8194_v40 = vrot.slane %v6880_v27, %v6740_v41 }
 0xb3f   : > { %v4366_v19 = vrot.slane %v4365_v15, 1 }
 0xb41   : > { %v4367_v25 = vadd.f32 %v4366_v19, %v4365_v15 }
 0xb43   : > { %6490 = vrcp.f32 %v4367_v25 }
 0xb50   : > { %v6491_v45 = vpop.eup %6490 }
 0xb51   : > { %v4370_v55 = vmul.f32 %v6491_v45, %v6489_v17  ;;  %v4369_v50 = vmul.f32 %v6491_v45, %v6487_v4 }
 0xb53   : > { %6278 = vmatprep.subr.mxu0 %v4370_v55 }
 0xb54   : > { %6279 = vmatpush3.msra.mxu0 %v4370_v55 }
 0xb55   : > { %6280 = vmatprep.subr.mxu0 %v4369_v50 }
 0xb56   : > { %6281 = vmatpush3.msra.mxu0 %v4369_v50 }
 0xb57   : > { %6292 = vmatprep.subr.mxu0 %v8003_v38 }
 0xb58   : > { %v6277_v52 = vpop.f32.mrf.mxu1 }
 0xb5a   : > { %v4443_v46 = vpop.f32.mrf.mxu1 }
 0xb5b   : > { %6282 = vmatprep.mubr.msk.f32.mxu0 %vm2410_vm3, %v4443_v46 }
 0xb5c   : > { %6283 = vmatmul.mubr.msk.f32.vlgmr.msra.gmra.mxu0 %vm2410_vm3, %v6277_v52 }
 0xb5d   : > { %6293 = vmatpush3.msra.mxu0 %v8003_v38  ;;  %v696_v38 = vrot.slane %v6762_v56, %v6740_v41 }
 0xb5e   : > { %6294 = vmatprep.subr.mxu0 %v8023_v21 }
 0xb5f   : > { %6295 = vmatpush3.msra.mxu0 %v8023_v21  ;;  %v8077_v21 = vrot.slane %v6800_v0, %v6740_v41 }
 0xb60   : > { %v6291_v18 = vpop.f32.mrf.mxu1 }
 0xb61   : > { %v4633_v47 = vmul.f32 0.35355338, %v6291_v18 }
 0xb62   : > { %v4623_v24 = vpop.f32.mrf.mxu1 }
 0xb63   : > { %v4632_v54 = vmul.f32 0.35355338, %v4623_v24  ;;  %v4637_v13 = vsel %vm2410_vm3, %v4633_v47, -inf }
 0xb64   : > { %4638 = vmax.xlane.f32.xlu0 %v4637_v13 }
 0xb65   : > { %v4634_v58 = vsel %vm2410_vm3, %v4632_v54, -inf }
 0xb66   : > { %4635 = vmax.xlane.f32.xlu1 %v4634_v58 }
 0xb77   : > { %1385 = vrot.lane.b32.xlu1 %v7997_v31, %s6605_s19 }
 0xb7a   : > { %2269 = vrot.lane.b32.xlu0 %v7944_v1, %s6603_s17 }
 0xb7b   : > { %873 = vrot.lane.b32.xlu1 %v696_v38, %s6599_s13 }
 0xb7e   : > { %1303 = vrot.lane.b32.xlu0 %v7970_v34, %s6603_s17 }
 0xb7f   : > { %1065 = vrot.lane.b32.xlu1 %v696_v38, %s6601_s15 }
 0xb82   : > { %1775 = vrot.lane.b32.xlu0 %v7986_v5, %s6600_s14 }
 0xb83   : > { %1257 = vrot.lane.b32.xlu1 %v696_v38, %s6603_s17 }
 0xb86   : > { %1967 = vrot.lane.b32.xlu0 %v7986_v5, %s6602_s16 }
 0xb87   : > { %1679 = vrot.lane.b32.xlu1 %v8077_v21, %s6600_s14 }
 0xb8a   : > { %2159 = vrot.lane.b32.xlu0 %v7986_v5, %s6604_s18 }
 0xb8b   : > { %1935 = vrot.lane.b32.xlu1 %v8077_v21, %s6602_s16 }
 0xb8e   : > { %2351 = vrot.lane.b32.xlu0 %v7986_v5, %s6605_s19 }
 0xb8f   : > { %2127 = vrot.lane.b32.xlu1 %v8077_v21, %s6604_s18 }
 0xb92   : > { %905 = vrot.lane.b32.xlu0 %v7997_v31, %s6599_s13 }
 0xb96   : > { %1097 = vrot.lane.b32.xlu0 %v7997_v31, %s6601_s15 }
 0xb9a   : > { %1289 = vrot.lane.b32.xlu0 %v7997_v31, %s6603_s17 }
 0xb9e   : > { %713 = vrot.lane.b32.xlu0 %v696_v38, %s6600_s14 }
 0xba2   : > { %969 = vrot.lane.b32.xlu0 %v696_v38, %s6602_s16 }
 0xba6   : > { %1161 = vrot.lane.b32.xlu0 %v696_v38, %s6604_s18 }
 0xbaa   : > { %1353 = vrot.lane.b32.xlu0 %v696_v38, %s6605_s19 }
 0xbae   : > { %1839 = vrot.lane.b32.xlu0 %v8077_v21, %s6599_s13 }
 0xbb2   : > { %2031 = vrot.lane.b32.xlu0 %v8077_v21, %s6601_s15 }
 0xbb6   : > { %2223 = vrot.lane.b32.xlu0 %v8077_v21, %s6603_s17 }
 0xbd4   : > { %4656 = vxpose.xlu0.b32.start [1/2] (short) (narrow) %v8019_v62, 16 }
 0xbd8   : > { %4657 = vxpose.xlu0.b32.end [2/2] (short) (narrow) %v8033_v51, 16 }
 0xbed   : > { %v4639_v56 = vpop.xlane.xlu0 %4638 }
 0xbee   : > { %v4641_v0 = vsub.f32 %v4633_v47, %v4639_v56 }
 0xbef   : > { %v4636_v1 = vpop.xlane.xlu1 %4635 }
 0xbf0   : > { %v4644_v34 = vmul.f32 1.442695, %v4641_v0  ;;  %v4640_v5 = vsub.f32 %v4632_v54, %v4636_v1 }
 0xbf1   : > { %v2270_v31 = vpop.permute.xlu0 %2269 }
 0xbf2   : > { %6492 = vpow2.f32 %v4644_v34  ;;  %v4642_v49 = vmul.f32 1.442695, %v4640_v5  ;;  %2304 = vst.msk [vmem:[#allocation3 + $0xde] sm:$0x1] %vm528_vm2, %v2270_v31 }
 0xbf3   : > { %v1386_v57 = vpop.permute.xlu1 %1385 }
 0xbf4   : > { %6494 = vpow2.f32 %v4642_v49  ;;  %1427 = vst.msk [vmem:[#allocation3 + $0x67] sm:$0x1] %vm528_vm2, %v1386_v57 }
 0xbf5   : > { %v1304_v61 = vpop.permute.xlu0 %1303 }
 0xbf6   : > { %1338 = vst.msk [vmem:[#allocation3 + $0xd6] sm:$0x1] %vm528_vm2, %v1304_v61 }
 0xbf7   : > { %v874_v62 = vpop.permute.xlu1 %873 }
 0xbf8   : > { %891 = vst.msk [vmem:[#allocation2 + $0x62] sm:$0x1] %vm528_vm2, %v874_v62 }
 0xbf9   : > { %v1776_v51 = vpop.permute.xlu0 %1775  ;;  %v8113_v29 = vld [vmem:[#allocation3 + $0xd8] sm:$0xff] }
 0xbfa   : > { %1817 = vst.msk [vmem:[#allocation3 + $0x69] sm:$0x1] %vm528_vm2, %v1776_v51  ;;  %6299 = vmatprep.subr.mxu0 %v8113_v29 }
 0xbfb   : > { %v1066_v14 = vpop.permute.xlu1 %1065 }
 0xbfc   : > { %1083 = vst.msk [vmem:[#allocation2 + $0x64] sm:$0x1] %vm528_vm2, %v1066_v14 }
 0xbfd   : > { %v1968_v11 = vpop.permute.xlu0 %1967  ;;  %v4543_v35 = vld [vmem:[#allocation3 + $0xd0] sm:$0xff] }
 0xbfe   : > { %2009 = vst.msk [vmem:[#allocation3 + $0x6b] sm:$0x1] %vm528_vm2, %v1968_v11 }
 0xbff   : > { %v8119_v63 = vpop.eup %6492  ;;  %v1258_v26 = vpop.permute.xlu1 %1257 }
 0xc00   : > { %1275 = vst.msk [vmem:[#allocation2 + $0x66] sm:$0x1] %vm528_vm2, %v1258_v26  ;;  %v4649_v30 = vsel %vm2410_vm3, %v8119_v63, 0.0 }
 0xc01   : > { %v8124_v22 = vpop.eup %6494  ;;  %v2160_v43 = vpop.permute.xlu0 %2159  ;;  %4650 = vadd.xlane.f32.xlu1 %v4649_v30 }
 0xc02   : > { %2201 = vst.msk [vmem:[#allocation3 + $0x6d] sm:$0x1] %vm528_vm2, %v2160_v43  ;;  %v4646_v48 = vsel %vm2410_vm3, %v8124_v22, 0.0 }
 0xc03   : > { %v1680_v3 = vpop.permute.xlu1 %1679 }
 0xc04   : > { %1697 = vst.msk [vmem:[#allocation2 + $0x69] sm:$0x1] %vm528_vm2, %v1680_v3 }
 0xc05   : > { %v2352_v59 = vpop.permute.xlu0 %2351  ;;  %4647 = vadd.xlane.f32.xlu1 %v4646_v48 }
 0xc06   : > { %2393 = vst.msk [vmem:[#allocation3 + $0x6f] sm:$0x1] %vm528_vm2, %v2352_v59 }
 0xc07   : > { %v1936_v39 = vpop.permute.xlu1 %1935 }
 0xc08   : > { %1953 = vst.msk [vmem:[#allocation2 + $0x6b] sm:$0x1] %vm528_vm2, %v1936_v39 }
 0xc09   : > { %v906_v7 = vpop.permute.xlu0 %905 }
 0xc0a   : > { %947 = vst.msk [vmem:[#allocation3 + $0x62] sm:$0x1] %vm528_vm2, %v906_v7 }
 0xc0b   : > { %v2128_v9 = vpop.permute.xlu1 %2127 }
 0xc0c   : > { %2145 = vst.msk [vmem:[#allocation2 + $0x6d] sm:$0x1] %vm528_vm2, %v2128_v9 }
 0xc0d   : > { %v1098_v16 = vpop.permute.xlu0 %1097  ;;  %v8200_v19 = vld [vmem:[#allocation3 + $0x68] sm:$0xff] }
 0xc0e   : > { %1139 = vst.msk [vmem:[#allocation3 + $0x64] sm:$0x1] %vm528_vm2, %v1098_v16 }
 0xc11   : > { %v1290_v42 = vpop.permute.xlu0 %1289 }
 0xc12   : > { %1331 = vst.msk [vmem:[#allocation3 + $0x66] sm:$0x1] %vm528_vm2, %v1290_v42 }
 0xc15   : > { %v714_v8 = vpop.permute.xlu0 %713 }
 0xc16   : > { %731 = vst.msk [vmem:[#allocation2 + $0x61] sm:$0x1] %vm528_vm2, %v714_v8  ;;  %2319 = vrot.lane.b32.xlu1 %v8077_v21, %s6605_s19 }
 0xc19   : > { %v970_v20 = vpop.permute.xlu0 %969  ;;  %v8220_v13 = vld [vmem:[#allocation3 + $0x60] sm:$0xff] }
 0xc1a   : > { %987 = vst.msk [vmem:[#allocation2 + $0x63] sm:$0x1] %vm528_vm2, %v970_v20  ;;  %1791 = vrot.lane.b32.xlu1 %v8141_v44, %s6600_s14 }
 0xc1c   : > { %v6284_v36 = vpop.f32.mrf.mxu0 }
 0xc1d   : > { %5973 = vst.msk [vmem:[%s7442_s9 + $0x48] sm:$0xff] %vm2410_vm3, %v6284_v36  ;;  %v1162_v4 = vpop.permute.xlu0 %1161 }
 0xc1e   : > { %1179 = vst.msk [vmem:[#allocation2 + $0x65] sm:$0x1] %vm528_vm2, %v1162_v4  ;;  %1887 = vrot.lane.b32.xlu1 %v8141_v44, %s6599_s13  ;;  %v4524_v17 = vpop.f32.mrf.mxu0 }
 0xc1f   : > { %5972 = vst.msk [vmem:[%s7442_s9 + $0x40] sm:$0xff] %vm2410_vm3, %v4524_v17 }
 0xc21   : > { %v1354_v33 = vpop.permute.xlu0 %1353 }
 0xc22   : > { %1371 = vst.msk [vmem:[#allocation2 + $0x67] sm:$0x1] %vm528_vm2, %v1354_v33  ;;  %1983 = vrot.lane.b32.xlu1 %v8141_v44, %s6602_s16 }
 0xc25   : > { %v1840_v32 = vpop.permute.xlu0 %1839 }
 0xc26   : > { %1857 = vst.msk [vmem:[#allocation2 + $0x6a] sm:$0x1] %vm528_vm2, %v1840_v32  ;;  %2079 = vrot.lane.b32.xlu1 %v8141_v44, %s6601_s15 }
 0xc29   : > { %v2032_v23 = vpop.permute.xlu0 %2031  ;;  %v8216_v54 = vld [vmem:[#allocation2 + $0x60] sm:$0xff] }
 0xc2a   : > { %2049 = vst.msk [vmem:[#allocation2 + $0x6c] sm:$0x1] %vm528_vm2, %v2032_v23  ;;  %2175 = vrot.lane.b32.xlu1 %v8141_v44, %s6604_s18 }
 0xc2d   : > { %v2224_v28 = vpop.permute.xlu0 %2223 }
 0xc2e   : > { %2241 = vst.msk [vmem:[#allocation2 + $0x6e] sm:$0x1] %vm528_vm2, %v2224_v28  ;;  %2367 = vrot.lane.b32.xlu1 %v8141_v44, %s6605_s19 }
 0xc32   : > { %825 = vrot.lane.b32.xlu1 %v8167_v53, %s6600_s14 }
 0xc36   : > { %921 = vrot.lane.b32.xlu1 %v8167_v53, %s6599_s13 }
 0xc3a   : > { %1017 = vrot.lane.b32.xlu1 %v8167_v53, %s6602_s16 }
 0xc3e   : > { %1113 = vrot.lane.b32.xlu1 %v8167_v53, %s6601_s15 }
 0xc42   : > { %1209 = vrot.lane.b32.xlu1 %v8167_v53, %s6604_s18 }
 0xc46   : > { %1401 = vrot.lane.b32.xlu1 %v8167_v53, %s6605_s19 }
 0xc4a   : > { %1873 = vrot.lane.b32.xlu1 %v8183_v6, %s6599_s13 }
 0xc4e   : > { %2065 = vrot.lane.b32.xlu1 %v8183_v6, %s6601_s15 }
 0xc50   : > { %v4672_v37 = vpop.trf.xlu0 }
 0xc51   : > { %6296 = vmatprep.mubr.msk.f32.mxu0 %vm2410_vm3, %v4672_v37 }
 0xc52   : > { %2257 = vrot.lane.b32.xlu1 %v8183_v6, %s6603_s17 }
 0xc54   : > { %v4673_v15 = vpop.trf.xlu0 }
 0xc55   : > { %6297 = vmatmul.mubr.msk.f32.vlgmr.msra.gmra.mxu0 %vm2410_vm3, %v4673_v15 }
 0xc56   : > { %6300 = vmatpush3.msra.mxu0 %v8113_v29  ;;  %811 = vrot.lane.b32.xlu1 %v8194_v40, %s6600_s14 }
 0xc57   : > { %6301 = vmatprep.subr.mxu0 %v4543_v35 }
 0xc58   : > { %6302 = vmatpush3.msra.mxu0 %v4543_v35 }
 0xc59   : > { %6313 = vmatprep.subr.msk.mxu0 %vm2410_vm3, %v8200_v19 }
 0xc5a   : > { %1003 = vrot.lane.b32.xlu1 %v8194_v40, %s6602_s16 }
 0xc5e   : > { %1195 = vrot.lane.b32.xlu1 %v8194_v40, %s6604_s18 }
 0xc8a   : > { %v4651_v27 = vpop.xlane.xlu1 %4650 }
 0xc8b   : > { %6496 = vrcp.f32 %v4651_v27 }
 0xc8e   : > { %v4648_v25 = vpop.xlane.xlu1 %4647 }
 0xc8f   : > { %6498 = vrcp.f32 %v4648_v25 }
 0xc92   : > { %v2320_v45 = vpop.permute.xlu1 %2319 }
 0xc93   : > { %2337 = vst.msk [vmem:[#allocation2 + $0x6f] sm:$0x1] %vm528_vm2, %v2320_v45 }
 0xc96   : > { %v1792_v55 = vpop.permute.xlu1 %1791 }
 0xc97   : > { %1825 = vst.msk [vmem:[#allocation3 + $0xe9] sm:$0x1] %vm528_vm2, %v1792_v55 }
 0xc98   : > { %v6497_v52 = vpop.eup %6496 }
 0xc99   : > { %v4655_v24 = vmul.f32 %v6497_v52, %v8119_v63 }
 0xc9a   : > { %v1888_v50 = vpop.permute.xlu1 %1887  ;;  %v8230_v21 = vld [vmem:[#allocation2 + $0x68] sm:$0xff] }
 0xc9b   : > { %1921 = vst.msk [vmem:[#allocation3 + $0xea] sm:$0x1] %vm528_vm2, %v1888_v50 }
 0xc9c   : > { %v6499_v46 = vpop.eup %6498 }
 0xc9d   : > { %v4654_v18 = vmul.f32 %v6499_v46, %v8124_v22 }
 0xc9e   : > { %v1984_v47 = vpop.permute.xlu1 %1983 }
 0xc9f   : > { %2017 = vst.msk [vmem:[#allocation3 + $0xeb] sm:$0x1] %vm528_vm2, %v1984_v47  ;;  %6303 = vmatprep.mubr.msk.f32.mxu0 %vm2410_vm3, %v4654_v18 }
 0xca0   : > { %6304 = vmatmul.mubr.msk.f32.vlgmr.msra.gmra.mxu0 %vm2410_vm3, %v4655_v24 }
 0xca1   : > { %6314 = vmatpush3.xpose.msk.msra.mxu0 %vm2410_vm3, %v8200_v19  ;;  %6317 = vmatprep.mubr.msk.f32.mxu0 %vm2410_vm3, %v8216_v54 }
 0xca2   : > { %6315 = vmatprep.subr.msk.mxu0 %vm2410_vm3, %v8220_v13  ;;  %v2080_v58 = vpop.permute.xlu1 %2079 }
 0xca3   : > { %2113 = vst.msk [vmem:[#allocation3 + $0xec] sm:$0x1] %vm528_vm2, %v2080_v58 }
 0xca5   : > { %6316 = vmatpush3.xpose.msk.msra.mxu0 %vm2410_vm3, %v8220_v13 }
 0xca6   : > { %v2176_v38 = vpop.permute.xlu1 %2175 }
 0xca7   : > { %2209 = vst.msk [vmem:[#allocation3 + $0xed] sm:$0x1] %vm528_vm2, %v2176_v38 }
 0xca8   : > { %6318 = vmatmul.mubr.msk.f32.vlgmr.msra.gmra.mxu0 %vm2410_vm3, %v8230_v21 }
 0xcaa   : > { %v2368_v56 = vpop.permute.xlu1 %2367 }
 0xcab   : > { %2401 = vst.msk [vmem:[#allocation3 + $0xef] sm:$0x1] %vm528_vm2, %v2368_v56 }
 0xcae   : > { %v826_v0 = vpop.permute.xlu1 %825 }
 0xcaf   : > { %859 = vst.msk [vmem:[#allocation3 + $0xe1] sm:$0x1] %vm528_vm2, %v826_v0 }
 0xcb2   : > { %v922_v1 = vpop.permute.xlu1 %921 }
 0xcb3   : > { %955 = vst.msk [vmem:[#allocation3 + $0xe2] sm:$0x1] %vm528_vm2, %v922_v1 }
 0xcb6   : > { %v1018_v34 = vpop.permute.xlu1 %1017 }
 0xcb7   : > { %1051 = vst.msk [vmem:[#allocation3 + $0xe3] sm:$0x1] %vm528_vm2, %v1018_v34 }
 0xcba   : > { %v1114_v5 = vpop.permute.xlu1 %1113 }
 0xcbb   : > { %1147 = vst.msk [vmem:[#allocation3 + $0xe4] sm:$0x1] %vm528_vm2, %v1114_v5 }
 0xcbe   : > { %v1210_v31 = vpop.permute.xlu1 %1209 }
 0xcbf   : > { %1243 = vst.msk [vmem:[#allocation3 + $0xe5] sm:$0x1] %vm528_vm2, %v1210_v31 }
 0xcc2   : > { %v1402_v49 = vpop.permute.xlu1 %1401 }
 0xcc3   : > { %1435 = vst.msk [vmem:[#allocation3 + $0xe7] sm:$0x1] %vm528_vm2, %v1402_v49 }
 0xcc6   : > { %v1874_v57 = vpop.permute.xlu1 %1873 }
 0xcc7   : > { %1914 = vst.msk [vmem:[#allocation3 + $0x7a] sm:$0x1] %vm528_vm2, %v1874_v57 }
 0xcca   : > { %v2066_v61 = vpop.permute.xlu1 %2065 }
 0xccb   : > { %2106 = vst.msk [vmem:[#allocation3 + $0x7c] sm:$0x1] %vm528_vm2, %v2066_v61 }
 0xcce   : > { %v2258_v62 = vpop.permute.xlu1 %2257 }
 0xccf   : > { %2298 = vst.msk [vmem:[#allocation3 + $0x7e] sm:$0x1] %vm528_vm2, %v2258_v62 }
 0xcd2   : > { %v812_v51 = vpop.permute.xlu1 %811 }
 0xcd3   : > { %852 = vst.msk [vmem:[#allocation3 + $0x71] sm:$0x1] %vm528_vm2, %v812_v51 }
 0xcd6   : > { %v1004_v29 = vpop.permute.xlu1 %1003 }
 0xcd7   : > { %1044 = vst.msk [vmem:[#allocation3 + $0x73] sm:$0x1] %vm528_vm2, %v1004_v29 }
 0xcda   : > { %v1196_v14 = vpop.permute.xlu1 %1195 }
 0xcdb   : > { %1236 = vst.msk [vmem:[#allocation3 + $0x75] sm:$0x1] %vm528_vm2, %v1196_v14 }
 0xd15   : > { %v6298_v11 = vpop.f32.mrf.mxu0 }
 0xd16   : > { %v4770_v63 = vmul.f32 0.35355338, %v6298_v11 }
 0xd17   : > { %v4760_v26 = vpop.f32.mrf.mxu0 }
 0xd18   : > { %v4772_v30 = vsel %vm2410_vm3, %v4770_v63, -inf  ;;  %v4769_v22 = vmul.f32 0.35355338, %v4760_v26 }
 0xd1a   : > { %v4771_v43 = vsel %vm2410_vm3, %v4769_v22, -inf }
 0xd1b   : > { %v4773_v3 = vmax.f32 %v4771_v43, %v4772_v30 }
 0xd1d   : > { %v4774_v48 = vrot.slane %v4773_v3, 4 }
 0xd1f   : > { %v4775_v59 = vmax.f32 %v4773_v3, %v4774_v48 }
 0xd21   : > { %v4776_v39 = vrot.slane %v4775_v59, 2 }
 0xd23   : > { %v4777_v7 = vmax.f32 %v4775_v59, %v4776_v39 }
 0xd25   : > { %v4778_v9 = vrot.slane %v4777_v7, 1 }
 0xd27   : > { %v4779_v16 = vmax.f32 %v4777_v7, %v4778_v9 }
 0xd29   : > { %v4780_v42 = vsub.f32 %v4769_v22, %v4779_v16  ;;  %v4781_v8 = vsub.f32 %v4770_v63, %v4779_v16 }
 0xd2b   : > { %v4782_v20 = vmul.f32 1.442695, %v4780_v42  ;;  %v4784_v36 = vmul.f32 1.442695, %v4781_v8 }
 0xd2d   : > { %6500 = vpow2.f32 %v4782_v20 }
 0xd2e   : > { %6502 = vpow2.f32 %v4784_v36 }
 0xd3a   : > { %v6501_v4 = vpop.eup %6500 }
 0xd3b   : > { %v6503_v17 = vpop.eup %6502  ;;  %v4786_v33 = vsel %vm2410_vm3, %v6501_v4, 0.0 }
 0xd3c   : > { %v4787_v32 = vsel %vm2410_vm3, %v6503_v17, 0.0 }
 0xd3d   : > { %v4788_v23 = vadd.f32 %v4787_v32, %v4786_v33 }
 0xd3f   : > { %v4789_v28 = vrot.slane %v4788_v23, 4 }
 0xd41   : > { %v4790_v37 = vadd.f32 %v4789_v28, %v4788_v23 }
 0xd43   : > { %v4791_v15 = vrot.slane %v4790_v37, 2 }
 0xd45   : > { %v4792_v35 = vadd.f32 %v4791_v15, %v4790_v37 }
 0xd47   : > { %v4793_v27 = vrot.slane %v4792_v35, 1 }
 0xd49   : > { %v4794_v25 = vadd.f32 %v4793_v27, %v4792_v35 }
 0xd4b   : > { %6504 = vrcp.f32 %v4794_v25 }
 0xd58   : > { %v6505_v45 = vpop.eup %6504 }
 0xd59   : > { %v4797_v55 = vmul.f32 %v6505_v45, %v6503_v17  ;;  %v4796_v50 = vmul.f32 %v6505_v45, %v6501_v4 }
 0xd5b   : > { %6306 = vmatprep.subr.mxu1 %v4797_v55 }
 0xd5c   : > { %6307 = vmatpush3.msra.mxu1 %v4797_v55 }
 0xd5d   : > { %6308 = vmatprep.subr.mxu1 %v4796_v50 }
 0xd5e   : > { %6309 = vmatpush3.msra.mxu1 %v4796_v50 }
 0xd5f   : > { %6320 = vmatprep.subr.mxu1 %v8200_v19 }
 0xd60   : > { %v6305_v52 = vpop.f32.mrf.mxu0 }
 0xd62   : > { %v4870_v46 = vpop.f32.mrf.mxu0 }
 0xd63   : > { %6310 = vmatprep.mubr.msk.f32.mxu1 %vm2410_vm3, %v4870_v46 }
 0xd64   : > { %6311 = vmatmul.mubr.msk.f32.vlgmr.msra.gmra.mxu1 %vm2410_vm3, %v6305_v52 }
 0xd65   : > { %6321 = vmatpush3.msra.mxu1 %v8200_v19  ;;  %v700_v19 = vrot.slane %v6781_v60, %v6740_v41 }
 0xd66   : > { %6322 = vmatprep.subr.mxu1 %v8220_v13 }
 0xd67   : > { %6323 = vmatpush3.msra.mxu1 %v8220_v13  ;;  %v8274_v13 = vrot.slane %v6812_v2, %v6740_v41 }
 0xd68   : > { %v6319_v18 = vpop.f32.mrf.mxu0 }
 0xd69   : > { %v5060_v47 = vmul.f32 0.35355338, %v6319_v18 }
 0xd6a   : > { %v5050_v24 = vpop.f32.mrf.mxu0 }
 0xd6b   : > { %v5059_v58 = vmul.f32 0.35355338, %v5050_v24  ;;  %v5064_v38 = vsel %vm2410_vm3, %v5060_v47, -inf }
 0xd6c   : > { %5065 = vmax.xlane.f32.xlu0 %v5064_v38 }
 0xd6d   : > { %v5061_v56 = vsel %vm2410_vm3, %v5059_v58, -inf }
 0xd6e   : > { %5062 = vmax.xlane.f32.xlu1 %v5061_v56 }
 0xd7f   : > { %1387 = vrot.lane.b32.xlu1 %v8194_v40, %s6605_s19 }
 0xd82   : > { %2271 = vrot.lane.b32.xlu0 %v8141_v44, %s6603_s17 }
 0xd83   : > { %875 = vrot.lane.b32.xlu1 %v700_v19, %s6599_s13 }
 0xd86   : > { %1305 = vrot.lane.b32.xlu0 %v8167_v53, %s6603_s17 }
 0xd87   : > { %1067 = vrot.lane.b32.xlu1 %v700_v19, %s6601_s15 }
 0xd8a   : > { %1777 = vrot.lane.b32.xlu0 %v8183_v6, %s6600_s14 }
 0xd8b   : > { %1259 = vrot.lane.b32.xlu1 %v700_v19, %s6603_s17 }
 0xd8e   : > { %1969 = vrot.lane.b32.xlu0 %v8183_v6, %s6602_s16 }
 0xd8f   : > { %1681 = vrot.lane.b32.xlu1 %v8274_v13, %s6600_s14 }
 0xd92   : > { %2161 = vrot.lane.b32.xlu0 %v8183_v6, %s6604_s18 }
 0xd93   : > { %1937 = vrot.lane.b32.xlu1 %v8274_v13, %s6602_s16 }
 0xd96   : > { %2353 = vrot.lane.b32.xlu0 %v8183_v6, %s6605_s19 }
 0xd97   : > { %2129 = vrot.lane.b32.xlu1 %v8274_v13, %s6604_s18 }
 0xd9a   : > { %907 = vrot.lane.b32.xlu0 %v8194_v40, %s6599_s13 }
 0xd9e   : > { %1099 = vrot.lane.b32.xlu0 %v8194_v40, %s6601_s15 }
 0xda2   : > { %1291 = vrot.lane.b32.xlu0 %v8194_v40, %s6603_s17 }
 0xda6   : > { %715 = vrot.lane.b32.xlu0 %v700_v19, %s6600_s14 }
 0xdaa   : > { %971 = vrot.lane.b32.xlu0 %v700_v19, %s6602_s16 }
 0xdae   : > { %1163 = vrot.lane.b32.xlu0 %v700_v19, %s6604_s18 }
 0xdb2   : > { %1355 = vrot.lane.b32.xlu0 %v700_v19, %s6605_s19 }
 0xdb6   : > { %1841 = vrot.lane.b32.xlu0 %v8274_v13, %s6599_s13 }
 0xdba   : > { %2033 = vrot.lane.b32.xlu0 %v8274_v13, %s6601_s15 }
 0xdbe   : > { %2225 = vrot.lane.b32.xlu0 %v8274_v13, %s6603_s17 }
 0xddc   : > { %5083 = vxpose.xlu0.b32.start [1/2] (short) (narrow) %v8216_v54, 16 }
 0xde0   : > { %5084 = vxpose.xlu0.b32.end [2/2] (short) (narrow) %v8230_v21, 16 }
 0xdf5   : > { %v5066_v60 = vpop.xlane.xlu0 %5065 }
 0xdf6   : > { %v5068_v2 = vsub.f32 %v5060_v47, %v5066_v60 }
 0xdf7   : > { %v5063_v44 = vpop.xlane.xlu1 %5062 }
 0xdf8   : > { %v5071_v53 = vmul.f32 1.442695, %v5068_v2  ;;  %v5067_v6 = vsub.f32 %v5059_v58, %v5063_v44 }
 0xdf9   : > { %v2272_v40 = vpop.permute.xlu0 %2271 }
 0xdfa   : > { %6506 = vpow2.f32 %v5071_v53  ;;  %v5069_v0 = vmul.f32 1.442695, %v5067_v6  ;;  %2305 = vst.msk [vmem:[#allocation3 + $0xee] sm:$0x1] %vm528_vm2, %v2272_v40 }
 0xdfb   : > { %v1388_v1 = vpop.permute.xlu1 %1387 }
 0xdfc   : > { %6508 = vpow2.f32 %v5069_v0  ;;  %1428 = vst.msk [vmem:[#allocation3 + $0x77] sm:$0x1] %vm528_vm2, %v1388_v1 }
 0xdfd   : > { %v1306_v34 = vpop.permute.xlu0 %1305 }
 0xdfe   : > { %1339 = vst.msk [vmem:[#allocation3 + $0xe6] sm:$0x1] %vm528_vm2, %v1306_v34 }
 0xdff   : > { %v876_v54 = vpop.permute.xlu1 %875 }
 0xe00   : > { %892 = vst.msk [vmem:[#allocation2 + $0x72] sm:$0x1] %vm528_vm2, %v876_v54 }
 0xe01   : > { %v1778_v21 = vpop.permute.xlu0 %1777  ;;  %v4971_v5 = vld [vmem:[#allocation3 + $0xe8] sm:$0xff] }
 0xe02   : > { %1818 = vst.msk [vmem:[#allocation3 + $0x79] sm:$0x1] %vm528_vm2, %v1778_v21  ;;  %6327 = vmatprep.subr.mxu1 %v4971_v5 }
 0xe03   : > { %v1068_v31 = vpop.permute.xlu1 %1067 }
 0xe04   : > { %1084 = vst.msk [vmem:[#allocation2 + $0x74] sm:$0x1] %vm528_vm2, %v1068_v31 }
 0xe05   : > { %v1970_v49 = vpop.permute.xlu0 %1969  ;;  %v4970_v17 = vld [vmem:[#allocation3 + $0xe0] sm:$0xff] }
 0xe06   : > { %2010 = vst.msk [vmem:[#allocation3 + $0x7b] sm:$0x1] %vm528_vm2, %v1970_v49 }
 0xe07   : > { %v6507_v57 = vpop.eup %6506  ;;  %v1260_v61 = vpop.permute.xlu1 %1259 }
 0xe08   : > { %1276 = vst.msk [vmem:[#allocation2 + $0x76] sm:$0x1] %vm528_vm2, %v1260_v61  ;;  %v5076_v62 = vsel %vm2410_vm3, %v6507_v57, 0.0 }
 0xe09   : > { %v6509_v51 = vpop.eup %6508  ;;  %v2162_v29 = vpop.permute.xlu0 %2161  ;;  %5077 = vadd.xlane.f32.xlu1 %v5076_v62 }
 0xe0a   : > { %2202 = vst.msk [vmem:[#allocation3 + $0x7d] sm:$0x1] %vm528_vm2, %v2162_v29  ;;  %v5073_v11 = vsel %vm2410_vm3, %v6509_v51, 0.0 }
 0xe0b   : > { %v1682_v14 = vpop.permute.xlu1 %1681 }
 0xe0c   : > { %1698 = vst.msk [vmem:[#allocation2 + $0x79] sm:$0x1] %vm528_vm2, %v1682_v14 }
 0xe0d   : > { %v2354_v63 = vpop.permute.xlu0 %2353  ;;  %5074 = vadd.xlane.f32.xlu1 %v5073_v11 }
 0xe0e   : > { %2394 = vst.msk [vmem:[#allocation3 + $0x7f] sm:$0x1] %vm528_vm2, %v2354_v63 }
 0xe0f   : > { %v1938_v26 = vpop.permute.xlu1 %1937 }
 0xe10   : > { %1954 = vst.msk [vmem:[#allocation2 + $0x7b] sm:$0x1] %vm528_vm2, %v1938_v26 }
 0xe11   : > { %v908_v30 = vpop.permute.xlu0 %907 }
 0xe12   : > { %948 = vst.msk [vmem:[#allocation3 + $0x72] sm:$0x1] %vm528_vm2, %v908_v30 }
 0xe13   : > { %v2130_v22 = vpop.permute.xlu1 %2129 }
 0xe14   : > { %2146 = vst.msk [vmem:[#allocation2 + $0x7d] sm:$0x1] %vm528_vm2, %v2130_v22 }
 0xe15   : > { %v1100_v43 = vpop.permute.xlu0 %1099  ;;  %v8339_v33 = vld [vmem:[#allocation3 + $0x78] sm:$0xff] }
 0xe16   : > { %1140 = vst.msk [vmem:[#allocation3 + $0x74] sm:$0x1] %vm528_vm2, %v1100_v43 }
 0xe19   : > { %v1292_v3 = vpop.permute.xlu0 %1291 }
 0xe1a   : > { %1332 = vst.msk [vmem:[#allocation3 + $0x76] sm:$0x1] %vm528_vm2, %v1292_v3 }
 0xe1d   : > { %v716_v48 = vpop.permute.xlu0 %715 }
 0xe1e   : > { %732 = vst.msk [vmem:[#allocation2 + $0x71] sm:$0x1] %vm528_vm2, %v716_v48  ;;  %2321 = vrot.lane.b32.xlu1 %v8274_v13, %s6605_s19 }
 0xe21   : > { %v972_v59 = vpop.permute.xlu0 %971  ;;  %v5394_v45 = vld [vmem:[#allocation3 + $0x70] sm:$0xff] }
 0xe22   : > { %988 = vst.msk [vmem:[#allocation2 + $0x73] sm:$0x1] %vm528_vm2, %v972_v59  ;;  %v1762_v59 = vrot.slane %v7137_v12, %v6740_v41 }
 0xe24   : > { %v6312_v39 = vpop.f32.mrf.mxu1 }
 0xe25   : > { %5985 = vst.msk [vmem:[%s7442_s9 + $0x58] sm:$0xff] %vm2410_vm3, %v6312_v39  ;;  %v1164_v7 = vpop.permute.xlu0 %1163  ;;  %v796_v39 = vrot.slane %v7119_v10, %v6740_v41 }
 0xe26   : > { %1180 = vst.msk [vmem:[#allocation2 + $0x75] sm:$0x1] %vm528_vm2, %v1164_v7  ;;  %v4951_v9 = vpop.f32.mrf.mxu1 }
 0xe27   : > { %5984 = vst.msk [vmem:[%s7442_s9 + $0x50] sm:$0xff] %vm2410_vm3, %v4951_v9 }
 0xe29   : > { %v1356_v16 = vpop.permute.xlu0 %1355 }
 0xe2a   : > { %1372 = vst.msk [vmem:[#allocation2 + $0x77] sm:$0x1] %vm528_vm2, %v1356_v16 }
 0xe2d   : > { %v1842_v42 = vpop.permute.xlu0 %1841 }
 0xe2e   : > { %1858 = vst.msk [vmem:[#allocation2 + $0x7a] sm:$0x1] %vm528_vm2, %v1842_v42 }
 0xe31   : > { %v2034_v8 = vpop.permute.xlu0 %2033  ;;  %v8346_v25 = vld [vmem:[#allocation2 + $0x70] sm:$0xff] }
 0xe32   : > { %2050 = vst.msk [vmem:[#allocation2 + $0x7c] sm:$0x1] %vm528_vm2, %v2034_v8 }
 0xe35   : > { %v2226_v20 = vpop.permute.xlu0 %2225 }
 0xe36   : > { %2242 = vst.msk [vmem:[#allocation2 + $0x7e] sm:$0x1] %vm528_vm2, %v2226_v20 }
 0xe58   : > { %v5099_v36 = vpop.trf.xlu0 }
 0xe59   : > { %6324 = vmatprep.mubr.msk.f32.mxu1 %vm2410_vm3, %v5099_v36 }
 0xe5c   : > { %v5100_v4 = vpop.trf.xlu0 }
 0xe5d   : > { %6325 = vmatmul.mubr.msk.f32.vlgmr.msra.gmra.mxu1 %vm2410_vm3, %v5100_v4 }
 0xe5e   : > { %6328 = vmatpush3.msra.mxu1 %v4971_v5 }
 0xe5f   : > { %6329 = vmatprep.subr.mxu1 %v4970_v17 }
 0xe60   : > { %6330 = vmatpush3.msra.mxu1 %v4970_v17 }
 0xe61   : > { %6341 = vmatprep.subr.msk.mxu1 %vm2410_vm3, %v8339_v33 }
 0xe92   : > { %v5078_v32 = vpop.xlane.xlu1 %5077 }
 0xe93   : > { %6510 = vrcp.f32 %v5078_v32 }
 0xe96   : > { %v5075_v23 = vpop.xlane.xlu1 %5074 }
 0xe97   : > { %6512 = vrcp.f32 %v5075_v23 }
 0xe9a   : > { %v2322_v28 = vpop.permute.xlu1 %2321 }
 0xe9b   : > { %2338 = vst.msk [vmem:[#allocation2 + $0x7f] sm:$0x1] %vm528_vm2, %v2322_v28 }
 0xea0   : > { %v6511_v37 = vpop.eup %6510 }
 0xea1   : > { %v5082_v27 = vmul.f32 %v6511_v37, %v6507_v57 }
 0xea2   : > { %v8354_v55 = vld [vmem:[#allocation2 + $0x78] sm:$0xff] }
 0xea4   : > { %v6513_v15 = vpop.eup %6512 }
 0xea5   : > { %v5081_v35 = vmul.f32 %v6513_v15, %v6509_v51 }
 0xea7   : > { %6331 = vmatprep.mubr.msk.f32.mxu1 %vm2410_vm3, %v5081_v35 }
 0xea8   : > { %6332 = vmatmul.mubr.msk.f32.vlgmr.msra.gmra.mxu1 %vm2410_vm3, %v5082_v27 }
 0xea9   : > { %6342 = vmatpush3.xpose.msk.msra.mxu1 %vm2410_vm3, %v8339_v33  ;;  %6345 = vmatprep.mubr.msk.f32.mxu1 %vm2410_vm3, %v8346_v25 }
 0xeaa   : > { %6343 = vmatprep.subr.msk.mxu1 %vm2410_vm3, %v5394_v45 }
 0xead   : > { %6344 = vmatpush3.xpose.msk.msra.mxu1 %vm2410_vm3, %v5394_v45 }
 0xeb0   : > { %6346 = vmatmul.mubr.msk.f32.vlgmr.msra.gmra.mxu1 %vm2410_vm3, %v8354_v55 }
 0xf1d   : > { %v6326_v50 = vpop.f32.mrf.mxu1 }
 0xf1e   : > { %v5197_v52 = vmul.f32 0.35355338, %v6326_v50 }
 0xf1f   : > { %v5187_v46 = vpop.f32.mrf.mxu1 }
 0xf20   : > { %v5199_v18 = vsel %vm2410_vm3, %v5197_v52, -inf  ;;  %v5196_v47 = vmul.f32 0.35355338, %v5187_v46 }
 0xf22   : > { %v5198_v24 = vsel %vm2410_vm3, %v5196_v47, -inf }
 0xf23   : > { %v5200_v58 = vmax.f32 %v5198_v24, %v5199_v18 }
 0xf25   : > { %v5201_v38 = vrot.slane %v5200_v58, 4 }
 0xf27   : > { %v5202_v56 = vmax.f32 %v5200_v58, %v5201_v38 }
 0xf29   : > { %v5203_v19 = vrot.slane %v5202_v56, 2 }
 0xf2b   : > { %v5204_v13 = vmax.f32 %v5202_v56, %v5203_v19 }
 0xf2d   : > { %v5205_v60 = vrot.slane %v5204_v13, 1 }
 0xf2f   : > { %v5206_v2 = vmax.f32 %v5204_v13, %v5205_v60 }
 0xf31   : > { %v5207_v44 = vsub.f32 %v5196_v47, %v5206_v2  ;;  %v5208_v53 = vsub.f32 %v5197_v52, %v5206_v2 }
 0xf33   : > { %v5209_v6 = vmul.f32 1.442695, %v5207_v44  ;;  %v5211_v40 = vmul.f32 1.442695, %v5208_v53 }
 0xf35   : > { %6514 = vpow2.f32 %v5209_v6 }
 0xf36   : > { %6516 = vpow2.f32 %v5211_v40 }
 0xf42   : > { %v6515_v0 = vpop.eup %6514 }
 0xf43   : > { %v6517_v1 = vpop.eup %6516  ;;  %v5213_v34 = vsel %vm2410_vm3, %v6515_v0, 0.0 }
 0xf44   : > { %v5214_v54 = vsel %vm2410_vm3, %v6517_v1, 0.0 }
 0xf45   : > { %v5215_v21 = vadd.f32 %v5214_v54, %v5213_v34 }
 0xf47   : > { %v5216_v5 = vrot.slane %v5215_v21, 4 }
 0xf49   : > { %v5217_v31 = vadd.f32 %v5216_v5, %v5215_v21 }
 0xf4b   : > { %v5218_v49 = vrot.slane %v5217_v31, 2 }
 0xf4d   : > { %v5219_v57 = vadd.f32 %v5218_v49, %v5217_v31 }
 0xf4f   : > { %v5220_v61 = vrot.slane %v5219_v57, 1 }
 0xf51   : > { %v5221_v62 = vadd.f32 %v5220_v61, %v5219_v57 }
 0xf53   : > { %6518 = vrcp.f32 %v5221_v62 }
 0xf60   : > { %v6519_v51 = vpop.eup %6518 }
 0xf61   : > { %v5224_v29 = vmul.f32 %v6519_v51, %v6517_v1  ;;  %v5223_v14 = vmul.f32 %v6519_v51, %v6515_v0 }
 0xf63   : > { %6334 = vmatprep.subr.mxu0 %v5224_v29 }
 0xf64   : > { %6335 = vmatpush3.msra.mxu0 %v5224_v29 }
 0xf65   : > { %6336 = vmatprep.subr.mxu0 %v5223_v14 }
 0xf66   : > { %6337 = vmatpush3.msra.mxu0 %v5223_v14 }
 0xf67   : > { %6348 = vmatprep.subr.mxu0 %v8339_v33 }
 0xf68   : > { %v6333_v11 = vpop.f32.mrf.mxu1 }
 0xf6a   : > { %v5297_v63 = vpop.f32.mrf.mxu1 }
 0xf6b   : > { %6338 = vmatprep.mubr.msk.f32.mxu0 %vm2410_vm3, %v5297_v63 }
 0xf6c   : > { %6339 = vmatmul.mubr.msk.f32.vlgmr.msra.gmra.mxu0 %vm2410_vm3, %v6333_v11 }
 0xf6d   : > { %6349 = vmatpush3.msra.mxu0 %v8339_v33 }
 0xf6e   : > { %6350 = vmatprep.subr.mxu0 %v5394_v45 }
 0xf6f   : > { %6351 = vmatpush3.msra.mxu0 %v5394_v45 }
 0xf70   : > { %v6347_v26 = vpop.f32.mrf.mxu1 }
 0xf71   : > { %v5487_v30 = vmul.f32 0.35355338, %v6347_v26 }
 0xf72   : > { %v5477_v22 = vpop.f32.mrf.mxu1 }
 0xf73   : > { %v5486_v43 = vmul.f32 0.35355338, %v5477_v22  ;;  %v5491_v3 = vsel %vm2410_vm3, %v5487_v30, -inf }
 0xf74   : > { %5492 = vmax.xlane.f32.xlu0 %v5491_v3 }
 0xf75   : > { %v5488_v48 = vsel %vm2410_vm3, %v5486_v43, -inf }
 0xf76   : > { %5489 = vmax.xlane.f32.xlu1 %v5488_v48 }
 0xf8a   : > { %1793 = vrot.lane.b32.xlu0 %v1762_v59, %s6600_s14 }
 0xf8e   : > { %1985 = vrot.lane.b32.xlu0 %v1762_v59, %s6602_s16 }
 0xf92   : > { %2081 = vrot.lane.b32.xlu0 %v1762_v59, %s6601_s15 }
 0xf96   : > { %2177 = vrot.lane.b32.xlu0 %v1762_v59, %s6604_s18 }
 0xf9a   : > { %2273 = vrot.lane.b32.xlu0 %v1762_v59, %s6603_s17 }
 0xf9e   : > { %827 = vrot.lane.b32.xlu0 %v796_v39, %s6600_s14  ;;  %s8423_s14 = scalar_lea.hbm %s8479_s6, %s6016_s10 }
 0xfa2   : > { %1019 = vrot.lane.b32.xlu0 %v796_v39, %s6602_s16  ;;  %s6606_s16 = smov [#allocation4]  }
 0xfa6   : > { %1211 = vrot.lane.b32.xlu0 %v796_v39, %s6604_s18 }
 0xfa9   : > { %5510 = vxpose.xlu1.b32.start [1/2] (short) (narrow) %v8346_v25, 16 }
 0xfad   : > { %5511 = vxpose.xlu1.b32.end [2/2] (short) (narrow) %v8354_v55, 16 }
 0xfcb   : > { %1889 = vrot.lane.b32.xlu1 %v1762_v59, %s6599_s13 }
 0xfcf   : > { %2369 = vrot.lane.b32.xlu1 %v1762_v59, %s6605_s19 }
 0xfd3   : > { %923 = vrot.lane.b32.xlu1 %v796_v39, %s6599_s13 }
 0xfd7   : > { %1115 = vrot.lane.b32.xlu1 %v796_v39, %s6601_s15  ;;  %s8433_s15 = scalar_lea.sflag [#allocation5], %s257_s28 }
 0xfdb   : > { %1307 = vrot.lane.b32.xlu1 %v796_v39, %s6603_s17  ;;  %s6538_s17 = sshll.u32 %s6606_s16, 4  ;;  %s6539_s17 = int_to_ptr.vmem [resolvable:$false] %s6538_s17 }
 0xfdc   : > { %s6540_s18 = scalar_lea.vmem %s6539_s17, 4096  ;;  %p6541_p0 = scmp.lt.s32.totalorder %s8425_s11, %s6539_s17 }
 0xfdd   : > { %p6542_p1 = scmp.lt.s32.totalorder %s6540_s18, %s6534_s25 }
 0xfdf   : > { %p6543_p2 = por %p6542_p1, %p6541_p0 }
 0xfe1   : > { %p6544_p3 = pnand %p6543_p2, %p6537_p13 }
 0xffd   : > { %v5493_v41 = vpop.xlane.xlu0 %5492 }
 0xffe   : > { %v5495_v10 = vsub.f32 %v5487_v30, %v5493_v41 }
 0xfff   : > { %v5490_v12 = vpop.xlane.xlu1 %5489 }
0x1000   : > { %v5498_v7 = vmul.f32 1.442695, %v5495_v10  ;;  %v5494_v9 = vsub.f32 %v5486_v43, %v5490_v12 }
0x1001   : > { %v1794_v16 = vpop.permute.xlu0 %1793 }
0x1002   : > { %6520 = vpow2.f32 %v5498_v7  ;;  %v5496_v42 = vmul.f32 1.442695, %v5494_v9  ;;  %1826 = vst.msk [vmem:[#allocation3 + $0xf9] sm:$0x1] %vm528_vm2, %v1794_v16 }
0x1004   : > { %6522 = vpow2.f32 %v5496_v42 }
0x1005   : > { %v1986_v8 = vpop.permute.xlu0 %1985 }
0x1006   : > { %2018 = vst.msk [vmem:[#allocation3 + $0xfb] sm:$0x1] %vm528_vm2, %v1986_v8 }
0x1009   : > { %v2082_v20 = vpop.permute.xlu0 %2081 }
0x100a   : > { %2114 = vst.msk [vmem:[#allocation3 + $0xfc] sm:$0x1] %vm528_vm2, %v2082_v20 }
0x100d   : > { %v2178_v36 = vpop.permute.xlu0 %2177 }
0x100e   : > { %2210 = vst.msk [vmem:[#allocation3 + $0xfd] sm:$0x1] %vm528_vm2, %v2178_v36 }
0x100f   : > { %v6521_v4 = vpop.eup %6520 }
0x1010   : > { %v5503_v17 = vsel %vm2410_vm3, %v6521_v4, 0.0 }
0x1011   : > { %v6523_v33 = vpop.eup %6522  ;;  %5504 = vadd.xlane.f32.xlu0 %v5503_v17  ;;  %v2274_v32 = vpop.permute.xlu0 %2273 }
0x1012   : > { %2306 = vst.msk [vmem:[#allocation3 + $0xfe] sm:$0x1] %vm528_vm2, %v2274_v32  ;;  %v5500_v23 = vsel %vm2410_vm3, %v6523_v33, 0.0 }
0x1015   : > { %v828_v28 = vpop.permute.xlu0 %827  ;;  %5501 = vadd.xlane.f32.xlu0 %v5500_v23 }
0x1016   : > { %860 = vst.msk [vmem:[#allocation3 + $0xf1] sm:$0x1] %vm528_vm2, %v828_v28 }
0x1019   : > { %v1020_v37 = vpop.permute.xlu0 %1019 }
0x101a   : > { %1052 = vst.msk [vmem:[#allocation3 + $0xf3] sm:$0x1] %vm528_vm2, %v1020_v37 }
0x101d   : > { %v1212_v15 = vpop.permute.xlu0 %1211 }
0x101e   : > { %1244 = vst.msk [vmem:[#allocation3 + $0xf5] sm:$0x1] %vm528_vm2, %v1212_v15 }
0x1025   : > { %v5526_v35 = vpop.trf.xlu1 }
0x1026   : > { %6352 = vmatprep.mubr.msk.f32.mxu0 %vm2410_vm3, %v5526_v35 }
0x1029   : > { %v5527_v27 = vpop.trf.xlu1 }
0x102a   : > { %6353 = vmatmul.mubr.msk.f32.vlgmr.msra.gmra.mxu0 %vm2410_vm3, %v5527_v27 }
0x102b   : > { %1403 = vrot.lane.b32.xlu0 %v796_v39, %s6605_s19 }
0x102c   : > { %v6340_v25 = vpop.f32.mrf.mxu0 }
0x102d   : > { %5997 = vst.msk [vmem:[%s7442_s9 + $0x68] sm:$0xff] %vm2410_vm3, %v6340_v25 }
0x102e   : > { %v5378_v45 = vpop.f32.mrf.mxu0 }
0x102f   : > { %5996 = vst.msk [vmem:[%s7442_s9 + $0x60] sm:$0xff] %vm2410_vm3, %v5378_v45 }
0x103d   : > { %v1890_v55 = vpop.permute.xlu1 %1889 }
0x103e   : > { %1922 = vst.msk [vmem:[#allocation3 + $0xfa] sm:$0x1] %vm528_vm2, %v1890_v55 }
0x1041   : > { %v2370_v50 = vpop.permute.xlu1 %2369 }
0x1042   : > { %2402 = vst.msk [vmem:[#allocation3 + $0xff] sm:$0x1] %vm528_vm2, %v2370_v50 }
0x1045   : > { %v924_v52 = vpop.permute.xlu1 %923 }
0x1046   : > { %956 = vst.msk [vmem:[#allocation3 + $0xf2] sm:$0x1] %vm528_vm2, %v924_v52 }
0x1049   : > { %v1116_v46 = vpop.permute.xlu1 %1115  ;;  %v5398_v18 = vld [vmem:[#allocation3 + $0xf8] sm:$0xff] }
0x104a   : > { %1148 = vst.msk [vmem:[#allocation3 + $0xf4] sm:$0x1] %vm528_vm2, %v1116_v46  ;;  %6355 = vmatprep.subr.mxu0 %v5398_v18 }
0x104b   : > { %6356 = vmatpush3.msra.mxu0 %v5398_v18 }
0x104d   : > { %v1308_v47 = vpop.permute.xlu1 %1307 }
0x104e   : > { %1340 = vst.msk [vmem:[#allocation3 + $0xf6] sm:$0x1] %vm528_vm2, %v1308_v47 }
0x109a   : > { %v5505_v24 = vpop.xlane.xlu0 %5504 }
0x109b   : > { %6524 = vrcp.f32 %v5505_v24 }
0x109e   : > { %v5502_v58 = vpop.xlane.xlu0 %5501 }
0x109f   : > { %6526 = vrcp.f32 %v5502_v58 }
0x10a2   : > { %v1404_v38 = vpop.permute.xlu0 %1403 }
0x10a3   : > { %1436 = vst.msk [vmem:[#allocation3 + $0xf7] sm:$0x1] %vm528_vm2, %v1404_v38 }
0x10a8   : > { %v6525_v19 = vpop.eup %6524 }
0x10a9   : > { %v5509_v2 = vmul.f32 %v6525_v19, %v6521_v4 }
0x10aa   : > { %v5397_v56 = vld [vmem:[#allocation3 + $0xf0] sm:$0xff] }
0x10ab   : > { %6357 = vmatprep.subr.mxu0 %v5397_v56 }
0x10ac   : > { %v6527_v13 = vpop.eup %6526  ;;  %6358 = vmatpush3.msra.mxu0 %v5397_v56 }
0x10ad   : > { %v5508_v60 = vmul.f32 %v6527_v13, %v6523_v33 }
0x10af   : > { %6359 = vmatprep.mubr.msk.f32.mxu0 %vm2410_vm3, %v5508_v60 }
0x10b0   : > { %6360 = vmatmul.mubr.msk.f32.vlgmr.msra.gmra.mxu0 %vm2410_vm3, %v5509_v2 }
0x10ea   : > { %v6354_v44 = vpop.f32.mrf.mxu0 }
0x10eb   : > { %v5624_v53 = vmul.f32 0.35355338, %v6354_v44 }
0x10ec   : > { %v5614_v6 = vpop.f32.mrf.mxu0 }
0x10ed   : > { %v5626_v40 = vsel %vm2410_vm3, %v5624_v53, -inf  ;;  %v5623_v0 = vmul.f32 0.35355338, %v5614_v6 }
0x10ef   : > { %v5625_v1 = vsel %vm2410_vm3, %v5623_v0, -inf }
0x10f0   : > { %v5627_v34 = vmax.f32 %v5625_v1, %v5626_v40 }
0x10f2   : > { %v5628_v54 = vrot.slane %v5627_v34, 4 }
0x10f4   : > { %v5629_v21 = vmax.f32 %v5627_v34, %v5628_v54 }
0x10f6   : > { %v5630_v5 = vrot.slane %v5629_v21, 2 }
0x10f8   : > { %v5631_v31 = vmax.f32 %v5629_v21, %v5630_v5 }
0x10fa   : > { %v5632_v49 = vrot.slane %v5631_v31, 1 }
0x10fc   : > { %v5633_v57 = vmax.f32 %v5631_v31, %v5632_v49 }
0x10fe   : > { %v5634_v61 = vsub.f32 %v5623_v0, %v5633_v57  ;;  %v5635_v62 = vsub.f32 %v5624_v53, %v5633_v57 }
0x1100   : > { %v5636_v51 = vmul.f32 1.442695, %v5634_v61  ;;  %v5638_v29 = vmul.f32 1.442695, %v5635_v62 }
0x1102   : > { %6528 = vpow2.f32 %v5636_v51 }
0x1103   : > { %6530 = vpow2.f32 %v5638_v29 }
0x110f   : > { %v6529_v14 = vpop.eup %6528 }
0x1110   : > { %v6531_v11 = vpop.eup %6530  ;;  %v5640_v63 = vsel %vm2410_vm3, %v6529_v14, 0.0 }
0x1111   : > { %v5641_v26 = vsel %vm2410_vm3, %v6531_v11, 0.0 }
0x1112   : > { %v5642_v30 = vadd.f32 %v5641_v26, %v5640_v63 }
0x1114   : > { %v5643_v22 = vrot.slane %v5642_v30, 4 }
0x1116   : > { %v5644_v43 = vadd.f32 %v5643_v22, %v5642_v30 }
0x1118   : > { %v5645_v3 = vrot.slane %v5644_v43, 2 }
0x111a   : > { %v5646_v48 = vadd.f32 %v5645_v3, %v5644_v43 }
0x111c   : > { %v5647_v59 = vrot.slane %v5646_v48, 1 }
0x111e   : > { %v5648_v39 = vadd.f32 %v5647_v59, %v5646_v48 }
0x1120   : > { %6532 = vrcp.f32 %v5648_v39 }
0x112d   : > { %v6533_v41 = vpop.eup %6532 }
0x112e   : > { %v5651_v10 = vmul.f32 %v6533_v41, %v6531_v11  ;;  %v5650_v12 = vmul.f32 %v6533_v41, %v6529_v14 }
0x1130   : > { %6362 = vmatprep.subr.mxu1 %v5651_v10 }
0x1131   : > { %6363 = vmatpush3.msra.mxu1 %v5651_v10 }
0x1132   : > { %6364 = vmatprep.subr.mxu1 %v5650_v12 }
0x1133   : > { %6365 = vmatpush3.msra.mxu1 %v5650_v12 }
0x1170   : > { %v6361_v7 = vpop.f32.mrf.mxu0 }
0x1172   : > { %v5724_v9 = vpop.f32.mrf.mxu0 }
0x1173   : > { %6366 = vmatprep.mubr.msk.f32.mxu1 %vm2410_vm3, %v5724_v9 }
0x1174   : > { %6367 = vmatmul.mubr.msk.f32.vlgmr.msra.gmra.mxu1 %vm2410_vm3, %v6361_v7 }
0x1234   : > { %v6368_v16 = vpop.f32.mrf.mxu1 }
0x1235   : > { %6009 = vst.msk [vmem:[%s7442_s9 + $0x78] sm:$0xff] %vm2410_vm3, %v6368_v16 }
0x1236   : > { %v5805_v42 = vpop.f32.mrf.mxu1 }
0x1237   : > { %6008 = vst.msk [vmem:[%s7442_s9 + $0x70] sm:$0xff] %vm2410_vm3, %v5805_v42 }
0x1238   : > { %6547 = shalt.err (!%p6544_p3)
}
0x1239   : > { %s6548_s19 = scalar_lea.hbm %s8423_s14, 2048  ;;  %s6552_s28 = scalar_lea.hbm %s8479_s6, 4096 }
0x123a   : > { %p6549_p4 = scmp.ne.s32.totalorder %s8423_s14, %s6548_s19  ;;  %p6553_p9 = scmp.lt.s32.totalorder %s8423_s14, %s8479_s6 }
0x123b   : > { %p6554_p10 = scmp.lt.s32.totalorder %s6552_s28, %s6548_s19 }
0x123c   : > { %p6550_p7 = pnand %p6549_p4, %p6682_p5 }
0x123d   : > { %p6555_p11 = por %p6554_p10, %p6553_p9 }
0x123e   : > { %p6551_p8 = pneg %p6550_p7 }
0x1240   : > { %p6556_p12 = pnand %p6555_p11, %p6551_p8 }
0x1242   : > { %6559 = shalt.err (!%p6556_p12)
}
0x1243   : > { %s6607_s10 = smov 128   ;;  %s6608_s12 = smov 8  }
0x1244   : > { %6370 = dma.vmem_to_hbm [thread:$0]  (%p6682_p5), %s8425_s11, 2048, %s8423_s14, %s8433_s15, %s6607_s10, %s6607_s10, %s6608_s12  }
0x1245 PF: > { %p6376_p13 = scmp.ge.s32.totalorder %s6594_s24, 2  ;;  %s5846_s13 = sand.u32 1, %s6582_s21  }
0x1246   : > { %s5847_s25 = scalar_lea.sflag [#allocation5], %s5846_s13 }
0x1247   : > { %p6373_p0 = pnand %p6376_p13, %p6686_p6 }
0x1249   : > { %p6374_p1 = pneg %p6373_p0 }
0x124b   : > { %6577 = dma.done.wait (%p6374_p1), %s5847_s25, 2048  }
0x124c   : > { %6579 = vsyncadd (%p6374_p1), %s5847_s25, 4294965248  ;;  %p16_p2 = scmp.ge.s32.totalorder %s6669_s27, 4   ;;  %s8482_s21 = smov %s6586_s22 }
0x124d   : > { %s8483_s22 = smov %s6590_s23  ;;  %s8484_s23 = smov %s6680_s30 }
0x124e   : > { %s8485_s24 = smov %s6669_s27  ;;  %18 = sbr.rel (!%p16_p2) target bundleno = 3 (0x3), region = 111 }
0x1253   :  { %5852 = vsyncpa [#allocation5], 1 }
0x1254   :  { %5854 = vsyncpa [#allocation5 + $0x1], 1 }

</bundles_post_ra>
